<compile_context>
chip_gen: v7x
topology: tpu7x:2x2x1
jax: 0.10.0
libtpu: 0.0.40
codegen_flags: <defaults>
</compile_context>

<pallas_src>
import functools
import math

import jax
import jax.numpy as jnp
from jax.experimental import pallas as pl
from jax.experimental.pallas import tpu as pltpu

D_MODEL = 32
NHEAD = 4
HEAD_DIM = D_MODEL // NHEAD
NUM_LAYERS = 2
DIM_FF = 128
LN_EPS = 1e-5
OUT_LANES = 128  # lane-dense output slab width


# ------------------------------ kernel helpers -------------------------------
def _layer_norm(y, g, b):
    mu = jnp.mean(y, axis=-1, keepdims=True)
    var = jnp.mean((y - mu) ** 2, axis=-1, keepdims=True)
    return (y - mu) * jax.lax.rsqrt(var + LN_EPS) * g + b


def _softmax_rows(s):
    # approx reciprocal lowers to the EUP slot (VALU-free); ~2^-12 rel. error.
    s = s - jnp.max(s, axis=-1, keepdims=True)
    p = jnp.exp(s)
    return p * pl.reciprocal(jnp.sum(p, axis=-1, keepdims=True), approx=True)


def _bf16(x):
    return x.astype(jnp.bfloat16)


# ------------------------------ fused forward --------------------------------
def _fused_forward_kernel(
    x_ref, emb_w_ref, emb_b_ref,
    wq_ref, wk_ref, wv_ref, bq_ref, bk_ref, bv_ref, wo_ref, bo_ref,
    g1_ref, bt1_ref, wff1_ref, bff1_ref, wff2_ref, bff2_ref, g2_ref, bt2_ref,
    hw1_ref, hb1_ref, hw2_ref, hb2_ref,
    o_ref,
    *, B, S,
):
    D = D_MODEL
    HD = HEAD_DIM
    T = B * S
    scale = 1.0 / math.sqrt(HD)

    # Embedding (token-wise Linear) on the [T, F] slab (flattened in the wrapper).
    h = (jnp.dot(_bf16(x_ref[...]), emb_w_ref[...],
                 preferred_element_type=jnp.float32) + emb_b_ref[...])

    for l in range(NUM_LAYERS):
        last_only = l == NUM_LAYERS - 1

        h_bf = _bf16(h)
        if last_only:
            # Only the last token feeds the regression head: project Q / take the
            # residual / run the FFN for that single row per batch element.
            resid = h.reshape(B, S, D)[:, S - 1, :]          # [B, D]
            q_rows_bf = _bf16(resid)
            Sq, rows = 1, B
        else:
            resid = h                                        # [T, D]
            q_rows_bf = h_bf
            Sq, rows = S, T

        # Tile-aligned Q/K/V projections (bf16 in, f32 accumulate).
        q = jnp.dot(q_rows_bf, wq_ref[l], preferred_element_type=jnp.float32) + bq_ref[l]
        k = jnp.dot(h_bf, wk_ref[l], preferred_element_type=jnp.float32) + bk_ref[l]
        v = jnp.dot(h_bf, wv_ref[l], preferred_element_type=jnp.float32) + bv_ref[l]
        q3 = q.reshape(B, Sq, D)
        k3 = k.reshape(B, S, D)
        v3 = v.reshape(B, S, D)

        # Per-head attention (statically unrolled, see module-level TODO).
        ctx_heads = []
        for hh in range(NHEAD):
            sl = slice(hh * HD, (hh + 1) * HD)
            s = jnp.einsum("bqd,bkd->bqk", _bf16(q3[:, :, sl]), _bf16(k3[:, :, sl]),
                           preferred_element_type=jnp.float32) * scale      # [B, Sq, S]
            p = _softmax_rows(s)
            ctx = jnp.einsum("bqk,bkd->bqd", _bf16(p), _bf16(v3[:, :, sl]),
                             preferred_element_type=jnp.float32)            # [B, Sq, HD]
            ctx_heads.append(ctx.reshape(rows, HD))
        ctx_all = jnp.concatenate(ctx_heads, axis=-1)                       # [rows, D]
        attn = (jnp.dot(_bf16(ctx_all), wo_ref[l],
                        preferred_element_type=jnp.float32) + bo_ref[l])

        # Residual + LayerNorm1 (post-norm), FFN (ReLU), residual + LayerNorm2.
        # TODO(synk): dropout layers are identity here (eval-mode semantics).
        y = _layer_norm(resid + attn, g1_ref[l], bt1_ref[l])
        ff = (jnp.dot(_bf16(y), wff1_ref[l], preferred_element_type=jnp.float32)
              + bff1_ref[l])
        ff = jnp.maximum(ff, 0.0)
        ff = (jnp.dot(_bf16(ff), wff2_ref[l], preferred_element_type=jnp.float32)
              + bff2_ref[l])
        h = _layer_norm(y + ff, g2_ref[l], bt2_ref[l])
        # After the final layer, h holds the last-token features [B, D].

    # --- regression head: Linear(D, FF) -> ReLU -> Linear(FF, 1) ---
    r = jnp.dot(_bf16(h), hw1_ref[...], preferred_element_type=jnp.float32) + hb1_ref[...]
    r = jnp.maximum(r, 0.0)
    # Final [B,128]x[128,1] dot stays f32 (tiny; avoids narrow bf16 layout corner cases).
    r = jnp.dot(r, hw2_ref[...], preferred_element_type=jnp.float32) + hb2_ref[...]  # [B,1]

    # Lane-dense store: broadcast the per-row scalar across the 128-lane slab.
    o_ref[...] = jnp.broadcast_to(r, o_ref.shape).astype(o_ref.dtype)


def _full_spec(arr):
    nd = arr.ndim
    return pl.BlockSpec(arr.shape, lambda i, nd=nd: (0,) * nd)


@functools.partial(jax.jit, static_argnames=("B", "S"))
def _transformer_regressor_impl(x2d, p, *, B, S):
    args = (
        x2d,
        p["emb_w"], p["emb_b"],
        p["w_q"], p["w_k"], p["w_v"], p["b_q"], p["b_k"], p["b_v"],
        p["w_o"], p["b_o"],
        p["ln1_g"], p["ln1_b"], p["w_ff1"], p["b_ff1"], p["w_ff2"], p["b_ff2"],
        p["ln2_g"], p["ln2_b"],
        p["head_w1"], p["head_b1"], p["head_w2"], p["head_b2"],
    )
    out = pl.pallas_call(
        functools.partial(_fused_forward_kernel, B=B, S=S),
        out_shape=jax.ShapeDtypeStruct((B, OUT_LANES), jnp.float32),
        grid=(1,),
        in_specs=[_full_spec(a) for a in args],
        out_specs=pl.BlockSpec((B, OUT_LANES), lambda i: (0, 0)),
        compiler_params=pltpu.CompilerParams(dimension_semantics=("arbitrary",)),
    )(*args)
    # Column 0 of the lane-dense slab is the regression output; return shape (B,)
    # (matches PyTorch's .squeeze() for B > 1).
    return out[:, 0]


def transformer_regressor(x, p):
    B, S, F = x.shape
    # Flatten [B,S,F] -> [B*S,F] in the wrapper (free metadata; avoids an in-kernel
    # reshape that could materialize a VMEM copy).
    return _transformer_regressor_impl(x.reshape(B * S, F), p, B=B, S=S)


# --------------------------- parameters & packing -----------------------------
def init_params(key, input_dim):
    keys = iter(jax.random.split(key, 64))

    def dense(k, fan_in, fan_out):
        return jax.random.normal(k, (fan_in, fan_out), jnp.float32) / jnp.sqrt(
            jnp.float32(fan_in))

    params = {
        "emb_w": dense(next(keys), input_dim, D_MODEL),
        "emb_b": jnp.zeros((D_MODEL,), jnp.float32),
        "layers": [],
        "head_w1": dense(next(keys), D_MODEL, DIM_FF),
        "head_b1": jnp.zeros((DIM_FF,), jnp.float32),
        "head_w2": dense(next(keys), DIM_FF, 1),
        "head_b2": jnp.zeros((1,), jnp.float32),
    }
    for _ in range(NUM_LAYERS):
        params["layers"].append({
            "w_qkv": dense(next(keys), D_MODEL, 3 * D_MODEL),
            "b_qkv": jnp.zeros((3 * D_MODEL,), jnp.float32),
            "w_o": dense(next(keys), D_MODEL, D_MODEL),
            "b_o": jnp.zeros((D_MODEL,), jnp.float32),
            "ln1_g": jnp.ones((D_MODEL,), jnp.float32),
            "ln1_b": jnp.zeros((D_MODEL,), jnp.float32),
            "w_ff1": dense(next(keys), D_MODEL, DIM_FF),
            "b_ff1": jnp.zeros((DIM_FF,), jnp.float32),
            "w_ff2": dense(next(keys), DIM_FF, D_MODEL),
            "b_ff2": jnp.zeros((D_MODEL,), jnp.float32),
            "ln2_g": jnp.ones((D_MODEL,), jnp.float32),
            "ln2_b": jnp.zeros((D_MODEL,), jnp.float32),
        })
    return params


def pack_params(params):
    """Stack per-layer params on a leading layer axis, split QKV into tile-aligned
    Q/K/V blocks, store matmul weights bf16, biases/LN params as f32 rows."""
    L = len(params["layers"])
    D = D_MODEL

    def stack(name):
        return jnp.stack([lp[name] for lp in params["layers"]])

    bf = lambda a: a.astype(jnp.bfloat16)
    row = lambda a: a.reshape(L, 1, -1)

    w_qkv = stack("w_qkv")   # [L, D, 3D]
    b_qkv = stack("b_qkv")   # [L, 3D]

    return {
        "emb_w": bf(params["emb_w"]),
        "emb_b": params["emb_b"].reshape(1, -1),
        "w_q": bf(w_qkv[:, :, 0 * D:1 * D]),
        "w_k": bf(w_qkv[:, :, 1 * D:2 * D]),
        "w_v": bf(w_qkv[:, :, 2 * D:3 * D]),
        "b_q": b_qkv[:, 0 * D:1 * D].reshape(L, 1, D),
        "b_k": b_qkv[:, 1 * D:2 * D].reshape(L, 1, D),
        "b_v": b_qkv[:, 2 * D:3 * D].reshape(L, 1, D),
        "w_o": bf(stack("w_o")),
        "b_o": row(stack("b_o")),
        "ln1_g": row(stack("ln1_g")),
        "ln1_b": row(stack("ln1_b")),
        "w_ff1": bf(stack("w_ff1")),
        "b_ff1": row(stack("b_ff1")),
        "w_ff2": bf(stack("w_ff2")),
        "b_ff2": row(stack("b_ff2")),
        "ln2_g": row(stack("ln2_g")),
        "ln2_b": row(stack("ln2_b")),
        "head_w1": bf(params["head_w1"]),
        "head_b1": params["head_b1"].reshape(1, -1),
        "head_w2": params["head_w2"],                 # kept f32 (final [FF,1] dot)
        "head_b2": params["head_b2"].reshape(1, -1),
    }


if __name__ == "__main__":
    key = jax.random.PRNGKey(0)
    kx, kp = jax.random.split(key)
    B, S, INPUT_DIM = 2, 8, 16
    x = jax.random.normal(kx, (B, S, INPUT_DIM), jnp.float32)
    params = init_params(kp, INPUT_DIM)
    packed = pack_params(params)
    out = transformer_regressor(x, packed)
    jax.block_until_ready(out)
    assert out.shape == (B,), out.shape
    print("KERNEL_OK")
</pallas_src>

<mosaic_0001>
module attributes {stable_mosaic.version = 11 : i64} {
  func.func @_fused_forward_kernel(%arg0: i32, %arg1: memref<16x16xf32, #tpu.memory_space<vmem>>, %arg2: memref<16x32xbf16, #tpu.memory_space<vmem>>, %arg3: memref<1x32xf32, #tpu.memory_space<vmem>>, %arg4: memref<2x32x32xbf16, #tpu.memory_space<vmem>>, %arg5: memref<2x32x32xbf16, #tpu.memory_space<vmem>>, %arg6: memref<2x32x32xbf16, #tpu.memory_space<vmem>>, %arg7: memref<2x1x32xf32, #tpu.memory_space<vmem>>, %arg8: memref<2x1x32xf32, #tpu.memory_space<vmem>>, %arg9: memref<2x1x32xf32, #tpu.memory_space<vmem>>, %arg10: memref<2x32x32xbf16, #tpu.memory_space<vmem>>, %arg11: memref<2x1x32xf32, #tpu.memory_space<vmem>>, %arg12: memref<2x1x32xf32, #tpu.memory_space<vmem>>, %arg13: memref<2x1x32xf32, #tpu.memory_space<vmem>>, %arg14: memref<2x32x128xbf16, #tpu.memory_space<vmem>>, %arg15: memref<2x1x128xf32, #tpu.memory_space<vmem>>, %arg16: memref<2x128x32xbf16, #tpu.memory_space<vmem>>, %arg17: memref<2x1x32xf32, #tpu.memory_space<vmem>>, %arg18: memref<2x1x32xf32, #tpu.memory_space<vmem>>, %arg19: memref<2x1x32xf32, #tpu.memory_space<vmem>>, %arg20: memref<32x128xbf16, #tpu.memory_space<vmem>>, %arg21: memref<1x128xf32, #tpu.memory_space<vmem>>, %arg22: memref<128x1xf32, #tpu.memory_space<vmem>>, %arg23: memref<1x1xf32, #tpu.memory_space<vmem>>, %arg24: memref<2x128xf32, #tpu.memory_space<vmem>>) attributes {dimension_semantics = [#tpu.dimension_semantics<arbitrary>], iteration_bounds = array<i64: 1>, scalar_prefetch = 0 : i64, scratch_operands = 0 : i64, tpu.core_type = #tpu.core_type<tc>, window_params = [{pipeline_mode = #tpu.pipeline_mode<synchronous>, transform_indices = @transform_0, window_bounds = array<i64: 16, 16>}, {pipeline_mode = #tpu.pipeline_mode<synchronous>, transform_indices = @transform_1, window_bounds = array<i64: 16, 32>}, {pipeline_mode = #tpu.pipeline_mode<synchronous>, transform_indices = @transform_2, window_bounds = array<i64: 1, 32>}, {pipeline_mode = #tpu.pipeline_mode<synchronous>, transform_indices = @transform_3, window_bounds = array<i64: 2, 32, 32>}, {pipeline_mode = #tpu.pipeline_mode<synchronous>, transform_indices = @transform_4, window_bounds = array<i64: 2, 32, 32>}, {pipeline_mode = #tpu.pipeline_mode<synchronous>, transform_indices = @transform_5, window_bounds = array<i64: 2, 32, 32>}, {pipeline_mode = #tpu.pipeline_mode<synchronous>, transform_indices = @transform_6, window_bounds = array<i64: 2, 1, 32>}, {pipeline_mode = #tpu.pipeline_mode<synchronous>, transform_indices = @transform_7, window_bounds = array<i64: 2, 1, 32>}, {pipeline_mode = #tpu.pipeline_mode<synchronous>, transform_indices = @transform_8, window_bounds = array<i64: 2, 1, 32>}, {pipeline_mode = #tpu.pipeline_mode<synchronous>, transform_indices = @transform_9, window_bounds = array<i64: 2, 32, 32>}, {pipeline_mode = #tpu.pipeline_mode<synchronous>, transform_indices = @transform_10, window_bounds = array<i64: 2, 1, 32>}, {pipeline_mode = #tpu.pipeline_mode<synchronous>, transform_indices = @transform_11, window_bounds = array<i64: 2, 1, 32>}, {pipeline_mode = #tpu.pipeline_mode<synchronous>, transform_indices = @transform_12, window_bounds = array<i64: 2, 1, 32>}, {pipeline_mode = #tpu.pipeline_mode<synchronous>, transform_indices = @transform_13, window_bounds = array<i64: 2, 32, 128>}, {pipeline_mode = #tpu.pipeline_mode<synchronous>, transform_indices = @transform_14, window_bounds = array<i64: 2, 1, 128>}, {pipeline_mode = #tpu.pipeline_mode<synchronous>, transform_indices = @transform_15, window_bounds = array<i64: 2, 128, 32>}, {pipeline_mode = #tpu.pipeline_mode<synchronous>, transform_indices = @transform_16, window_bounds = array<i64: 2, 1, 32>}, {pipeline_mode = #tpu.pipeline_mode<synchronous>, transform_indices = @transform_17, window_bounds = array<i64: 2, 1, 32>}, {pipeline_mode = #tpu.pipeline_mode<synchronous>, transform_indices = @transform_18, window_bounds = array<i64: 2, 1, 32>}, {pipeline_mode = #tpu.pipeline_mode<synchronous>, transform_indices = @transform_19, window_bounds = array<i64: 32, 128>}, {pipeline_mode = #tpu.pipeline_mode<synchronous>, transform_indices = @transform_20, window_bounds = array<i64: 1, 128>}, {pipeline_mode = #tpu.pipeline_mode<synchronous>, transform_indices = @transform_21, window_bounds = array<i64: 128, 1>}, {pipeline_mode = #tpu.pipeline_mode<synchronous>, transform_indices = @transform_22, window_bounds = array<i64: 1, 1>}, {pipeline_mode = #tpu.pipeline_mode<synchronous>, transform_indices = @transform_23, window_bounds = array<i64: 2, 128>}]} {
    %c0 = arith.constant 0 : index
    %c0_0 = arith.constant 0 : index
    %0 = vector.load %arg1[%c0, %c0_0] : memref<16x16xf32, #tpu.memory_space<vmem>>, vector<16x16xf32>
    %1 = arith.truncf %0 : vector<16x16xf32> to vector<16x16xbf16>
    %c0_1 = arith.constant 0 : index
    %c0_2 = arith.constant 0 : index
    %2 = vector.load %arg2[%c0_1, %c0_2] : memref<16x32xbf16, #tpu.memory_space<vmem>>, vector<16x32xbf16>
    %cst = arith.constant dense<0.000000e+00> : vector<16x32xf32>
    %3 = tpu.matmul %1, %2, %cst {dimension_numbers = #tpu.dot_dimension_numbers<[1], [0], [0], [1], [0, 0, 1, 1], [], []>} : vector<16x16xbf16>, vector<16x32xbf16>, vector<16x32xf32> -> vector<16x32xf32>
    %c0_3 = arith.constant 0 : index
    %c0_4 = arith.constant 0 : index
    %4 = vector.load %arg3[%c0_3, %c0_4] : memref<1x32xf32, #tpu.memory_space<vmem>>, vector<1x32xf32>
    %5 = vector.broadcast %4 : vector<1x32xf32> to vector<16x32xf32>
    %6 = arith.addf %3, %5 : vector<16x32xf32>
    %7 = arith.truncf %6 : vector<16x32xf32> to vector<16x32xbf16>
    %c0_5 = arith.constant 0 : index
    %c0_6 = arith.constant 0 : index
    %c0_7 = arith.constant 0 : index
    %8 = vector.load %arg4[%c0_5, %c0_6, %c0_7] : memref<2x32x32xbf16, #tpu.memory_space<vmem>>, vector<1x32x32xbf16>
    %9 = vector.shape_cast %8 : vector<1x32x32xbf16> to vector<32x32xbf16>
    %cst_8 = arith.constant dense<0.000000e+00> : vector<16x32xf32>
    %10 = tpu.matmul %7, %9, %cst_8 {dimension_numbers = #tpu.dot_dimension_numbers<[1], [0], [0], [1], [0, 0, 1, 1], [], []>} : vector<16x32xbf16>, vector<32x32xbf16>, vector<16x32xf32> -> vector<16x32xf32>
    %c0_9 = arith.constant 0 : index
    %c0_10 = arith.constant 0 : index
    %c0_11 = arith.constant 0 : index
    %11 = vector.load %arg7[%c0_9, %c0_10, %c0_11] : memref<2x1x32xf32, #tpu.memory_space<vmem>>, vector<1x1x32xf32>
    %12 = vector.shape_cast %11 : vector<1x1x32xf32> to vector<1x32xf32>
    %13 = vector.broadcast %12 : vector<1x32xf32> to vector<16x32xf32>
    %14 = arith.addf %10, %13 : vector<16x32xf32>
    %c0_12 = arith.constant 0 : index
    %c0_13 = arith.constant 0 : index
    %c0_14 = arith.constant 0 : index
    %15 = vector.load %arg5[%c0_12, %c0_13, %c0_14] : memref<2x32x32xbf16, #tpu.memory_space<vmem>>, vector<1x32x32xbf16>
    %16 = vector.shape_cast %15 : vector<1x32x32xbf16> to vector<32x32xbf16>
    %cst_15 = arith.constant dense<0.000000e+00> : vector<16x32xf32>
    %17 = tpu.matmul %7, %16, %cst_15 {dimension_numbers = #tpu.dot_dimension_numbers<[1], [0], [0], [1], [0, 0, 1, 1], [], []>} : vector<16x32xbf16>, vector<32x32xbf16>, vector<16x32xf32> -> vector<16x32xf32>
    %c0_16 = arith.constant 0 : index
    %c0_17 = arith.constant 0 : index
    %c0_18 = arith.constant 0 : index
    %18 = vector.load %arg8[%c0_16, %c0_17, %c0_18] : memref<2x1x32xf32, #tpu.memory_space<vmem>>, vector<1x1x32xf32>
    %19 = vector.shape_cast %18 : vector<1x1x32xf32> to vector<1x32xf32>
    %20 = vector.broadcast %19 : vector<1x32xf32> to vector<16x32xf32>
    %21 = arith.addf %17, %20 : vector<16x32xf32>
    %c0_19 = arith.constant 0 : index
    %c0_20 = arith.constant 0 : index
    %c0_21 = arith.constant 0 : index
    %22 = vector.load %arg6[%c0_19, %c0_20, %c0_21] : memref<2x32x32xbf16, #tpu.memory_space<vmem>>, vector<1x32x32xbf16>
    %23 = vector.shape_cast %22 : vector<1x32x32xbf16> to vector<32x32xbf16>
    %cst_22 = arith.constant dense<0.000000e+00> : vector<16x32xf32>
    %24 = tpu.matmul %7, %23, %cst_22 {dimension_numbers = #tpu.dot_dimension_numbers<[1], [0], [0], [1], [0, 0, 1, 1], [], []>} : vector<16x32xbf16>, vector<32x32xbf16>, vector<16x32xf32> -> vector<16x32xf32>
    %c0_23 = arith.constant 0 : index
    %c0_24 = arith.constant 0 : index
    %c0_25 = arith.constant 0 : index
    %25 = vector.load %arg9[%c0_23, %c0_24, %c0_25] : memref<2x1x32xf32, #tpu.memory_space<vmem>>, vector<1x1x32xf32>
    %26 = vector.shape_cast %25 : vector<1x1x32xf32> to vector<1x32xf32>
    %27 = vector.broadcast %26 : vector<1x32xf32> to vector<16x32xf32>
    %28 = arith.addf %24, %27 : vector<16x32xf32>
    %29 = vector.shape_cast %14 : vector<16x32xf32> to vector<2x8x32xf32>
    %30 = vector.shape_cast %21 : vector<16x32xf32> to vector<2x8x32xf32>
    %31 = vector.shape_cast %28 : vector<16x32xf32> to vector<2x8x32xf32>
    %32 = vector.extract_strided_slice %29 {offsets = [0, 0, 0], sizes = [2, 8, 8], strides = [1, 1, 1]} : vector<2x8x32xf32> to vector<2x8x8xf32>
    %33 = arith.truncf %32 : vector<2x8x8xf32> to vector<2x8x8xbf16>
    %34 = vector.extract_strided_slice %30 {offsets = [0, 0, 0], sizes = [2, 8, 8], strides = [1, 1, 1]} : vector<2x8x32xf32> to vector<2x8x8xf32>
    %35 = arith.truncf %34 : vector<2x8x8xf32> to vector<2x8x8xbf16>
    "tpu.trace_start"() <{level = 10 : i32, message = "bqd,bkd->bqk"}> : () -> ()
    %cst_26 = arith.constant dense<0.000000e+00> : vector<2x8x8xf32>
    %36 = tpu.matmul %33, %35, %cst_26 {dimension_numbers = #tpu.dot_dimension_numbers<[2], [2], [1], [1], [0, 0, 0, 1, 1, 1], [0], [0]>} : vector<2x8x8xbf16>, vector<2x8x8xbf16>, vector<2x8x8xf32> -> vector<2x8x8xf32>
    "tpu.trace_stop"() : () -> ()
    %cst_27 = arith.constant 0.353553385 : f32
    %37 = vector.broadcast %cst_27 : f32 to vector<2x8x8xf32>
    %38 = arith.mulf %36, %37 : vector<2x8x8xf32>
    %cst_28 = arith.constant dense<0xFF800000> : vector<2x8xf32>
    %39 = vector.multi_reduction <maximumf>, %38, %cst_28 [2] : vector<2x8x8xf32> to vector<2x8xf32>
    %40 = vector.shape_cast %39 : vector<2x8xf32> to vector<2x8x1xf32>
    %41 = vector.broadcast %40 : vector<2x8x1xf32> to vector<2x8x8xf32>
    %42 = arith.subf %38, %41 : vector<2x8x8xf32>
    %43 = math.exp %42 : vector<2x8x8xf32>
    %cst_29 = arith.constant dense<0.000000e+00> : vector<2x8xf32>
    %44 = vector.multi_reduction <add>, %43, %cst_29 [2] : vector<2x8x8xf32> to vector<2x8xf32>
    %45 = vector.shape_cast %44 : vector<2x8xf32> to vector<2x8x1xf32>
    %46 = tpu.reciprocal %45 {approx = true} : vector<2x8x1xf32> -> vector<2x8x1xf32>
    %47 = vector.broadcast %46 : vector<2x8x1xf32> to vector<2x8x8xf32>
    %48 = arith.mulf %43, %47 : vector<2x8x8xf32>
    %49 = arith.truncf %48 : vector<2x8x8xf32> to vector<2x8x8xbf16>
    %50 = vector.extract_strided_slice %31 {offsets = [0, 0, 0], sizes = [2, 8, 8], strides = [1, 1, 1]} : vector<2x8x32xf32> to vector<2x8x8xf32>
    %51 = arith.truncf %50 : vector<2x8x8xf32> to vector<2x8x8xbf16>
    "tpu.trace_start"() <{level = 10 : i32, message = "bqk,bkd->bqd"}> : () -> ()
    %cst_30 = arith.constant dense<0.000000e+00> : vector<2x8x8xf32>
    %52 = tpu.matmul %49, %51, %cst_30 {dimension_numbers = #tpu.dot_dimension_numbers<[2], [1], [1], [2], [0, 0, 0, 1, 1, 2], [0], [0]>} : vector<2x8x8xbf16>, vector<2x8x8xbf16>, vector<2x8x8xf32> -> vector<2x8x8xf32>
    "tpu.trace_stop"() : () -> ()
    %53 = vector.shape_cast %52 : vector<2x8x8xf32> to vector<16x8xf32>
    %54 = vector.extract_strided_slice %29 {offsets = [0, 0, 8], sizes = [2, 8, 8], strides = [1, 1, 1]} : vector<2x8x32xf32> to vector<2x8x8xf32>
    %55 = arith.truncf %54 : vector<2x8x8xf32> to vector<2x8x8xbf16>
    %56 = vector.extract_strided_slice %30 {offsets = [0, 0, 8], sizes = [2, 8, 8], strides = [1, 1, 1]} : vector<2x8x32xf32> to vector<2x8x8xf32>
    %57 = arith.truncf %56 : vector<2x8x8xf32> to vector<2x8x8xbf16>
    "tpu.trace_start"() <{level = 10 : i32, message = "bqd,bkd->bqk"}> : () -> ()
    %cst_31 = arith.constant dense<0.000000e+00> : vector<2x8x8xf32>
    %58 = tpu.matmul %55, %57, %cst_31 {dimension_numbers = #tpu.dot_dimension_numbers<[2], [2], [1], [1], [0, 0, 0, 1, 1, 1], [0], [0]>} : vector<2x8x8xbf16>, vector<2x8x8xbf16>, vector<2x8x8xf32> -> vector<2x8x8xf32>
    "tpu.trace_stop"() : () -> ()
    %cst_32 = arith.constant 0.353553385 : f32
    %59 = vector.broadcast %cst_32 : f32 to vector<2x8x8xf32>
    %60 = arith.mulf %58, %59 : vector<2x8x8xf32>
    %cst_33 = arith.constant dense<0xFF800000> : vector<2x8xf32>
    %61 = vector.multi_reduction <maximumf>, %60, %cst_33 [2] : vector<2x8x8xf32> to vector<2x8xf32>
    %62 = vector.shape_cast %61 : vector<2x8xf32> to vector<2x8x1xf32>
    %63 = vector.broadcast %62 : vector<2x8x1xf32> to vector<2x8x8xf32>
    %64 = arith.subf %60, %63 : vector<2x8x8xf32>
    %65 = math.exp %64 : vector<2x8x8xf32>
    %cst_34 = arith.constant dense<0.000000e+00> : vector<2x8xf32>
    %66 = vector.multi_reduction <add>, %65, %cst_34 [2] : vector<2x8x8xf32> to vector<2x8xf32>
    %67 = vector.shape_cast %66 : vector<2x8xf32> to vector<2x8x1xf32>
    %68 = tpu.reciprocal %67 {approx = true} : vector<2x8x1xf32> -> vector<2x8x1xf32>
    %69 = vector.broadcast %68 : vector<2x8x1xf32> to vector<2x8x8xf32>
    %70 = arith.mulf %65, %69 : vector<2x8x8xf32>
    %71 = arith.truncf %70 : vector<2x8x8xf32> to vector<2x8x8xbf16>
    %72 = vector.extract_strided_slice %31 {offsets = [0, 0, 8], sizes = [2, 8, 8], strides = [1, 1, 1]} : vector<2x8x32xf32> to vector<2x8x8xf32>
    %73 = arith.truncf %72 : vector<2x8x8xf32> to vector<2x8x8xbf16>
    "tpu.trace_start"() <{level = 10 : i32, message = "bqk,bkd->bqd"}> : () -> ()
    %cst_35 = arith.constant dense<0.000000e+00> : vector<2x8x8xf32>
    %74 = tpu.matmul %71, %73, %cst_35 {dimension_numbers = #tpu.dot_dimension_numbers<[2], [1], [1], [2], [0, 0, 0, 1, 1, 2], [0], [0]>} : vector<2x8x8xbf16>, vector<2x8x8xbf16>, vector<2x8x8xf32> -> vector<2x8x8xf32>
    "tpu.trace_stop"() : () -> ()
    %75 = vector.shape_cast %74 : vector<2x8x8xf32> to vector<16x8xf32>
    %76 = vector.extract_strided_slice %29 {offsets = [0, 0, 16], sizes = [2, 8, 8], strides = [1, 1, 1]} : vector<2x8x32xf32> to vector<2x8x8xf32>
    %77 = arith.truncf %76 : vector<2x8x8xf32> to vector<2x8x8xbf16>
    %78 = vector.extract_strided_slice %30 {offsets = [0, 0, 16], sizes = [2, 8, 8], strides = [1, 1, 1]} : vector<2x8x32xf32> to vector<2x8x8xf32>
    %79 = arith.truncf %78 : vector<2x8x8xf32> to vector<2x8x8xbf16>
    "tpu.trace_start"() <{level = 10 : i32, message = "bqd,bkd->bqk"}> : () -> ()
    %cst_36 = arith.constant dense<0.000000e+00> : vector<2x8x8xf32>
    %80 = tpu.matmul %77, %79, %cst_36 {dimension_numbers = #tpu.dot_dimension_numbers<[2], [2], [1], [1], [0, 0, 0, 1, 1, 1], [0], [0]>} : vector<2x8x8xbf16>, vector<2x8x8xbf16>, vector<2x8x8xf32> -> vector<2x8x8xf32>
    "tpu.trace_stop"() : () -> ()
    %cst_37 = arith.constant 0.353553385 : f32
    %81 = vector.broadcast %cst_37 : f32 to vector<2x8x8xf32>
    %82 = arith.mulf %80, %81 : vector<2x8x8xf32>
    %cst_38 = arith.constant dense<0xFF800000> : vector<2x8xf32>
    %83 = vector.multi_reduction <maximumf>, %82, %cst_38 [2] : vector<2x8x8xf32> to vector<2x8xf32>
    %84 = vector.shape_cast %83 : vector<2x8xf32> to vector<2x8x1xf32>
    %85 = vector.broadcast %84 : vector<2x8x1xf32> to vector<2x8x8xf32>
    %86 = arith.subf %82, %85 : vector<2x8x8xf32>
    %87 = math.exp %86 : vector<2x8x8xf32>
    %cst_39 = arith.constant dense<0.000000e+00> : vector<2x8xf32>
    %88 = vector.multi_reduction <add>, %87, %cst_39 [2] : vector<2x8x8xf32> to vector<2x8xf32>
    %89 = vector.shape_cast %88 : vector<2x8xf32> to vector<2x8x1xf32>
    %90 = tpu.reciprocal %89 {approx = true} : vector<2x8x1xf32> -> vector<2x8x1xf32>
    %91 = vector.broadcast %90 : vector<2x8x1xf32> to vector<2x8x8xf32>
    %92 = arith.mulf %87, %91 : vector<2x8x8xf32>
    %93 = arith.truncf %92 : vector<2x8x8xf32> to vector<2x8x8xbf16>
    %94 = vector.extract_strided_slice %31 {offsets = [0, 0, 16], sizes = [2, 8, 8], strides = [1, 1, 1]} : vector<2x8x32xf32> to vector<2x8x8xf32>
    %95 = arith.truncf %94 : vector<2x8x8xf32> to vector<2x8x8xbf16>
    "tpu.trace_start"() <{level = 10 : i32, message = "bqk,bkd->bqd"}> : () -> ()
    %cst_40 = arith.constant dense<0.000000e+00> : vector<2x8x8xf32>
    %96 = tpu.matmul %93, %95, %cst_40 {dimension_numbers = #tpu.dot_dimension_numbers<[2], [1], [1], [2], [0, 0, 0, 1, 1, 2], [0], [0]>} : vector<2x8x8xbf16>, vector<2x8x8xbf16>, vector<2x8x8xf32> -> vector<2x8x8xf32>
    "tpu.trace_stop"() : () -> ()
    %97 = vector.shape_cast %96 : vector<2x8x8xf32> to vector<16x8xf32>
    %98 = vector.extract_strided_slice %29 {offsets = [0, 0, 24], sizes = [2, 8, 8], strides = [1, 1, 1]} : vector<2x8x32xf32> to vector<2x8x8xf32>
    %99 = arith.truncf %98 : vector<2x8x8xf32> to vector<2x8x8xbf16>
    %100 = vector.extract_strided_slice %30 {offsets = [0, 0, 24], sizes = [2, 8, 8], strides = [1, 1, 1]} : vector<2x8x32xf32> to vector<2x8x8xf32>
    %101 = arith.truncf %100 : vector<2x8x8xf32> to vector<2x8x8xbf16>
    "tpu.trace_start"() <{level = 10 : i32, message = "bqd,bkd->bqk"}> : () -> ()
    %cst_41 = arith.constant dense<0.000000e+00> : vector<2x8x8xf32>
    %102 = tpu.matmul %99, %101, %cst_41 {dimension_numbers = #tpu.dot_dimension_numbers<[2], [2], [1], [1], [0, 0, 0, 1, 1, 1], [0], [0]>} : vector<2x8x8xbf16>, vector<2x8x8xbf16>, vector<2x8x8xf32> -> vector<2x8x8xf32>
    "tpu.trace_stop"() : () -> ()
    %cst_42 = arith.constant 0.353553385 : f32
    %103 = vector.broadcast %cst_42 : f32 to vector<2x8x8xf32>
    %104 = arith.mulf %102, %103 : vector<2x8x8xf32>
    %cst_43 = arith.constant dense<0xFF800000> : vector<2x8xf32>
    %105 = vector.multi_reduction <maximumf>, %104, %cst_43 [2] : vector<2x8x8xf32> to vector<2x8xf32>
    %106 = vector.shape_cast %105 : vector<2x8xf32> to vector<2x8x1xf32>
    %107 = vector.broadcast %106 : vector<2x8x1xf32> to vector<2x8x8xf32>
    %108 = arith.subf %104, %107 : vector<2x8x8xf32>
    %109 = math.exp %108 : vector<2x8x8xf32>
    %cst_44 = arith.constant dense<0.000000e+00> : vector<2x8xf32>
    %110 = vector.multi_reduction <add>, %109, %cst_44 [2] : vector<2x8x8xf32> to vector<2x8xf32>
    %111 = vector.shape_cast %110 : vector<2x8xf32> to vector<2x8x1xf32>
    %112 = tpu.reciprocal %111 {approx = true} : vector<2x8x1xf32> -> vector<2x8x1xf32>
    %113 = vector.broadcast %112 : vector<2x8x1xf32> to vector<2x8x8xf32>
    %114 = arith.mulf %109, %113 : vector<2x8x8xf32>
    %115 = arith.truncf %114 : vector<2x8x8xf32> to vector<2x8x8xbf16>
    %116 = vector.extract_strided_slice %31 {offsets = [0, 0, 24], sizes = [2, 8, 8], strides = [1, 1, 1]} : vector<2x8x32xf32> to vector<2x8x8xf32>
    %117 = arith.truncf %116 : vector<2x8x8xf32> to vector<2x8x8xbf16>
    "tpu.trace_start"() <{level = 10 : i32, message = "bqk,bkd->bqd"}> : () -> ()
    %cst_45 = arith.constant dense<0.000000e+00> : vector<2x8x8xf32>
    %118 = tpu.matmul %115, %117, %cst_45 {dimension_numbers = #tpu.dot_dimension_numbers<[2], [1], [1], [2], [0, 0, 0, 1, 1, 2], [0], [0]>} : vector<2x8x8xbf16>, vector<2x8x8xbf16>, vector<2x8x8xf32> -> vector<2x8x8xf32>
    "tpu.trace_stop"() : () -> ()
    %119 = vector.shape_cast %118 : vector<2x8x8xf32> to vector<16x8xf32>
    %120 = tpu.concatenate %53, %75, %97, %119 in 1 : vector<16x8xf32>, vector<16x8xf32>, vector<16x8xf32>, vector<16x8xf32> -> vector<16x32xf32>
    %121 = arith.truncf %120 : vector<16x32xf32> to vector<16x32xbf16>
    %c0_46 = arith.constant 0 : index
    %c0_47 = arith.constant 0 : index
    %c0_48 = arith.constant 0 : index
    %122 = vector.load %arg10[%c0_46, %c0_47, %c0_48] : memref<2x32x32xbf16, #tpu.memory_space<vmem>>, vector<1x32x32xbf16>
    %123 = vector.shape_cast %122 : vector<1x32x32xbf16> to vector<32x32xbf16>
    %cst_49 = arith.constant dense<0.000000e+00> : vector<16x32xf32>
    %124 = tpu.matmul %121, %123, %cst_49 {dimension_numbers = #tpu.dot_dimension_numbers<[1], [0], [0], [1], [0, 0, 1, 1], [], []>} : vector<16x32xbf16>, vector<32x32xbf16>, vector<16x32xf32> -> vector<16x32xf32>
    %c0_50 = arith.constant 0 : index
    %c0_51 = arith.constant 0 : index
    %c0_52 = arith.constant 0 : index
    %125 = vector.load %arg11[%c0_50, %c0_51, %c0_52] : memref<2x1x32xf32, #tpu.memory_space<vmem>>, vector<1x1x32xf32>
    %126 = vector.shape_cast %125 : vector<1x1x32xf32> to vector<1x32xf32>
    %127 = vector.broadcast %126 : vector<1x32xf32> to vector<16x32xf32>
    %128 = arith.addf %124, %127 : vector<16x32xf32>
    %129 = arith.addf %6, %128 : vector<16x32xf32>
    %c0_53 = arith.constant 0 : index
    %c0_54 = arith.constant 0 : index
    %c0_55 = arith.constant 0 : index
    %130 = vector.load %arg12[%c0_53, %c0_54, %c0_55] : memref<2x1x32xf32, #tpu.memory_space<vmem>>, vector<1x1x32xf32>
    %131 = vector.shape_cast %130 : vector<1x1x32xf32> to vector<1x32xf32>
    %c0_56 = arith.constant 0 : index
    %c0_57 = arith.constant 0 : index
    %c0_58 = arith.constant 0 : index
    %132 = vector.load %arg13[%c0_56, %c0_57, %c0_58] : memref<2x1x32xf32, #tpu.memory_space<vmem>>, vector<1x1x32xf32>
    %133 = vector.shape_cast %132 : vector<1x1x32xf32> to vector<1x32xf32>
    %cst_59 = arith.constant dense<0.000000e+00> : vector<16xf32>
    %134 = vector.multi_reduction <add>, %129, %cst_59 [1] : vector<16x32xf32> to vector<16xf32>
    %135 = vector.shape_cast %134 : vector<16xf32> to vector<16x1xf32>
    %cst_60 = arith.constant 3.200000e+01 : f32
    %136 = vector.broadcast %cst_60 : f32 to vector<16x1xf32>
    %137 = arith.divf %135, %136 : vector<16x1xf32>
    %138 = vector.broadcast %137 : vector<16x1xf32> to vector<16x32xf32>
    %139 = arith.subf %129, %138 : vector<16x32xf32>
    %140 = arith.mulf %139, %139 : vector<16x32xf32>
    %cst_61 = arith.constant dense<0.000000e+00> : vector<16xf32>
    %141 = vector.multi_reduction <add>, %140, %cst_61 [1] : vector<16x32xf32> to vector<16xf32>
    %142 = vector.shape_cast %141 : vector<16xf32> to vector<16x1xf32>
    %cst_62 = arith.constant 3.200000e+01 : f32
    %143 = vector.broadcast %cst_62 : f32 to vector<16x1xf32>
    %144 = arith.divf %142, %143 : vector<16x1xf32>
    %145 = vector.broadcast %137 : vector<16x1xf32> to vector<16x32xf32>
    %146 = arith.subf %129, %145 : vector<16x32xf32>
    %cst_63 = arith.constant 9.99999974E-6 : f32
    %147 = vector.broadcast %cst_63 : f32 to vector<16x1xf32>
    %148 = arith.addf %144, %147 : vector<16x1xf32>
    %149 = math.rsqrt %148 : vector<16x1xf32>
    %150 = vector.broadcast %149 : vector<16x1xf32> to vector<16x32xf32>
    %151 = arith.mulf %146, %150 : vector<16x32xf32>
    %152 = vector.broadcast %131 : vector<1x32xf32> to vector<16x32xf32>
    %153 = arith.mulf %151, %152 : vector<16x32xf32>
    %154 = vector.broadcast %133 : vector<1x32xf32> to vector<16x32xf32>
    %155 = arith.addf %153, %154 : vector<16x32xf32>
    %156 = arith.truncf %155 : vector<16x32xf32> to vector<16x32xbf16>
    %c0_64 = arith.constant 0 : index
    %c0_65 = arith.constant 0 : index
    %c0_66 = arith.constant 0 : index
    %157 = vector.load %arg14[%c0_64, %c0_65, %c0_66] : memref<2x32x128xbf16, #tpu.memory_space<vmem>>, vector<1x32x128xbf16>
    %158 = vector.shape_cast %157 : vector<1x32x128xbf16> to vector<32x128xbf16>
    %cst_67 = arith.constant dense<0.000000e+00> : vector<16x128xf32>
    %159 = tpu.matmul %156, %158, %cst_67 {dimension_numbers = #tpu.dot_dimension_numbers<[1], [0], [0], [1], [0, 0, 1, 1], [], []>} : vector<16x32xbf16>, vector<32x128xbf16>, vector<16x128xf32> -> vector<16x128xf32>
    %c0_68 = arith.constant 0 : index
    %c0_69 = arith.constant 0 : index
    %c0_70 = arith.constant 0 : index
    %160 = vector.load %arg15[%c0_68, %c0_69, %c0_70] : memref<2x1x128xf32, #tpu.memory_space<vmem>>, vector<1x1x128xf32>
    %161 = vector.shape_cast %160 : vector<1x1x128xf32> to vector<1x128xf32>
    %162 = vector.broadcast %161 : vector<1x128xf32> to vector<16x128xf32>
    %163 = arith.addf %159, %162 : vector<16x128xf32>
    %cst_71 = arith.constant 0.000000e+00 : f32
    %164 = vector.broadcast %cst_71 : f32 to vector<16x128xf32>
    %165 = arith.maximumf %163, %164 : vector<16x128xf32>
    %166 = arith.truncf %165 : vector<16x128xf32> to vector<16x128xbf16>
    %c0_72 = arith.constant 0 : index
    %c0_73 = arith.constant 0 : index
    %c0_74 = arith.constant 0 : index
    %167 = vector.load %arg16[%c0_72, %c0_73, %c0_74] : memref<2x128x32xbf16, #tpu.memory_space<vmem>>, vector<1x128x32xbf16>
    %168 = vector.shape_cast %167 : vector<1x128x32xbf16> to vector<128x32xbf16>
    %cst_75 = arith.constant dense<0.000000e+00> : vector<16x32xf32>
    %169 = tpu.matmul %166, %168, %cst_75 {dimension_numbers = #tpu.dot_dimension_numbers<[1], [0], [0], [1], [0, 0, 1, 1], [], []>} : vector<16x128xbf16>, vector<128x32xbf16>, vector<16x32xf32> -> vector<16x32xf32>
    %c0_76 = arith.constant 0 : index
    %c0_77 = arith.constant 0 : index
    %c0_78 = arith.constant 0 : index
    %170 = vector.load %arg17[%c0_76, %c0_77, %c0_78] : memref<2x1x32xf32, #tpu.memory_space<vmem>>, vector<1x1x32xf32>
    %171 = vector.shape_cast %170 : vector<1x1x32xf32> to vector<1x32xf32>
    %172 = vector.broadcast %171 : vector<1x32xf32> to vector<16x32xf32>
    %173 = arith.addf %169, %172 : vector<16x32xf32>
    %174 = arith.addf %155, %173 : vector<16x32xf32>
    %c0_79 = arith.constant 0 : index
    %c0_80 = arith.constant 0 : index
    %c0_81 = arith.constant 0 : index
    %175 = vector.load %arg18[%c0_79, %c0_80, %c0_81] : memref<2x1x32xf32, #tpu.memory_space<vmem>>, vector<1x1x32xf32>
    %176 = vector.shape_cast %175 : vector<1x1x32xf32> to vector<1x32xf32>
    %c0_82 = arith.constant 0 : index
    %c0_83 = arith.constant 0 : index
    %c0_84 = arith.constant 0 : index
    %177 = vector.load %arg19[%c0_82, %c0_83, %c0_84] : memref<2x1x32xf32, #tpu.memory_space<vmem>>, vector<1x1x32xf32>
    %178 = vector.shape_cast %177 : vector<1x1x32xf32> to vector<1x32xf32>
    %cst_85 = arith.constant dense<0.000000e+00> : vector<16xf32>
    %179 = vector.multi_reduction <add>, %174, %cst_85 [1] : vector<16x32xf32> to vector<16xf32>
    %180 = vector.shape_cast %179 : vector<16xf32> to vector<16x1xf32>
    %cst_86 = arith.constant 3.200000e+01 : f32
    %181 = vector.broadcast %cst_86 : f32 to vector<16x1xf32>
    %182 = arith.divf %180, %181 : vector<16x1xf32>
    %183 = vector.broadcast %182 : vector<16x1xf32> to vector<16x32xf32>
    %184 = arith.subf %174, %183 : vector<16x32xf32>
    %185 = arith.mulf %184, %184 : vector<16x32xf32>
    %cst_87 = arith.constant dense<0.000000e+00> : vector<16xf32>
    %186 = vector.multi_reduction <add>, %185, %cst_87 [1] : vector<16x32xf32> to vector<16xf32>
    %187 = vector.shape_cast %186 : vector<16xf32> to vector<16x1xf32>
    %cst_88 = arith.constant 3.200000e+01 : f32
    %188 = vector.broadcast %cst_88 : f32 to vector<16x1xf32>
    %189 = arith.divf %187, %188 : vector<16x1xf32>
    %190 = vector.broadcast %182 : vector<16x1xf32> to vector<16x32xf32>
    %191 = arith.subf %174, %190 : vector<16x32xf32>
    %cst_89 = arith.constant 9.99999974E-6 : f32
    %192 = vector.broadcast %cst_89 : f32 to vector<16x1xf32>
    %193 = arith.addf %189, %192 : vector<16x1xf32>
    %194 = math.rsqrt %193 : vector<16x1xf32>
    %195 = vector.broadcast %194 : vector<16x1xf32> to vector<16x32xf32>
    %196 = arith.mulf %191, %195 : vector<16x32xf32>
    %197 = vector.broadcast %176 : vector<1x32xf32> to vector<16x32xf32>
    %198 = arith.mulf %196, %197 : vector<16x32xf32>
    %199 = vector.broadcast %178 : vector<1x32xf32> to vector<16x32xf32>
    %200 = arith.addf %198, %199 : vector<16x32xf32>
    %201 = arith.truncf %200 : vector<16x32xf32> to vector<16x32xbf16>
    %202 = vector.shape_cast %200 : vector<16x32xf32> to vector<2x8x32xf32>
    %203 = vector.extract_strided_slice %202 {offsets = [0, 7, 0], sizes = [2, 1, 32], strides = [1, 1, 1]} : vector<2x8x32xf32> to vector<2x1x32xf32>
    %204 = vector.shape_cast %203 : vector<2x1x32xf32> to vector<2x32xf32>
    %205 = arith.truncf %204 : vector<2x32xf32> to vector<2x32xbf16>
    %c1 = arith.constant 1 : index
    %c0_90 = arith.constant 0 : index
    %c0_91 = arith.constant 0 : index
    %206 = vector.load %arg4[%c1, %c0_90, %c0_91] : memref<2x32x32xbf16, #tpu.memory_space<vmem>>, vector<1x32x32xbf16>
    %207 = vector.shape_cast %206 : vector<1x32x32xbf16> to vector<32x32xbf16>
    %cst_92 = arith.constant dense<0.000000e+00> : vector<2x32xf32>
    %208 = tpu.matmul %205, %207, %cst_92 {dimension_numbers = #tpu.dot_dimension_numbers<[1], [0], [0], [1], [0, 0, 1, 1], [], []>} : vector<2x32xbf16>, vector<32x32xbf16>, vector<2x32xf32> -> vector<2x32xf32>
    %c1_93 = arith.constant 1 : index
    %c0_94 = arith.constant 0 : index
    %c0_95 = arith.constant 0 : index
    %209 = vector.load %arg7[%c1_93, %c0_94, %c0_95] : memref<2x1x32xf32, #tpu.memory_space<vmem>>, vector<1x1x32xf32>
    %210 = vector.shape_cast %209 : vector<1x1x32xf32> to vector<1x32xf32>
    %211 = vector.broadcast %210 : vector<1x32xf32> to vector<2x32xf32>
    %212 = arith.addf %208, %211 : vector<2x32xf32>
    %c1_96 = arith.constant 1 : index
    %c0_97 = arith.constant 0 : index
    %c0_98 = arith.constant 0 : index
    %213 = vector.load %arg5[%c1_96, %c0_97, %c0_98] : memref<2x32x32xbf16, #tpu.memory_space<vmem>>, vector<1x32x32xbf16>
    %214 = vector.shape_cast %213 : vector<1x32x32xbf16> to vector<32x32xbf16>
    %cst_99 = arith.constant dense<0.000000e+00> : vector<16x32xf32>
    %215 = tpu.matmul %201, %214, %cst_99 {dimension_numbers = #tpu.dot_dimension_numbers<[1], [0], [0], [1], [0, 0, 1, 1], [], []>} : vector<16x32xbf16>, vector<32x32xbf16>, vector<16x32xf32> -> vector<16x32xf32>
    %c1_100 = arith.constant 1 : index
    %c0_101 = arith.constant 0 : index
    %c0_102 = arith.constant 0 : index
    %216 = vector.load %arg8[%c1_100, %c0_101, %c0_102] : memref<2x1x32xf32, #tpu.memory_space<vmem>>, vector<1x1x32xf32>
    %217 = vector.shape_cast %216 : vector<1x1x32xf32> to vector<1x32xf32>
    %218 = vector.broadcast %217 : vector<1x32xf32> to vector<16x32xf32>
    %219 = arith.addf %215, %218 : vector<16x32xf32>
    %c1_103 = arith.constant 1 : index
    %c0_104 = arith.constant 0 : index
    %c0_105 = arith.constant 0 : index
    %220 = vector.load %arg6[%c1_103, %c0_104, %c0_105] : memref<2x32x32xbf16, #tpu.memory_space<vmem>>, vector<1x32x32xbf16>
    %221 = vector.shape_cast %220 : vector<1x32x32xbf16> to vector<32x32xbf16>
    %cst_106 = arith.constant dense<0.000000e+00> : vector<16x32xf32>
    %222 = tpu.matmul %201, %221, %cst_106 {dimension_numbers = #tpu.dot_dimension_numbers<[1], [0], [0], [1], [0, 0, 1, 1], [], []>} : vector<16x32xbf16>, vector<32x32xbf16>, vector<16x32xf32> -> vector<16x32xf32>
    %c1_107 = arith.constant 1 : index
    %c0_108 = arith.constant 0 : index
    %c0_109 = arith.constant 0 : index
    %223 = vector.load %arg9[%c1_107, %c0_108, %c0_109] : memref<2x1x32xf32, #tpu.memory_space<vmem>>, vector<1x1x32xf32>
    %224 = vector.shape_cast %223 : vector<1x1x32xf32> to vector<1x32xf32>
    %225 = vector.broadcast %224 : vector<1x32xf32> to vector<16x32xf32>
    %226 = arith.addf %222, %225 : vector<16x32xf32>
    %227 = vector.shape_cast %212 : vector<2x32xf32> to vector<2x1x32xf32>
    %228 = vector.shape_cast %219 : vector<16x32xf32> to vector<2x8x32xf32>
    %229 = vector.shape_cast %226 : vector<16x32xf32> to vector<2x8x32xf32>
    %230 = vector.extract_strided_slice %227 {offsets = [0, 0, 0], sizes = [2, 1, 8], strides = [1, 1, 1]} : vector<2x1x32xf32> to vector<2x1x8xf32>
    %231 = arith.truncf %230 : vector<2x1x8xf32> to vector<2x1x8xbf16>
    %232 = vector.extract_strided_slice %228 {offsets = [0, 0, 0], sizes = [2, 8, 8], strides = [1, 1, 1]} : vector<2x8x32xf32> to vector<2x8x8xf32>
    %233 = arith.truncf %232 : vector<2x8x8xf32> to vector<2x8x8xbf16>
    "tpu.trace_start"() <{level = 10 : i32, message = "bqd,bkd->bqk"}> : () -> ()
    %cst_110 = arith.constant dense<0.000000e+00> : vector<2x1x8xf32>
    %234 = tpu.matmul %231, %233, %cst_110 {dimension_numbers = #tpu.dot_dimension_numbers<[2], [2], [1], [1], [0, 0, 0, 1, 1, 1], [0], [0]>} : vector<2x1x8xbf16>, vector<2x8x8xbf16>, vector<2x1x8xf32> -> vector<2x1x8xf32>
    "tpu.trace_stop"() : () -> ()
    %cst_111 = arith.constant 0.353553385 : f32
    %235 = vector.broadcast %cst_111 : f32 to vector<2x1x8xf32>
    %236 = arith.mulf %234, %235 : vector<2x1x8xf32>
    %cst_112 = arith.constant dense<0xFF800000> : vector<2x1xf32>
    %237 = vector.multi_reduction <maximumf>, %236, %cst_112 [2] : vector<2x1x8xf32> to vector<2x1xf32>
    %238 = vector.shape_cast %237 : vector<2x1xf32> to vector<2x1x1xf32>
    %239 = vector.broadcast %238 : vector<2x1x1xf32> to vector<2x1x8xf32>
    %240 = arith.subf %236, %239 : vector<2x1x8xf32>
    %241 = math.exp %240 : vector<2x1x8xf32>
    %cst_113 = arith.constant dense<0.000000e+00> : vector<2x1xf32>
    %242 = vector.multi_reduction <add>, %241, %cst_113 [2] : vector<2x1x8xf32> to vector<2x1xf32>
    %243 = vector.shape_cast %242 : vector<2x1xf32> to vector<2x1x1xf32>
    %244 = tpu.reciprocal %243 {approx = true} : vector<2x1x1xf32> -> vector<2x1x1xf32>
    %245 = vector.broadcast %244 : vector<2x1x1xf32> to vector<2x1x8xf32>
    %246 = arith.mulf %241, %245 : vector<2x1x8xf32>
    %247 = arith.truncf %246 : vector<2x1x8xf32> to vector<2x1x8xbf16>
    %248 = vector.extract_strided_slice %229 {offsets = [0, 0, 0], sizes = [2, 8, 8], strides = [1, 1, 1]} : vector<2x8x32xf32> to vector<2x8x8xf32>
    %249 = arith.truncf %248 : vector<2x8x8xf32> to vector<2x8x8xbf16>
    "tpu.trace_start"() <{level = 10 : i32, message = "bqk,bkd->bqd"}> : () -> ()
    %cst_114 = arith.constant dense<0.000000e+00> : vector<2x1x8xf32>
    %250 = tpu.matmul %247, %249, %cst_114 {dimension_numbers = #tpu.dot_dimension_numbers<[2], [1], [1], [2], [0, 0, 0, 1, 1, 2], [0], [0]>} : vector<2x1x8xbf16>, vector<2x8x8xbf16>, vector<2x1x8xf32> -> vector<2x1x8xf32>
    "tpu.trace_stop"() : () -> ()
    %251 = vector.shape_cast %250 : vector<2x1x8xf32> to vector<2x8xf32>
    %252 = vector.extract_strided_slice %227 {offsets = [0, 0, 8], sizes = [2, 1, 8], strides = [1, 1, 1]} : vector<2x1x32xf32> to vector<2x1x8xf32>
    %253 = arith.truncf %252 : vector<2x1x8xf32> to vector<2x1x8xbf16>
    %254 = vector.extract_strided_slice %228 {offsets = [0, 0, 8], sizes = [2, 8, 8], strides = [1, 1, 1]} : vector<2x8x32xf32> to vector<2x8x8xf32>
    %255 = arith.truncf %254 : vector<2x8x8xf32> to vector<2x8x8xbf16>
    "tpu.trace_start"() <{level = 10 : i32, message = "bqd,bkd->bqk"}> : () -> ()
    %cst_115 = arith.constant dense<0.000000e+00> : vector<2x1x8xf32>
    %256 = tpu.matmul %253, %255, %cst_115 {dimension_numbers = #tpu.dot_dimension_numbers<[2], [2], [1], [1], [0, 0, 0, 1, 1, 1], [0], [0]>} : vector<2x1x8xbf16>, vector<2x8x8xbf16>, vector<2x1x8xf32> -> vector<2x1x8xf32>
    "tpu.trace_stop"() : () -> ()
    %cst_116 = arith.constant 0.353553385 : f32
    %257 = vector.broadcast %cst_116 : f32 to vector<2x1x8xf32>
    %258 = arith.mulf %256, %257 : vector<2x1x8xf32>
    %cst_117 = arith.constant dense<0xFF800000> : vector<2x1xf32>
    %259 = vector.multi_reduction <maximumf>, %258, %cst_117 [2] : vector<2x1x8xf32> to vector<2x1xf32>
    %260 = vector.shape_cast %259 : vector<2x1xf32> to vector<2x1x1xf32>
    %261 = vector.broadcast %260 : vector<2x1x1xf32> to vector<2x1x8xf32>
    %262 = arith.subf %258, %261 : vector<2x1x8xf32>
    %263 = math.exp %262 : vector<2x1x8xf32>
    %cst_118 = arith.constant dense<0.000000e+00> : vector<2x1xf32>
    %264 = vector.multi_reduction <add>, %263, %cst_118 [2] : vector<2x1x8xf32> to vector<2x1xf32>
    %265 = vector.shape_cast %264 : vector<2x1xf32> to vector<2x1x1xf32>
    %266 = tpu.reciprocal %265 {approx = true} : vector<2x1x1xf32> -> vector<2x1x1xf32>
    %267 = vector.broadcast %266 : vector<2x1x1xf32> to vector<2x1x8xf32>
    %268 = arith.mulf %263, %267 : vector<2x1x8xf32>
    %269 = arith.truncf %268 : vector<2x1x8xf32> to vector<2x1x8xbf16>
    %270 = vector.extract_strided_slice %229 {offsets = [0, 0, 8], sizes = [2, 8, 8], strides = [1, 1, 1]} : vector<2x8x32xf32> to vector<2x8x8xf32>
    %271 = arith.truncf %270 : vector<2x8x8xf32> to vector<2x8x8xbf16>
    "tpu.trace_start"() <{level = 10 : i32, message = "bqk,bkd->bqd"}> : () -> ()
    %cst_119 = arith.constant dense<0.000000e+00> : vector<2x1x8xf32>
    %272 = tpu.matmul %269, %271, %cst_119 {dimension_numbers = #tpu.dot_dimension_numbers<[2], [1], [1], [2], [0, 0, 0, 1, 1, 2], [0], [0]>} : vector<2x1x8xbf16>, vector<2x8x8xbf16>, vector<2x1x8xf32> -> vector<2x1x8xf32>
    "tpu.trace_stop"() : () -> ()
    %273 = vector.shape_cast %272 : vector<2x1x8xf32> to vector<2x8xf32>
    %274 = vector.extract_strided_slice %227 {offsets = [0, 0, 16], sizes = [2, 1, 8], strides = [1, 1, 1]} : vector<2x1x32xf32> to vector<2x1x8xf32>
    %275 = arith.truncf %274 : vector<2x1x8xf32> to vector<2x1x8xbf16>
    %276 = vector.extract_strided_slice %228 {offsets = [0, 0, 16], sizes = [2, 8, 8], strides = [1, 1, 1]} : vector<2x8x32xf32> to vector<2x8x8xf32>
    %277 = arith.truncf %276 : vector<2x8x8xf32> to vector<2x8x8xbf16>
    "tpu.trace_start"() <{level = 10 : i32, message = "bqd,bkd->bqk"}> : () -> ()
    %cst_120 = arith.constant dense<0.000000e+00> : vector<2x1x8xf32>
    %278 = tpu.matmul %275, %277, %cst_120 {dimension_numbers = #tpu.dot_dimension_numbers<[2], [2], [1], [1], [0, 0, 0, 1, 1, 1], [0], [0]>} : vector<2x1x8xbf16>, vector<2x8x8xbf16>, vector<2x1x8xf32> -> vector<2x1x8xf32>
    "tpu.trace_stop"() : () -> ()
    %cst_121 = arith.constant 0.353553385 : f32
    %279 = vector.broadcast %cst_121 : f32 to vector<2x1x8xf32>
    %280 = arith.mulf %278, %279 : vector<2x1x8xf32>
    %cst_122 = arith.constant dense<0xFF800000> : vector<2x1xf32>
    %281 = vector.multi_reduction <maximumf>, %280, %cst_122 [2] : vector<2x1x8xf32> to vector<2x1xf32>
    %282 = vector.shape_cast %281 : vector<2x1xf32> to vector<2x1x1xf32>
    %283 = vector.broadcast %282 : vector<2x1x1xf32> to vector<2x1x8xf32>
    %284 = arith.subf %280, %283 : vector<2x1x8xf32>
    %285 = math.exp %284 : vector<2x1x8xf32>
    %cst_123 = arith.constant dense<0.000000e+00> : vector<2x1xf32>
    %286 = vector.multi_reduction <add>, %285, %cst_123 [2] : vector<2x1x8xf32> to vector<2x1xf32>
    %287 = vector.shape_cast %286 : vector<2x1xf32> to vector<2x1x1xf32>
    %288 = tpu.reciprocal %287 {approx = true} : vector<2x1x1xf32> -> vector<2x1x1xf32>
    %289 = vector.broadcast %288 : vector<2x1x1xf32> to vector<2x1x8xf32>
    %290 = arith.mulf %285, %289 : vector<2x1x8xf32>
    %291 = arith.truncf %290 : vector<2x1x8xf32> to vector<2x1x8xbf16>
    %292 = vector.extract_strided_slice %229 {offsets = [0, 0, 16], sizes = [2, 8, 8], strides = [1, 1, 1]} : vector<2x8x32xf32> to vector<2x8x8xf32>
    %293 = arith.truncf %292 : vector<2x8x8xf32> to vector<2x8x8xbf16>
    "tpu.trace_start"() <{level = 10 : i32, message = "bqk,bkd->bqd"}> : () -> ()
    %cst_124 = arith.constant dense<0.000000e+00> : vector<2x1x8xf32>
    %294 = tpu.matmul %291, %293, %cst_124 {dimension_numbers = #tpu.dot_dimension_numbers<[2], [1], [1], [2], [0, 0, 0, 1, 1, 2], [0], [0]>} : vector<2x1x8xbf16>, vector<2x8x8xbf16>, vector<2x1x8xf32> -> vector<2x1x8xf32>
    "tpu.trace_stop"() : () -> ()
    %295 = vector.shape_cast %294 : vector<2x1x8xf32> to vector<2x8xf32>
    %296 = vector.extract_strided_slice %227 {offsets = [0, 0, 24], sizes = [2, 1, 8], strides = [1, 1, 1]} : vector<2x1x32xf32> to vector<2x1x8xf32>
    %297 = arith.truncf %296 : vector<2x1x8xf32> to vector<2x1x8xbf16>
    %298 = vector.extract_strided_slice %228 {offsets = [0, 0, 24], sizes = [2, 8, 8], strides = [1, 1, 1]} : vector<2x8x32xf32> to vector<2x8x8xf32>
    %299 = arith.truncf %298 : vector<2x8x8xf32> to vector<2x8x8xbf16>
    "tpu.trace_start"() <{level = 10 : i32, message = "bqd,bkd->bqk"}> : () -> ()
    %cst_125 = arith.constant dense<0.000000e+00> : vector<2x1x8xf32>
    %300 = tpu.matmul %297, %299, %cst_125 {dimension_numbers = #tpu.dot_dimension_numbers<[2], [2], [1], [1], [0, 0, 0, 1, 1, 1], [0], [0]>} : vector<2x1x8xbf16>, vector<2x8x8xbf16>, vector<2x1x8xf32> -> vector<2x1x8xf32>
    "tpu.trace_stop"() : () -> ()
    %cst_126 = arith.constant 0.353553385 : f32
    %301 = vector.broadcast %cst_126 : f32 to vector<2x1x8xf32>
    %302 = arith.mulf %300, %301 : vector<2x1x8xf32>
    %cst_127 = arith.constant dense<0xFF800000> : vector<2x1xf32>
    %303 = vector.multi_reduction <maximumf>, %302, %cst_127 [2] : vector<2x1x8xf32> to vector<2x1xf32>
    %304 = vector.shape_cast %303 : vector<2x1xf32> to vector<2x1x1xf32>
    %305 = vector.broadcast %304 : vector<2x1x1xf32> to vector<2x1x8xf32>
    %306 = arith.subf %302, %305 : vector<2x1x8xf32>
    %307 = math.exp %306 : vector<2x1x8xf32>
    %cst_128 = arith.constant dense<0.000000e+00> : vector<2x1xf32>
    %308 = vector.multi_reduction <add>, %307, %cst_128 [2] : vector<2x1x8xf32> to vector<2x1xf32>
    %309 = vector.shape_cast %308 : vector<2x1xf32> to vector<2x1x1xf32>
    %310 = tpu.reciprocal %309 {approx = true} : vector<2x1x1xf32> -> vector<2x1x1xf32>
    %311 = vector.broadcast %310 : vector<2x1x1xf32> to vector<2x1x8xf32>
    %312 = arith.mulf %307, %311 : vector<2x1x8xf32>
    %313 = arith.truncf %312 : vector<2x1x8xf32> to vector<2x1x8xbf16>
    %314 = vector.extract_strided_slice %229 {offsets = [0, 0, 24], sizes = [2, 8, 8], strides = [1, 1, 1]} : vector<2x8x32xf32> to vector<2x8x8xf32>
    %315 = arith.truncf %314 : vector<2x8x8xf32> to vector<2x8x8xbf16>
    "tpu.trace_start"() <{level = 10 : i32, message = "bqk,bkd->bqd"}> : () -> ()
    %cst_129 = arith.constant dense<0.000000e+00> : vector<2x1x8xf32>
    %316 = tpu.matmul %313, %315, %cst_129 {dimension_numbers = #tpu.dot_dimension_numbers<[2], [1], [1], [2], [0, 0, 0, 1, 1, 2], [0], [0]>} : vector<2x1x8xbf16>, vector<2x8x8xbf16>, vector<2x1x8xf32> -> vector<2x1x8xf32>
    "tpu.trace_stop"() : () -> ()
    %317 = vector.shape_cast %316 : vector<2x1x8xf32> to vector<2x8xf32>
    %318 = tpu.concatenate %251, %273, %295, %317 in 1 : vector<2x8xf32>, vector<2x8xf32>, vector<2x8xf32>, vector<2x8xf32> -> vector<2x32xf32>
    %319 = arith.truncf %318 : vector<2x32xf32> to vector<2x32xbf16>
    %c1_130 = arith.constant 1 : index
    %c0_131 = arith.constant 0 : index
    %c0_132 = arith.constant 0 : index
    %320 = vector.load %arg10[%c1_130, %c0_131, %c0_132] : memref<2x32x32xbf16, #tpu.memory_space<vmem>>, vector<1x32x32xbf16>
    %321 = vector.shape_cast %320 : vector<1x32x32xbf16> to vector<32x32xbf16>
    %cst_133 = arith.constant dense<0.000000e+00> : vector<2x32xf32>
    %322 = tpu.matmul %319, %321, %cst_133 {dimension_numbers = #tpu.dot_dimension_numbers<[1], [0], [0], [1], [0, 0, 1, 1], [], []>} : vector<2x32xbf16>, vector<32x32xbf16>, vector<2x32xf32> -> vector<2x32xf32>
    %c1_134 = arith.constant 1 : index
    %c0_135 = arith.constant 0 : index
    %c0_136 = arith.constant 0 : index
    %323 = vector.load %arg11[%c1_134, %c0_135, %c0_136] : memref<2x1x32xf32, #tpu.memory_space<vmem>>, vector<1x1x32xf32>
    %324 = vector.shape_cast %323 : vector<1x1x32xf32> to vector<1x32xf32>
    %325 = vector.broadcast %324 : vector<1x32xf32> to vector<2x32xf32>
    %326 = arith.addf %322, %325 : vector<2x32xf32>
    %327 = arith.addf %204, %326 : vector<2x32xf32>
    %c1_137 = arith.constant 1 : index
    %c0_138 = arith.constant 0 : index
    %c0_139 = arith.constant 0 : index
    %328 = vector.load %arg12[%c1_137, %c0_138, %c0_139] : memref<2x1x32xf32, #tpu.memory_space<vmem>>, vector<1x1x32xf32>
    %329 = vector.shape_cast %328 : vector<1x1x32xf32> to vector<1x32xf32>
    %c1_140 = arith.constant 1 : index
    %c0_141 = arith.constant 0 : index
    %c0_142 = arith.constant 0 : index
    %330 = vector.load %arg13[%c1_140, %c0_141, %c0_142] : memref<2x1x32xf32, #tpu.memory_space<vmem>>, vector<1x1x32xf32>
    %331 = vector.shape_cast %330 : vector<1x1x32xf32> to vector<1x32xf32>
    %cst_143 = arith.constant dense<0.000000e+00> : vector<2xf32>
    %332 = vector.multi_reduction <add>, %327, %cst_143 [1] : vector<2x32xf32> to vector<2xf32>
    %333 = vector.shape_cast %332 : vector<2xf32> to vector<2x1xf32>
    %cst_144 = arith.constant 3.200000e+01 : f32
    %334 = vector.broadcast %cst_144 : f32 to vector<2x1xf32>
    %335 = arith.divf %333, %334 : vector<2x1xf32>
    %336 = vector.broadcast %335 : vector<2x1xf32> to vector<2x32xf32>
    %337 = arith.subf %327, %336 : vector<2x32xf32>
    %338 = arith.mulf %337, %337 : vector<2x32xf32>
    %cst_145 = arith.constant dense<0.000000e+00> : vector<2xf32>
    %339 = vector.multi_reduction <add>, %338, %cst_145 [1] : vector<2x32xf32> to vector<2xf32>
    %340 = vector.shape_cast %339 : vector<2xf32> to vector<2x1xf32>
    %cst_146 = arith.constant 3.200000e+01 : f32
    %341 = vector.broadcast %cst_146 : f32 to vector<2x1xf32>
    %342 = arith.divf %340, %341 : vector<2x1xf32>
    %343 = vector.broadcast %335 : vector<2x1xf32> to vector<2x32xf32>
    %344 = arith.subf %327, %343 : vector<2x32xf32>
    %cst_147 = arith.constant 9.99999974E-6 : f32
    %345 = vector.broadcast %cst_147 : f32 to vector<2x1xf32>
    %346 = arith.addf %342, %345 : vector<2x1xf32>
    %347 = math.rsqrt %346 : vector<2x1xf32>
    %348 = vector.broadcast %347 : vector<2x1xf32> to vector<2x32xf32>
    %349 = arith.mulf %344, %348 : vector<2x32xf32>
    %350 = vector.broadcast %329 : vector<1x32xf32> to vector<2x32xf32>
    %351 = arith.mulf %349, %350 : vector<2x32xf32>
    %352 = vector.broadcast %331 : vector<1x32xf32> to vector<2x32xf32>
    %353 = arith.addf %351, %352 : vector<2x32xf32>
    %354 = arith.truncf %353 : vector<2x32xf32> to vector<2x32xbf16>
    %c1_148 = arith.constant 1 : index
    %c0_149 = arith.constant 0 : index
    %c0_150 = arith.constant 0 : index
    %355 = vector.load %arg14[%c1_148, %c0_149, %c0_150] : memref<2x32x128xbf16, #tpu.memory_space<vmem>>, vector<1x32x128xbf16>
    %356 = vector.shape_cast %355 : vector<1x32x128xbf16> to vector<32x128xbf16>
    %cst_151 = arith.constant dense<0.000000e+00> : vector<2x128xf32>
    %357 = tpu.matmul %354, %356, %cst_151 {dimension_numbers = #tpu.dot_dimension_numbers<[1], [0], [0], [1], [0, 0, 1, 1], [], []>} : vector<2x32xbf16>, vector<32x128xbf16>, vector<2x128xf32> -> vector<2x128xf32>
    %c1_152 = arith.constant 1 : index
    %c0_153 = arith.constant 0 : index
    %c0_154 = arith.constant 0 : index
    %358 = vector.load %arg15[%c1_152, %c0_153, %c0_154] : memref<2x1x128xf32, #tpu.memory_space<vmem>>, vector<1x1x128xf32>
    %359 = vector.shape_cast %358 : vector<1x1x128xf32> to vector<1x128xf32>
    %360 = vector.broadcast %359 : vector<1x128xf32> to vector<2x128xf32>
    %361 = arith.addf %357, %360 : vector<2x128xf32>
    %cst_155 = arith.constant 0.000000e+00 : f32
    %362 = vector.broadcast %cst_155 : f32 to vector<2x128xf32>
    %363 = arith.maximumf %361, %362 : vector<2x128xf32>
    %364 = arith.truncf %363 : vector<2x128xf32> to vector<2x128xbf16>
    %c1_156 = arith.constant 1 : index
    %c0_157 = arith.constant 0 : index
    %c0_158 = arith.constant 0 : index
    %365 = vector.load %arg16[%c1_156, %c0_157, %c0_158] : memref<2x128x32xbf16, #tpu.memory_space<vmem>>, vector<1x128x32xbf16>
    %366 = vector.shape_cast %365 : vector<1x128x32xbf16> to vector<128x32xbf16>
    %cst_159 = arith.constant dense<0.000000e+00> : vector<2x32xf32>
    %367 = tpu.matmul %364, %366, %cst_159 {dimension_numbers = #tpu.dot_dimension_numbers<[1], [0], [0], [1], [0, 0, 1, 1], [], []>} : vector<2x128xbf16>, vector<128x32xbf16>, vector<2x32xf32> -> vector<2x32xf32>
    %c1_160 = arith.constant 1 : index
    %c0_161 = arith.constant 0 : index
    %c0_162 = arith.constant 0 : index
    %368 = vector.load %arg17[%c1_160, %c0_161, %c0_162] : memref<2x1x32xf32, #tpu.memory_space<vmem>>, vector<1x1x32xf32>
    %369 = vector.shape_cast %368 : vector<1x1x32xf32> to vector<1x32xf32>
    %370 = vector.broadcast %369 : vector<1x32xf32> to vector<2x32xf32>
    %371 = arith.addf %367, %370 : vector<2x32xf32>
    %372 = arith.addf %353, %371 : vector<2x32xf32>
    %c1_163 = arith.constant 1 : index
    %c0_164 = arith.constant 0 : index
    %c0_165 = arith.constant 0 : index
    %373 = vector.load %arg18[%c1_163, %c0_164, %c0_165] : memref<2x1x32xf32, #tpu.memory_space<vmem>>, vector<1x1x32xf32>
    %374 = vector.shape_cast %373 : vector<1x1x32xf32> to vector<1x32xf32>
    %c1_166 = arith.constant 1 : index
    %c0_167 = arith.constant 0 : index
    %c0_168 = arith.constant 0 : index
    %375 = vector.load %arg19[%c1_166, %c0_167, %c0_168] : memref<2x1x32xf32, #tpu.memory_space<vmem>>, vector<1x1x32xf32>
    %376 = vector.shape_cast %375 : vector<1x1x32xf32> to vector<1x32xf32>
    %cst_169 = arith.constant dense<0.000000e+00> : vector<2xf32>
    %377 = vector.multi_reduction <add>, %372, %cst_169 [1] : vector<2x32xf32> to vector<2xf32>
    %378 = vector.shape_cast %377 : vector<2xf32> to vector<2x1xf32>
    %cst_170 = arith.constant 3.200000e+01 : f32
    %379 = vector.broadcast %cst_170 : f32 to vector<2x1xf32>
    %380 = arith.divf %378, %379 : vector<2x1xf32>
    %381 = vector.broadcast %380 : vector<2x1xf32> to vector<2x32xf32>
    %382 = arith.subf %372, %381 : vector<2x32xf32>
    %383 = arith.mulf %382, %382 : vector<2x32xf32>
    %cst_171 = arith.constant dense<0.000000e+00> : vector<2xf32>
    %384 = vector.multi_reduction <add>, %383, %cst_171 [1] : vector<2x32xf32> to vector<2xf32>
    %385 = vector.shape_cast %384 : vector<2xf32> to vector<2x1xf32>
    %cst_172 = arith.constant 3.200000e+01 : f32
    %386 = vector.broadcast %cst_172 : f32 to vector<2x1xf32>
    %387 = arith.divf %385, %386 : vector<2x1xf32>
    %388 = vector.broadcast %380 : vector<2x1xf32> to vector<2x32xf32>
    %389 = arith.subf %372, %388 : vector<2x32xf32>
    %cst_173 = arith.constant 9.99999974E-6 : f32
    %390 = vector.broadcast %cst_173 : f32 to vector<2x1xf32>
    %391 = arith.addf %387, %390 : vector<2x1xf32>
    %392 = math.rsqrt %391 : vector<2x1xf32>
    %393 = vector.broadcast %392 : vector<2x1xf32> to vector<2x32xf32>
    %394 = arith.mulf %389, %393 : vector<2x32xf32>
    %395 = vector.broadcast %374 : vector<1x32xf32> to vector<2x32xf32>
    %396 = arith.mulf %394, %395 : vector<2x32xf32>
    %397 = vector.broadcast %376 : vector<1x32xf32> to vector<2x32xf32>
    %398 = arith.addf %396, %397 : vector<2x32xf32>
    %399 = arith.truncf %398 : vector<2x32xf32> to vector<2x32xbf16>
    %c0_174 = arith.constant 0 : index
    %c0_175 = arith.constant 0 : index
    %400 = vector.load %arg20[%c0_174, %c0_175] : memref<32x128xbf16, #tpu.memory_space<vmem>>, vector<32x128xbf16>
    %cst_176 = arith.constant dense<0.000000e+00> : vector<2x128xf32>
    %401 = tpu.matmul %399, %400, %cst_176 {dimension_numbers = #tpu.dot_dimension_numbers<[1], [0], [0], [1], [0, 0, 1, 1], [], []>} : vector<2x32xbf16>, vector<32x128xbf16>, vector<2x128xf32> -> vector<2x128xf32>
    %c0_177 = arith.constant 0 : index
    %c0_178 = arith.constant 0 : index
    %402 = vector.load %arg21[%c0_177, %c0_178] : memref<1x128xf32, #tpu.memory_space<vmem>>, vector<1x128xf32>
    %403 = vector.broadcast %402 : vector<1x128xf32> to vector<2x128xf32>
    %404 = arith.addf %401, %403 : vector<2x128xf32>
    %cst_179 = arith.constant 0.000000e+00 : f32
    %405 = vector.broadcast %cst_179 : f32 to vector<2x128xf32>
    %406 = arith.maximumf %404, %405 : vector<2x128xf32>
    %c0_180 = arith.constant 0 : index
    %c0_181 = arith.constant 0 : index
    %407 = vector.load %arg22[%c0_180, %c0_181] : memref<128x1xf32, #tpu.memory_space<vmem>>, vector<128x1xf32>
    %cst_182 = arith.constant dense<0.000000e+00> : vector<2x1xf32>
    %408 = tpu.matmul %406, %407, %cst_182 {dimension_numbers = #tpu.dot_dimension_numbers<[1], [0], [0], [1], [0, 0, 1, 1], [], []>} : vector<2x128xf32>, vector<128x1xf32>, vector<2x1xf32> -> vector<2x1xf32>
    %c0_183 = arith.constant 0 : index
    %c0_184 = arith.constant 0 : index
    %409 = vector.load %arg23[%c0_183, %c0_184] : memref<1x1xf32, #tpu.memory_space<vmem>>, vector<1x1xf32>
    %410 = vector.broadcast %409 : vector<1x1xf32> to vector<2x1xf32>
    %411 = arith.addf %408, %410 : vector<2x1xf32>
    %412 = vector.shape_cast %411 : vector<2x1xf32> to vector<2x1xf32>
    %413 = vector.broadcast %412 : vector<2x1xf32> to vector<2x128xf32>
    %c0_185 = arith.constant 0 : index
    %c0_186 = arith.constant 0 : index
    %414 = vector.load %arg24[%c0_185, %c0_186] : memref<2x128xf32, #tpu.memory_space<vmem>>, vector<2x128xf32>
    tpu.vector_store %arg24[%c0_185, %c0_186], %413 {strides = array<i32>} : memref<2x128xf32, #tpu.memory_space<vmem>>, vector<2x128xf32>,
    return
  }
  func.func @transform_0(%arg0: i32) -> (i32, i32) {
    %c0_i32 = arith.constant 0 : i32
    %c0_i32_0 = arith.constant 0 : i32
    %c0_i32_1 = arith.constant 0 : i32
    return %c0_i32, %c0_i32_0 : i32, i32
  }
  func.func @transform_1(%arg0: i32) -> (i32, i32) {
    %c0_i32 = arith.constant 0 : i32
    %c0_i32_0 = arith.constant 0 : i32
    %c0_i32_1 = arith.constant 0 : i32
    return %c0_i32, %c0_i32_0 : i32, i32
  }
  func.func @transform_2(%arg0: i32) -> (i32, i32) {
    %c0_i32 = arith.constant 0 : i32
    %c0_i32_0 = arith.constant 0 : i32
    %c0_i32_1 = arith.constant 0 : i32
    return %c0_i32, %c0_i32_0 : i32, i32
  }
  func.func @transform_3(%arg0: i32) -> (i32, i32, i32) {
    %c0_i32 = arith.constant 0 : i32
    %c0_i32_0 = arith.constant 0 : i32
    %c0_i32_1 = arith.constant 0 : i32
    %c0_i32_2 = arith.constant 0 : i32
    return %c0_i32, %c0_i32_0, %c0_i32_1 : i32, i32, i32
  }
  func.func @transform_4(%arg0: i32) -> (i32, i32, i32) {
    %c0_i32 = arith.constant 0 : i32
    %c0_i32_0 = arith.constant 0 : i32
    %c0_i32_1 = arith.constant 0 : i32
    %c0_i32_2 = arith.constant 0 : i32
    return %c0_i32, %c0_i32_0, %c0_i32_1 : i32, i32, i32
  }
  func.func @transform_5(%arg0: i32) -> (i32, i32, i32) {
    %c0_i32 = arith.constant 0 : i32
    %c0_i32_0 = arith.constant 0 : i32
    %c0_i32_1 = arith.constant 0 : i32
    %c0_i32_2 = arith.constant 0 : i32
    return %c0_i32, %c0_i32_0, %c0_i32_1 : i32, i32, i32
  }
  func.func @transform_6(%arg0: i32) -> (i32, i32, i32) {
    %c0_i32 = arith.constant 0 : i32
    %c0_i32_0 = arith.constant 0 : i32
    %c0_i32_1 = arith.constant 0 : i32
    %c0_i32_2 = arith.constant 0 : i32
    return %c0_i32, %c0_i32_0, %c0_i32_1 : i32, i32, i32
  }
  func.func @transform_7(%arg0: i32) -> (i32, i32, i32) {
    %c0_i32 = arith.constant 0 : i32
    %c0_i32_0 = arith.constant 0 : i32
    %c0_i32_1 = arith.constant 0 : i32
    %c0_i32_2 = arith.constant 0 : i32
    return %c0_i32, %c0_i32_0, %c0_i32_1 : i32, i32, i32
  }
  func.func @transform_8(%arg0: i32) -> (i32, i32, i32) {
    %c0_i32 = arith.constant 0 : i32
    %c0_i32_0 = arith.constant 0 : i32
    %c0_i32_1 = arith.constant 0 : i32
    %c0_i32_2 = arith.constant 0 : i32
    return %c0_i32, %c0_i32_0, %c0_i32_1 : i32, i32, i32
  }
  func.func @transform_9(%arg0: i32) -> (i32, i32, i32) {
    %c0_i32 = arith.constant 0 : i32
    %c0_i32_0 = arith.constant 0 : i32
    %c0_i32_1 = arith.constant 0 : i32
    %c0_i32_2 = arith.constant 0 : i32
    return %c0_i32, %c0_i32_0, %c0_i32_1 : i32, i32, i32
  }
  func.func @transform_10(%arg0: i32) -> (i32, i32, i32) {
    %c0_i32 = arith.constant 0 : i32
    %c0_i32_0 = arith.constant 0 : i32
    %c0_i32_1 = arith.constant 0 : i32
    %c0_i32_2 = arith.constant 0 : i32
    return %c0_i32, %c0_i32_0, %c0_i32_1 : i32, i32, i32
  }
  func.func @transform_11(%arg0: i32) -> (i32, i32, i32) {
    %c0_i32 = arith.constant 0 : i32
    %c0_i32_0 = arith.constant 0 : i32
    %c0_i32_1 = arith.constant 0 : i32
    %c0_i32_2 = arith.constant 0 : i32
    return %c0_i32, %c0_i32_0, %c0_i32_1 : i32, i32, i32
  }
  func.func @transform_12(%arg0: i32) -> (i32, i32, i32) {
    %c0_i32 = arith.constant 0 : i32
    %c0_i32_0 = arith.constant 0 : i32
    %c0_i32_1 = arith.constant 0 : i32
    %c0_i32_2 = arith.constant 0 : i32
    return %c0_i32, %c0_i32_0, %c0_i32_1 : i32, i32, i32
  }
  func.func @transform_13(%arg0: i32) -> (i32, i32, i32) {
    %c0_i32 = arith.constant 0 : i32
    %c0_i32_0 = arith.constant 0 : i32
    %c0_i32_1 = arith.constant 0 : i32
    %c0_i32_2 = arith.constant 0 : i32
    return %c0_i32, %c0_i32_0, %c0_i32_1 : i32, i32, i32
  }
  func.func @transform_14(%arg0: i32) -> (i32, i32, i32) {
    %c0_i32 = arith.constant 0 : i32
    %c0_i32_0 = arith.constant 0 : i32
    %c0_i32_1 = arith.constant 0 : i32
    %c0_i32_2 = arith.constant 0 : i32
    return %c0_i32, %c0_i32_0, %c0_i32_1 : i32, i32, i32
  }
  func.func @transform_15(%arg0: i32) -> (i32, i32, i32) {
    %c0_i32 = arith.constant 0 : i32
    %c0_i32_0 = arith.constant 0 : i32
    %c0_i32_1 = arith.constant 0 : i32
    %c0_i32_2 = arith.constant 0 : i32
    return %c0_i32, %c0_i32_0, %c0_i32_1 : i32, i32, i32
  }
  func.func @transform_16(%arg0: i32) -> (i32, i32, i32) {
    %c0_i32 = arith.constant 0 : i32
    %c0_i32_0 = arith.constant 0 : i32
    %c0_i32_1 = arith.constant 0 : i32
    %c0_i32_2 = arith.constant 0 : i32
    return %c0_i32, %c0_i32_0, %c0_i32_1 : i32, i32, i32
  }
  func.func @transform_17(%arg0: i32) -> (i32, i32, i32) {
    %c0_i32 = arith.constant 0 : i32
    %c0_i32_0 = arith.constant 0 : i32
    %c0_i32_1 = arith.constant 0 : i32
    %c0_i32_2 = arith.constant 0 : i32
    return %c0_i32, %c0_i32_0, %c0_i32_1 : i32, i32, i32
  }
  func.func @transform_18(%arg0: i32) -> (i32, i32, i32) {
    %c0_i32 = arith.constant 0 : i32
    %c0_i32_0 = arith.constant 0 : i32
    %c0_i32_1 = arith.constant 0 : i32
    %c0_i32_2 = arith.constant 0 : i32
    return %c0_i32, %c0_i32_0, %c0_i32_1 : i32, i32, i32
  }
  func.func @transform_19(%arg0: i32) -> (i32, i32) {
    %c0_i32 = arith.constant 0 : i32
    %c0_i32_0 = arith.constant 0 : i32
    %c0_i32_1 = arith.constant 0 : i32
    return %c0_i32, %c0_i32_0 : i32, i32
  }
  func.func @transform_20(%arg0: i32) -> (i32, i32) {
    %c0_i32 = arith.constant 0 : i32
    %c0_i32_0 = arith.constant 0 : i32
    %c0_i32_1 = arith.constant 0 : i32
    return %c0_i32, %c0_i32_0 : i32, i32
  }
  func.func @transform_21(%arg0: i32) -> (i32, i32) {
    %c0_i32 = arith.constant 0 : i32
    %c0_i32_0 = arith.constant 0 : i32
    %c0_i32_1 = arith.constant 0 : i32
    return %c0_i32, %c0_i32_0 : i32, i32
  }
  func.func @transform_22(%arg0: i32) -> (i32, i32) {
    %c0_i32 = arith.constant 0 : i32
    %c0_i32_0 = arith.constant 0 : i32
    %c0_i32_1 = arith.constant 0 : i32
    return %c0_i32, %c0_i32_0 : i32, i32
  }
  func.func @transform_23(%arg0: i32) -> (i32, i32) {
    %c0_i32 = arith.constant 0 : i32
    %c0_i32_0 = arith.constant 0 : i32
    %c0_i32_1 = arith.constant 0 : i32
    return %c0_i32, %c0_i32_0 : i32, i32
  }
}

</mosaic_0001>

<bundles_post_ra>
// kernel: _transformer_regressor_impl.1
= control target key start
LH: loop header
LB: loop body
LE: loop exit
PB: predicated region body
PF: predicated region fallthrough
CT: control target
= control target key end

     0   :  { %v4167_v0 = vmov 0.0   ;;  %vm4168_vm0 = vmmov 0   ;;  %vm95_vm1 = vcmask 130048   ;;  %vm164_vm2 = vcmask 261120   ;;  %s4169_s26 = smov 120   ;;  %s5042_s27 = smov 104   ;;  %s5009_s1 = inlined_call_operand.vmem [shape: bf16[16,32], index: 1, kind: input, shape index: {}]   ;;  %s5010_s0 = inlined_call_operand.vmem [shape: f32[16,16], index: 0, kind: input, shape index: {}]   ;;  %s5011_s3 = inlined_call_operand.vmem [shape: bf16[2,32,32], index: 3, kind: input, shape index: {}]   ;;  %s5012_s4 = inlined_call_operand.vmem [shape: bf16[2,32,32], index: 4, kind: input, shape index: {}]   ;;  %s5013_s5 = inlined_call_operand.vmem [shape: bf16[2,32,32], index: 5, kind: input, shape index: {}]   ;;  %s5014_s2 = inlined_call_operand.vmem [shape: f32[1,32], index: 2, kind: input, shape index: {}]   ;;  %s5015_s7 = inlined_call_operand.vmem [shape: f32[2,1,32], index: 7, kind: input, shape index: {}]   ;;  %s5016_s6 = inlined_call_operand.vmem [shape: f32[2,1,32], index: 6, kind: input, shape index: {}]   ;;  %s5017_s8 = inlined_call_operand.vmem [shape: f32[2,1,32], index: 8, kind: input, shape index: {}]   ;;  %s5018_s9 = inlined_call_operand.vmem [shape: bf16[2,32,32], index: 9, kind: input, shape index: {}]   ;;  %s5019_s10 = inlined_call_operand.vmem [shape: f32[2,1,32], index: 10, kind: input, shape index: {}]   ;;  %s5020_s13 = inlined_call_operand.vmem [shape: bf16[2,32,128], index: 13, kind: input, shape index: {}]   ;;  %s5021_s15 = inlined_call_operand.vmem [shape: bf16[2,128,32], index: 15, kind: input, shape index: {}]   ;;  %s5022_s11 = inlined_call_operand.vmem [shape: f32[2,1,32], index: 11, kind: input, shape index: {}]   ;;  %s5023_s12 = inlined_call_operand.vmem [shape: f32[2,1,32], index: 12, kind: input, shape index: {}]   ;;  %s5024_s14 = inlined_call_operand.vmem [shape: f32[2,1,128], index: 14, kind: input, shape index: {}]   ;;  %s5025_s16 = inlined_call_operand.vmem [shape: f32[2,1,32], index: 16, kind: input, shape index: {}]   ;;  %s5026_s17 = inlined_call_operand.vmem [shape: f32[2,1,32], index: 17, kind: input, shape index: {}]   ;;  %s5027_s18 = inlined_call_operand.vmem [shape: f32[2,1,32], index: 18, kind: input, shape index: {}]   ;;  %s5028_s19 = inlined_call_operand.vmem [shape: bf16[32,128], index: 19, kind: input, shape index: {}]   ;;  %s5029_s21 = inlined_call_operand.vmem [shape: f32[128,1], index: 21, kind: input, shape index: {}]   ;;  %s5030_s22 = inlined_call_operand.<no memory space> [shape: f32[1,1], index: 22, kind: input, shape index: {}]   ;;  %s5031_s20 = inlined_call_operand.vmem [shape: f32[1,128], index: 20, kind: input, shape index: {}]   ;;  %s5032_s23 = inlined_call_operand.vmem [shape: f32[2,128], index: 23, kind: output, shape index: {}]  }
   0x1   :  { %5044 = sst [smem:[#allocation3_spill]] %s5009_s1  ;;  %3636 = vmatprep.subr.bf16.mxu1 %v4167_v0  ;;  %3638 = vmatprep.mubr.msk.bf16.mxu1 %vm4168_vm0, %v4167_v0  ;;  %vm341_vm3 = vcmask 64512   ;;  %v3361_v34 = vld [vmem:[%s5017_s8] ss:$0 sm:$0xff]  ;;  %vm465_vm4 = vcmask 1043456   ;;  %s5041_s28 = smov 8  }
   0x2   :  { %5045 = sst [smem:[#allocation4_spill]] %s5010_s0  ;;  %s5052_s24 = sld [smem:[#allocation3_spill]]  ;;  %3650 = vmatprep.subr.bf16.mxu0 %v4167_v0  ;;  %3654 = vmatprep.mubr.msk.bf16.mxu0 %vm4168_vm0, %v4167_v0  ;;  %vm1255_vm5 = vcmask 195584   ;;  %vm1624_vm6 = vcmask 1041409   ;;  %vm1940_vm7 = vcmask 57344   ;;  %vm2845_vm8 = vcmask 261127  }
   0x3   :  { %5046 = sst [smem:[#allocation5_spill]] %s5011_s3  ;;  %s5053_s0 = sld [smem:[#allocation4_spill]]  ;;  %vm2849_vm9 = vcmask 253952  }
   0x4   :  { %5047 = sst [smem:[#allocation6_spill]] %s5012_s4  ;;  %s4170_s3 = smov 112  }
   0x5   :  { %5048 = sst [smem:[#allocation7_spill]] %s5013_s5  ;;  %s5055_s4 = sld [smem:[#allocation6_spill]] }
   0x6   :  { %5049 = sst [smem:[#allocation8_spill]] %s5014_s2  ;;  %s5040_s29 = smov 16  }
   0x7   :  { %5050 = sst [smem:[#allocation9_spill]] %s5015_s7  ;;  %s5057_s7 = sld [smem:[#allocation7_spill]] }
   0x8   :  { %5051 = sst [smem:[#allocation10_spill]] %s5016_s6  ;;  %v4048_v1 = vld [vmem:[%s5052_s24] sm:$0xff]   ;;  %s5054_s6 = sld [smem:[#allocation5_spill]] }
   0x9   :  { %v77_v2 = vld [vmem:[%s5053_s0] sm:$0xff]  ;;  %v78_v3 = vld [vmem:[%s5053_s0 + $0x8] sm:$0xff]  ;;  %3637 = vmatpush3.bf16.msra.mxu1 %v4048_v1  ;;  %s5056_s0 = sld [smem:[#allocation8_spill]]  ;;  %s5058_s5 = sld [smem:[#allocation9_spill]] }
   0xa   :  { %v79_v4 = vpack.c.bf16 %v78_v3, %v77_v2  ;;  %3642 = vmatprep.subr.bf16.mxu1 %v4167_v0  ;;  %s5059_s25 = sld [smem:[#allocation10_spill]]  ;;  %s5063_s24 = smov 24  }
   0xb   :  { %v4050_v6 = vld [vmem:[%s5055_s4] sm:$0xff]   ;;  %v4052_v8 = vld [vmem:[%s5055_s4 + $0x8] sm:$0xff]  }
   0xc   :  { %3639 = vmatmul.mubr.msk.bf16.vlgmr.msra.gmra.mrb[0].mxu1 %vm95_vm1, %v79_v4  ;;  %3651 = vmatpush3.bf16.msra.mxu0 %v4050_v6 }
   0xd   :  { %3646 = vmatprep.mubr.msk.bf16.mxu1 %vm4168_vm0, %v4167_v0  ;;  %3652 = vmatprep.subr.bf16.mxu0 %v4167_v0  ;;  %v4053_v16 = vld [vmem:[%s5057_s7] sm:$0xff]   ;;  %v4054_v18 = vld [vmem:[%s5057_s7 + $0x8] sm:$0xff]  }
   0xe   :  { %v4049_v5 = vld [vmem:[%s5054_s6] sm:$0xff]   ;;  %v4051_v7 = vld [vmem:[%s5054_s6 + $0x8] sm:$0xff]  }
   0xf   :  { %3643 = vmatpush3.bf16.msra.mxu1 %v4049_v5  ;;  %v3350_v9 = vld [vmem:[%s5056_s0] ss:$0 sm:$0xff]  ;;  %s5039_s0 = smov 24  }
  0x10   :  { %3644 = vmatprep.subr.bf16.mxu1 %v4167_v0  ;;  %3653 = vmatpush3.bf16.msra.mxu0 %v4052_v8  ;;  %v3357_v19 = vld [vmem:[%s5058_s5] ss:$0 sm:$0xff] }
  0x11   :  { %3666 = vmatprep.subr.bf16.mxu0 %v4167_v0  ;;  %v3353_v31 = vld [vmem:[%s5059_s25] ss:$0 sm:$0xff] }
  0x13   :  { %3645 = vmatpush3.bf16.msra.mxu1 %v4051_v7 }
  0x14   :  { %3658 = vmatprep.subr.bf16.mxu1 %v4167_v0 }
  0xdf   :  { %v133_v10 = vpop.f32.mrb[0].mxu1 }
  0xe0   :  { %v3640_v11 = vpop.f32.mrb[1].mxu1  ;;  %v4336_v13 = vadd.f32 %v3350_v9, %v133_v10 }
  0xe1   :  { %v136_v12 = vpop.f32.mrb[2].mxu1 }
  0xe2   :  { %v4338_v14 = vadd.f32 %v3350_v9, %v136_v12  ;;  %v3641_v15 = vpop.f32.mrb[3].mxu1 }
  0xe4   :  { %v140_v17 = vpack.c.bf16 %v4338_v14, %v4336_v13 }
  0xe6   :  { %3647 = vmatmul.mubr.msk.bf16.vlgmr.msra.gmra.mrb[4].mxu1 %vm164_vm2, %v140_v17  ;;  %3655 = vmatmul.mubr.msk.bf16.vlgmr.msra.gmra.mrb[0].mxu0 %vm164_vm2, %v140_v17 }
  0xe7   :  { %3659 = vmatpush3.bf16.msra.mxu1 %v4053_v16  ;;  %3662 = vmatprep.mubr.msk.bf16.mxu1 %vm4168_vm0, %v4167_v0 }
  0xe8   :  { %3660 = vmatprep.subr.bf16.mxu1 %v4167_v0  ;;  %3668 = vmatprep.mubr.msk.bf16.mxu0 %vm4168_vm0, %v4167_v0 }
  0xeb   :  { %3661 = vmatpush3.bf16.msra.mxu1 %v4054_v18 }
  0xec   :  { %3672 = vmatprep.subr.bf16.mxu1 %v4167_v0 }
  0xee   :  { %3663 = vmatmul.mubr.msk.bf16.vlgmr.msra.gmra.mrb[8].mxu1 %vm164_vm2, %v140_v17 }
  0xef   :  { %3674 = vmatprep.mubr.msk.bf16.mxu1 %vm4168_vm0, %v4167_v0 }
 0x1b9   :  { %v202_v20 = vpop.f32.mrb[4].mxu1  ;;  %v266_v21 = vpop.f32.mrb[0].mxu0 }
 0x1ba   :  { %v267_v22 = vadd.f32 %v3357_v19, %v266_v21  ;;  %v3648_v23 = vpop.f32.mrb[5].mxu1  ;;  %v3656_v24 = vpop.f32.mrb[1].mxu0  ;;  %v203_v35 = vadd.f32 %v3353_v31, %v202_v20 }
 0x1bb   :  { %v205_v25 = vpop.f32.mrb[6].mxu1  ;;  %v269_v26 = vpop.f32.mrb[2].mxu0 }
 0x1bc   :  { %v4362_v27 = vpack.c.bf16 %v267_v22, %v267_v22  ;;  %v270_v28 = vadd.f32 %v3357_v19, %v269_v26  ;;  %v3649_v29 = vpop.f32.mrb[7].mxu1  ;;  %v3657_v30 = vpop.f32.mrb[3].mxu0  ;;  %v206_v38 = vadd.f32 %v3353_v31, %v205_v25  ;;  %v4380_v42 = vpack.c.bf16 %v203_v35, %v203_v35 }
 0x1be   :  { %v4367_v32 = vpack.c.bf16 %v270_v28, %v270_v28  ;;  %v346_v33 = vsel %vm341_vm3, %v4362_v27, 0  ;;  %v4384_v46 = vpack.c.bf16 %v206_v38, %v206_v38 }
 0x1bf   :  { %3667 = vmatpush3.bf16.xpose.msra.mxu0 %v346_v33 }
 0x1c0   :  { %611 = vrot.lane.b32.xlu1 %v4367_v32, %s4169_s26  ;;  %v392_v36 = vsel %vm341_vm3, %v4367_v32, 0  ;;  %3678 = vmatprep.subr.bf16.mxu0 %v4167_v0 }
 0x1c1   :  { %v330_v37 = vpop.f32.mrb[8].mxu1  ;;  %3673 = vmatpush3.bf16.xpose.msra.mxu1 %v392_v36 }
 0x1c2   :  { %v331_v39 = vadd.f32 %v3361_v34, %v330_v37  ;;  %v3664_v40 = vpop.f32.mrb[9].mxu1  ;;  %3684 = vmatprep.subr.bf16.mxu1 %v4167_v0 }
 0x1c3   :  { %v333_v41 = vpop.f32.mrb[10].mxu1 }
 0x1c4   :  { %v4382_v43 = vpack.c.bf16 %v331_v39, %v331_v39  ;;  %v334_v44 = vadd.f32 %v3361_v34, %v333_v41  ;;  %v3665_v45 = vpop.f32.mrb[11].mxu1 }
 0x1c6   :  { %v4386_v47 = vpack.c.bf16 %v334_v44, %v334_v44  ;;  %3669 = vmatmul.mubr.msk.bf16.vlgmr.msra.gmra.mrb[4].mxu0 %vm341_vm3, %v4380_v42  ;;  %v467_v48 = vsel %vm465_vm4, %v4382_v43, 0 }
 0x1c7   :  { %3679 = vmatpush3.bf16.msra.mxu0 %v467_v48  ;;  %3680 = vmatprep.mubr.msk.bf16.mxu0 %vm4168_vm0, %v4167_v0 }
 0x1c8   :  { %3675 = vmatmul.mubr.msk.bf16.vlgmr.msra.gmra.mrb[12].mxu1 %vm341_vm3, %v4384_v46  ;;  %v513_v49 = vsel %vm465_vm4, %v4386_v47, 0  ;;  %3690 = vmatprep.subr.bf16.mxu0 %v4167_v0 }
 0x1c9   :  { %3685 = vmatpush3.bf16.msra.mxu1 %v513_v49  ;;  %3686 = vmatprep.mubr.msk.bf16.mxu1 %vm4168_vm0, %v4167_v0 }
 0x1ca   :  { %3696 = vmatprep.subr.bf16.mxu1 %v4167_v0 }
 0x232   :  { %v612_v9 = vpop.permute.xlu1 %611 }
 0x233   :  { %v617_v22 = vsel %vm341_vm3, %v612_v9, 0 }
 0x299   :  { %v382_v50 = vpop.f32.mrb[4].mxu0 }
 0x29a   :  { %v434_v51 = vmul.f32 0.35355338, %v382_v50  ;;  %v3670_v52 = vpop.f32.mrb[5].mxu0 }
 0x29b   :  { %v385_v53 = vpop.f32.mrb[6].mxu0  ;;  %v428_v54 = vpop.f32.mrb[12].mxu1 }
 0x29c   :  { %v435_v55 = vmul.f32 0.35355338, %v428_v54  ;;  %v3671_v56 = vpop.f32.mrb[7].mxu0  ;;  %v3676_v57 = vpop.f32.mrb[13].mxu1  ;;  %v436_v58 = vsel %vm341_vm3, %v434_v51, -inf }
 0x29d   :  { %437 = vmax.xlane.f32.xlu0 %v436_v58  ;;  %v431_v59 = vpop.f32.mrb[14].mxu1 }
 0x29e   :  { %v3677_v60 = vpop.f32.mrb[15].mxu1  ;;  %v439_v61 = vsel %vm341_vm3, %v435_v55, -inf }
 0x2a1   :  { %440 = vmax.xlane.f32.xlu0 %v439_v61 }
 0x2b7   :  { %559 = vrot.lane.b32.xlu0 %v4362_v27, %s4169_s26 }
 0x32a   :  { %v438_v62 = vpop.xlane.xlu0 %437 }
 0x32b   :  { %v442_v63 = vsub.f32 %v434_v51, %v438_v62 }
 0x32d   :  { %v444_v1 = vmul.f32 1.442695, %v442_v63 }
 0x32e   :  { %v441_v2 = vpop.xlane.xlu0 %440 }
 0x32f   :  { %4087 = vpow2.f32 %v444_v1  ;;  %v443_v3 = vsub.f32 %v435_v55, %v441_v2 }
 0x331   :  { %v446_v4 = vmul.f32 1.442695, %v443_v3 }
 0x332   :  { %v560_v16 = vpop.permute.xlu0 %559 }
 0x333   :  { %4089 = vpow2.f32 %v446_v4  ;;  %v565_v19 = vsel %vm341_vm3, %v560_v16, 0 }
 0x339   :  { %v4088_v5 = vpop.eup %4087 }
 0x33a   :  { %v448_v6 = vsel %vm341_vm3, %v4088_v5, 0.0 }
 0x33b   :  { %449 = vadd.xlane.f32.xlu1 %v448_v6 }
 0x33d   :  { %v4090_v7 = vpop.eup %4089 }
 0x33e   :  { %v451_v8 = vsel %vm341_vm3, %v4090_v7, 0.0 }
 0x33f   :  { %452 = vadd.xlane.f32.xlu1 %v451_v8 }
 0x350   :  { %556 = vrot.lane.b32.xlu1 %v4380_v42, %s4169_s26 }
 0x354   :  { %608 = vrot.lane.b32.xlu1 %v4384_v46, %s4169_s26 }
 0x3c8   :  { %v450_v10 = vpop.xlane.xlu1 %449 }
 0x3c9   :  { %4091 = vrcp.f32 %v450_v10 }
 0x3cc   :  { %v453_v11 = vpop.xlane.xlu1 %452 }
 0x3cd   :  { %4093 = vrcp.f32 %v453_v11 }
 0x3d0   :  { %v557_v23 = vpop.permute.xlu1 %556 }
 0x3d3   :  { %v4092_v12 = vpop.eup %4091 }
 0x3d4   :  { %v456_v15 = vmul.f32 %v4092_v12, %v4088_v5  ;;  %v609_v24 = vpop.permute.xlu1 %608 }
 0x3d6   :  { %v458_v17 = vpack.c.bf16 %v456_v15, %v456_v15 }
 0x3d7   :  { %v4094_v18 = vpop.eup %4093 }
 0x3d8   :  { %v457_v20 = vmul.f32 %v4094_v18, %v4090_v7  ;;  %3681 = vmatmul.mubr.msk.bf16.vlgmr.msra.gmra.mrb[8].mxu0 %vm341_vm3, %v458_v17 }
 0x3d9   :  { %3691 = vmatpush3.bf16.xpose.msra.mxu0 %v565_v19  ;;  %3692 = vmatprep.mubr.msk.bf16.mxu0 %vm4168_vm0, %v4167_v0 }
 0x3da   :  { %v459_v21 = vpack.c.bf16 %v457_v20, %v457_v20  ;;  %3702 = vmatprep.subr.bf16.mxu0 %v4167_v0 }
 0x3dc   :  { %3687 = vmatmul.mubr.msk.bf16.vlgmr.msra.gmra.mrb[16].mxu1 %vm341_vm3, %v459_v21 }
 0x3dd   :  { %3697 = vmatpush3.bf16.xpose.msra.mxu1 %v617_v22  ;;  %3698 = vmatprep.mubr.msk.bf16.mxu1 %vm4168_vm0, %v4167_v0 }
 0x3de   :  { %3708 = vmatprep.subr.bf16.mxu1 %v4167_v0 }
 0x3e0   :  { %3693 = vmatmul.mubr.msk.bf16.vlgmr.msra.gmra.mrb[12].mxu0 %vm341_vm3, %v557_v23 }
 0x3e1   :  { %3704 = vmatprep.mubr.msk.bf16.mxu0 %vm4168_vm0, %v4167_v0 }
 0x3e4   :  { %3699 = vmatmul.mubr.msk.bf16.vlgmr.msra.gmra.mrb[20].mxu1 %vm341_vm3, %v609_v24 }
 0x3e5   :  { %3710 = vmatprep.mubr.msk.bf16.mxu1 %vm4168_vm0, %v4167_v0 }
 0x4ab   :  { %v4428_v25 = vpop.f32.mrb[8].mxu0 }
 0x4ac   :  { %v3682_v26 = vpop.f32.mrb[9].mxu0 }
 0x4ad   :  { %v506_v28 = vpop.f32.mrb[10].mxu0 }
 0x4ae   :  { %v3683_v29 = vpop.f32.mrb[11].mxu0 }
 0x4af   :  { %v4430_v30 = vpop.f32.mrb[16].mxu1 }
 0x4b0   :  { %v3688_v31 = vpop.f32.mrb[17].mxu1 }
 0x4b1   :  { %v552_v33 = vpop.f32.mrb[18].mxu1 }
 0x4b2   :  { %v3689_v34 = vpop.f32.mrb[19].mxu1 }
 0x4b3   :  { %v601_v35 = vpop.f32.mrb[12].mxu0 }
 0x4b4   :  { %v659_v36 = vmul.f32 0.35355338, %v601_v35  ;;  %v3694_v37 = vpop.f32.mrb[13].mxu0 }
 0x4b5   :  { %v604_v38 = vpop.f32.mrb[14].mxu0 }
 0x4b6   :  { %v3695_v39 = vpop.f32.mrb[15].mxu0  ;;  %v661_v40 = vsel %vm341_vm3, %v659_v36, -inf }
 0x4b7   :  { %662 = vmax.xlane.f32.xlu0 %v661_v40  ;;  %v653_v41 = vpop.f32.mrb[20].mxu1 }
 0x4b8   :  { %v660_v44 = vmul.f32 0.35355338, %v653_v41  ;;  %v3700_v45 = vpop.f32.mrb[21].mxu1 }
 0x4b9   :  { %v656_v48 = vpop.f32.mrb[22].mxu1 }
 0x4ba   :  { %v3701_v49 = vpop.f32.mrb[23].mxu1  ;;  %v664_v50 = vsel %vm341_vm3, %v660_v44, -inf }
 0x4bb   :  { %665 = vmax.xlane.f32.xlu1 %v664_v50 }
 0x4cc   :  { %735 = vrot.lane.b32.xlu1 %v4386_v47, %s4169_s26 }
 0x4d0   :  { %785 = vrot.lane.b32.xlu1 %v4362_v27, %s4170_s3 }
 0x4d4   :  { %835 = vrot.lane.b32.xlu1 %v4367_v32, %s4170_s3 }
 0x4d8   :  { %833 = vrot.lane.b32.xlu1 %v4384_v46, %s4170_s3 }
 0x544   :  { %v663_v51 = vpop.xlane.xlu0 %662 }
 0x545   :  { %v667_v52 = vsub.f32 %v659_v36, %v663_v51 }
 0x547   :  { %v669_v53 = vmul.f32 1.442695, %v667_v52 }
 0x548   :  { %v666_v54 = vpop.xlane.xlu1 %665 }
 0x549   :  { %4095 = vpow2.f32 %v669_v53  ;;  %v668_v55 = vsub.f32 %v660_v44, %v666_v54 }
 0x54b   :  { %v671_v56 = vmul.f32 1.442695, %v668_v55 }
 0x54c   :  { %v736_v57 = vpop.permute.xlu1 %735 }
 0x54d   :  { %4097 = vpow2.f32 %v671_v56  ;;  %v741_v58 = vsel %vm465_vm4, %v736_v57, 0 }
 0x54e   :  { %3709 = vmatpush3.bf16.msra.mxu1 %v741_v58 }
 0x54f   :  { %3720 = vmatprep.subr.bf16.mxu1 %v4167_v0 }
 0x550   :  { %v786_v5 = vpop.permute.xlu1 %785 }
 0x551   :  { %v791_v11 = vsel %vm341_vm3, %v786_v5, 0 }
 0x553   :  { %v4096_v59 = vpop.eup %4095 }
 0x554   :  { %v673_v60 = vsel %vm341_vm3, %v4096_v59, 0.0  ;;  %v836_v10 = vpop.permute.xlu1 %835 }
 0x555   :  { %674 = vadd.xlane.f32.xlu0 %v673_v60  ;;  %v841_v15 = vsel %vm341_vm3, %v836_v10, 0 }
 0x557   :  { %v4098_v61 = vpop.eup %4097 }
 0x558   :  { %v676_v62 = vsel %vm341_vm3, %v4098_v61, 0.0  ;;  %v834_v17 = vpop.permute.xlu1 %833 }
 0x559   :  { %677 = vadd.xlane.f32.xlu0 %v676_v62 }
 0x56f   :  { %686 = vrot.lane.b32.xlu0 %v4382_v43, %s4169_s26 }
 0x573   :  { %783 = vrot.lane.b32.xlu0 %v4380_v42, %s4170_s3 }
 0x5e2   :  { %v675_v63 = vpop.xlane.xlu0 %674 }
 0x5e3   :  { %4099 = vrcp.f32 %v675_v63 }
 0x5e6   :  { %v678_v1 = vpop.xlane.xlu0 %677 }
 0x5e7   :  { %4101 = vrcp.f32 %v678_v1 }
 0x5ea   :  { %v687_v2 = vpop.permute.xlu0 %686 }
 0x5eb   :  { %v692_v3 = vsel %vm465_vm4, %v687_v2, 0 }
 0x5ec   :  { %3703 = vmatpush3.bf16.msra.mxu0 %v692_v3 }
 0x5ed   :  { %v4100_v4 = vpop.eup %4099  ;;  %3714 = vmatprep.subr.bf16.mxu0 %v4167_v0 }
 0x5ee   :  { %v681_v6 = vmul.f32 %v4100_v4, %v4096_v59  ;;  %v784_v16 = vpop.permute.xlu0 %783 }
 0x5f0   :  { %v683_v7 = vpack.c.bf16 %v681_v6, %v681_v6 }
 0x5f1   :  { %v4102_v8 = vpop.eup %4101 }
 0x5f2   :  { %v682_v9 = vmul.f32 %v4102_v8, %v4098_v61  ;;  %3705 = vmatmul.mubr.msk.bf16.vlgmr.msra.gmra.mrb[16].mxu0 %vm341_vm3, %v683_v7 }
 0x5f3   :  { %3716 = vmatprep.mubr.msk.bf16.mxu0 %vm4168_vm0, %v4167_v0 }
 0x5f4   :  { %v684_v12 = vpack.c.bf16 %v682_v9, %v682_v9 }
 0x5f5   :  { %3715 = vmatpush3.bf16.xpose.msra.mxu0 %v791_v11 }
 0x5f6   :  { %3711 = vmatmul.mubr.msk.bf16.vlgmr.msra.gmra.mrb[24].mxu1 %vm341_vm3, %v684_v12  ;;  %3726 = vmatprep.subr.bf16.mxu0 %v4167_v0 }
 0x5f7   :  { %3721 = vmatpush3.bf16.xpose.msra.mxu1 %v841_v15  ;;  %3722 = vmatprep.mubr.msk.bf16.mxu1 %vm4168_vm0, %v4167_v0 }
 0x5f8   :  { %3732 = vmatprep.subr.bf16.mxu1 %v4167_v0 }
 0x5fc   :  { %3717 = vmatmul.mubr.msk.bf16.vlgmr.msra.gmra.mrb[20].mxu0 %vm341_vm3, %v784_v16 }
 0x5fd   :  { %3728 = vmatprep.mubr.msk.bf16.mxu0 %vm4168_vm0, %v4167_v0 }
 0x5fe   :  { %3723 = vmatmul.mubr.msk.bf16.vlgmr.msra.gmra.mrb[28].mxu1 %vm341_vm3, %v834_v17 }
 0x5ff   :  { %3734 = vmatprep.mubr.msk.bf16.mxu1 %vm4168_vm0, %v4167_v0 }
 0x6c5   :  { %v4468_v18 = vpop.f32.mrb[16].mxu0 }
 0x6c6   :  { %v3706_v19 = vpop.f32.mrb[17].mxu0 }
 0x6c7   :  { %v731_v20 = vpop.f32.mrb[18].mxu0 }
 0x6c8   :  { %v3707_v21 = vpop.f32.mrb[19].mxu0 }
 0x6c9   :  { %v4470_v22 = vpop.f32.mrb[24].mxu1 }
 0x6ca   :  { %v4032_v23 = vpack.i.bf16 %v4470_v22, %v4468_v18  ;;  %v3712_v24 = vpop.f32.mrb[25].mxu1 }
 0x6cb   :  { %v780_v26 = vpop.f32.mrb[26].mxu1 }
 0x6cc   :  { %v3713_v28 = vpop.f32.mrb[27].mxu1 }
 0x6cf   :  { %v827_v29 = vpop.f32.mrb[20].mxu0 }
 0x6d0   :  { %v883_v31 = vmul.f32 0.35355338, %v827_v29  ;;  %v3718_v33 = vpop.f32.mrb[21].mxu0 }
 0x6d1   :  { %v830_v34 = vpop.f32.mrb[22].mxu0  ;;  %v877_v35 = vpop.f32.mrb[28].mxu1 }
 0x6d2   :  { %v884_v36 = vmul.f32 0.35355338, %v877_v35  ;;  %v3719_v37 = vpop.f32.mrb[23].mxu0  ;;  %v3724_v38 = vpop.f32.mrb[29].mxu1  ;;  %v885_v39 = vsel %vm341_vm3, %v883_v31, -inf }
 0x6d3   :  { %886 = vmax.xlane.f32.xlu0 %v885_v39  ;;  %v880_v40 = vpop.f32.mrb[30].mxu1 }
 0x6d4   :  { %v3725_v41 = vpop.f32.mrb[31].mxu1  ;;  %v888_v44 = vsel %vm341_vm3, %v884_v36, -inf }
 0x6d5   :  { %889 = vmax.xlane.f32.xlu1 %v888_v44 }
 0x6e6   :  { %957 = vrot.lane.b32.xlu1 %v4386_v47, %s4170_s3 }
 0x6ea   :  { %1007 = vrot.lane.b32.xlu1 %v4362_v27, %s5042_s27 }
 0x6ee   :  { %1057 = vrot.lane.b32.xlu1 %v4367_v32, %s5042_s27 }
 0x6f2   :  { %1055 = vrot.lane.b32.xlu1 %v4384_v46, %s5042_s27 }
 0x760   :  { %v887_v45 = vpop.xlane.xlu0 %886 }
 0x761   :  { %v891_v48 = vsub.f32 %v883_v31, %v887_v45 }
 0x762   :  { %v890_v49 = vpop.xlane.xlu1 %889 }
 0x763   :  { %v893_v50 = vmul.f32 1.442695, %v891_v48  ;;  %v892_v51 = vsub.f32 %v884_v36, %v890_v49 }
 0x765   :  { %4103 = vpow2.f32 %v893_v50  ;;  %v895_v52 = vmul.f32 1.442695, %v892_v51 }
 0x766   :  { %v958_v53 = vpop.permute.xlu1 %957 }
 0x767   :  { %4105 = vpow2.f32 %v895_v52  ;;  %v963_v54 = vsel %vm465_vm4, %v958_v53, 0 }
 0x768   :  { %3733 = vmatpush3.bf16.msra.mxu1 %v963_v54 }
 0x769   :  { %3744 = vmatprep.subr.bf16.mxu1 %v4167_v0 }
 0x76a   :  { %v1008_v61 = vpop.permute.xlu1 %1007 }
 0x76e   :  { %v1058_v3 = vpop.permute.xlu1 %1057 }
 0x76f   :  { %v4104_v27 = vpop.eup %4103  ;;  %v1063_v5 = vsel %vm341_vm3, %v1058_v3, 0 }
 0x770   :  { %v897_v32 = vsel %vm341_vm3, %v4104_v27, 0.0 }
 0x771   :  { %v4106_v55 = vpop.eup %4105  ;;  %898 = vadd.xlane.f32.xlu0 %v897_v32 }
 0x772   :  { %v900_v46 = vsel %vm341_vm3, %v4106_v55, 0.0  ;;  %v1056_v7 = vpop.permute.xlu1 %1055 }
 0x775   :  { %901 = vadd.xlane.f32.xlu0 %v900_v46 }
 0x78b   :  { %909 = vrot.lane.b32.xlu0 %v4382_v43, %s4170_s3 }
 0x78f   :  { %1005 = vrot.lane.b32.xlu0 %v4380_v42, %s5042_s27  ;;  %v1013_v42 = vsel %vm341_vm3, %v1008_v61, 0 }
 0x7fe   :  { %v899_v56 = vpop.xlane.xlu0 %898 }
 0x7ff   :  { %4107 = vrcp.f32 %v899_v56  ;;  %v4055_v56 = vld [vmem:[%s5018_s9] sm:$0xff]  }
 0x802   :  { %v902_v57 = vpop.xlane.xlu0 %901 }
 0x803   :  { %4109 = vrcp.f32 %v902_v57  ;;  %v4056_v57 = vld [vmem:[%s5018_s9 + $0x8] sm:$0xff]  }
 0x806   :  { %v910_v58 = vpop.permute.xlu0 %909 }
 0x807   :  { %v915_v59 = vsel %vm465_vm4, %v910_v58, 0 }
 0x808   :  { %3727 = vmatpush3.bf16.msra.mxu0 %v915_v59 }
 0x809   :  { %v4108_v60 = vpop.eup %4107  ;;  %3738 = vmatprep.subr.bf16.mxu0 %v4167_v0 }
 0x80a   :  { %v905_v62 = vmul.f32 %v4108_v60, %v4104_v27  ;;  %v1006_v6 = vpop.permute.xlu0 %1005 }
 0x80c   :  { %v907_v63 = vpack.c.bf16 %v905_v62, %v905_v62 }
 0x80d   :  { %v4110_v1 = vpop.eup %4109 }
 0x80e   :  { %v906_v2 = vmul.f32 %v4110_v1, %v4106_v55  ;;  %3729 = vmatmul.mubr.msk.bf16.vlgmr.msra.gmra.mrb[24].mxu0 %vm341_vm3, %v907_v63 }
 0x80f   :  { %3740 = vmatprep.mubr.msk.bf16.mxu0 %vm4168_vm0, %v4167_v0 }
 0x810   :  { %v908_v4 = vpack.c.bf16 %v906_v2, %v906_v2 }
 0x811   :  { %3739 = vmatpush3.bf16.xpose.msra.mxu0 %v1013_v42 }
 0x812   :  { %3735 = vmatmul.mubr.msk.bf16.vlgmr.msra.gmra.mrb[32].mxu1 %vm341_vm3, %v908_v4  ;;  %3750 = vmatprep.subr.bf16.mxu0 %v4167_v0 }
 0x813   :  { %3745 = vmatpush3.bf16.xpose.msra.mxu1 %v1063_v5  ;;  %3746 = vmatprep.mubr.msk.bf16.mxu1 %vm4168_vm0, %v4167_v0 }
 0x814   :  { %3756 = vmatprep.subr.bf16.mxu1 %v4167_v0 }
 0x818   :  { %3741 = vmatmul.mubr.msk.bf16.vlgmr.msra.gmra.mrb[28].mxu0 %vm341_vm3, %v1006_v6 }
 0x819   :  { %3752 = vmatprep.mubr.msk.bf16.mxu0 %vm4168_vm0, %v4167_v0 }
 0x81a   :  { %3747 = vmatmul.mubr.msk.bf16.vlgmr.msra.gmra.mrb[36].mxu1 %vm341_vm3, %v1056_v7 }
 0x81b   :  { %3758 = vmatprep.mubr.msk.bf16.mxu1 %vm4168_vm0, %v4167_v0 }
 0x8e1   :  { %v951_v8 = vpop.f32.mrb[24].mxu0 }
 0x8e2   :  { %v3730_v9 = vpop.f32.mrb[25].mxu0 }
 0x8e3   :  { %v954_v10 = vpop.f32.mrb[26].mxu0 }
 0x8e4   :  { %v3731_v11 = vpop.f32.mrb[27].mxu0 }
 0x8e5   :  { %v999_v12 = vpop.f32.mrb[32].mxu1 }
 0x8e6   :  { %v4037_v15 = vpack.i.bf16 %v999_v12, %v951_v8  ;;  %v3736_v16 = vpop.f32.mrb[33].mxu1 }
 0x8e7   :  { %v1002_v17 = vpop.f32.mrb[34].mxu1 }
 0x8e8   :  { %v3737_v19 = vpop.f32.mrb[35].mxu1 }
 0x8eb   :  { %v1049_v20 = vpop.f32.mrb[28].mxu0 }
 0x8ec   :  { %v1105_v21 = vmul.f32 0.35355338, %v1049_v20  ;;  %v3742_v24 = vpop.f32.mrb[29].mxu0 }
 0x8ed   :  { %v1052_v26 = vpop.f32.mrb[30].mxu0  ;;  %v1099_v28 = vpop.f32.mrb[36].mxu1 }
 0x8ee   :  { %v1106_v29 = vmul.f32 0.35355338, %v1099_v28  ;;  %v3743_v31 = vpop.f32.mrb[31].mxu0  ;;  %v3748_v33 = vpop.f32.mrb[37].mxu1  ;;  %v1107_v34 = vsel %vm341_vm3, %v1105_v21, -inf }
 0x8ef   :  { %1108 = vmax.xlane.f32.xlu0 %v1107_v34  ;;  %v1102_v35 = vpop.f32.mrb[38].mxu1 }
 0x8f0   :  { %v3749_v36 = vpop.f32.mrb[39].mxu1  ;;  %v1110_v37 = vsel %vm341_vm3, %v1106_v29, -inf }
 0x8f1   :  { %1111 = vmax.xlane.f32.xlu1 %v1110_v37 }
 0x902   :  { %1179 = vrot.lane.b32.xlu1 %v4386_v47, %s5042_s27 }
 0x906   :  { %4033 = vrot.lane.b32.xlu1 %v4032_v23, %s5041_s28 }
 0x90a   :  { %4038 = vrot.lane.b32.xlu1 %v4037_v15, %s5040_s29 }
 0x97c   :  { %v1109_v38 = vpop.xlane.xlu0 %1108 }
 0x97d   :  { %v1113_v39 = vsub.f32 %v1105_v21, %v1109_v38 }
 0x97e   :  { %v1112_v40 = vpop.xlane.xlu1 %1111 }
 0x97f   :  { %v1115_v41 = vmul.f32 1.442695, %v1113_v39  ;;  %v1114_v44 = vsub.f32 %v1106_v29, %v1112_v40 }
 0x981   :  { %4111 = vpow2.f32 %v1115_v41  ;;  %v1117_v45 = vmul.f32 1.442695, %v1114_v44 }
 0x982   :  { %v1180_v48 = vpop.permute.xlu1 %1179 }
 0x983   :  { %4113 = vpow2.f32 %v1117_v45  ;;  %v1185_v47 = vsel %vm465_vm4, %v1180_v48, 0 }
 0x984   :  { %3757 = vmatpush3.bf16.msra.mxu1 %v1185_v47 }
 0x985   :  { %3770 = vmatprep.subr.bf16.mxu1 %v4167_v0 }
 0x986   :  { %v4034_v42 = vpop.permute.xlu1 %4033 }
 0x987   :  { %v4036_v5 = vunpack.i.h.bf16 %v4034_v42  ;;  %v4035_v6 = vunpack.i.l.bf16 %v4034_v42  ;;  %v4066_v42 = vld [vmem:[%s5021_s15 + $0x38] sm:$0xff]  }
 0x989   :  { %v1252_v10 = vsel %vm341_vm3, %v4430_v30, %v4036_v5  ;;  %v1251_v11 = vsel %vm341_vm3, %v4428_v25, %v4035_v6  ;;  %v3381_v25 = vld [vmem:[%s5019_s10] ss:$0 sm:$0xff] }
 0x98a   :  { %v4039_v4 = vpop.permute.xlu1 %4038 }
 0x98b   :  { %v4112_v49 = vpop.eup %4111  ;;  %v4041_v7 = vunpack.i.h.bf16 %v4039_v4  ;;  %v4040_v8 = vunpack.i.l.bf16 %v4039_v4  ;;  %v3387_v4 = vld [vmem:[%s5024_s14] ss:$0 sm:$0xff] }
 0x98c   :  { %v1119_v18 = vsel %vm341_vm3, %v4112_v49, 0.0 }
 0x98d   :  { %v4114_v22 = vpop.eup %4113  ;;  %1120 = vadd.xlane.f32.xlu0 %v1119_v18  ;;  %v1253_v16 = vsel %vm95_vm1, %v1251_v11, %v4040_v8  ;;  %v1254_v17 = vsel %vm95_vm1, %v1252_v10, %v4041_v7  ;;  %v4059_v18 = vld [vmem:[%s5021_s15] sm:$0xff]  }
 0x98e   :  { %v1122_v23 = vsel %vm341_vm3, %v4114_v22, 0.0 }
 0x991   :  { %1123 = vadd.xlane.f32.xlu0 %v1122_v23  ;;  %v4061_v23 = vld [vmem:[%s5021_s15 + $0x10] sm:$0xff]  }
 0x9a7   :  { %1131 = vrot.lane.b32.xlu0 %v4382_v43, %s5042_s27 }
 0xa1a   :  { %v1121_v50 = vpop.xlane.xlu0 %1120 }
 0xa1b   :  { %4115 = vrcp.f32 %v1121_v50  ;;  %v4062_v50 = vld [vmem:[%s5021_s15 + $0x18] sm:$0xff]  }
 0xa1e   :  { %v1124_v51 = vpop.xlane.xlu0 %1123 }
 0xa1f   :  { %4117 = vrcp.f32 %v1124_v51  ;;  %v4063_v51 = vld [vmem:[%s5021_s15 + $0x20] sm:$0xff]  }
 0xa22   :  { %v1132_v52 = vpop.permute.xlu0 %1131 }
 0xa23   :  { %v1137_v53 = vsel %vm465_vm4, %v1132_v52, 0  ;;  %v4064_v52 = vld [vmem:[%s5021_s15 + $0x28] sm:$0xff]  }
 0xa24   :  { %3751 = vmatpush3.bf16.msra.mxu0 %v1137_v53 }
 0xa25   :  { %v4116_v54 = vpop.eup %4115  ;;  %3762 = vmatprep.subr.bf16.mxu0 %v4167_v0 }
 0xa26   :  { %v1127_v27 = vmul.f32 %v4116_v54, %v4112_v49  ;;  %v4058_v49 = vld [vmem:[%s5020_s13 + $0x8] sm:$0xff]  }
 0xa28   :  { %v1129_v32 = vpack.c.bf16 %v1127_v27, %v1127_v27 }
 0xa29   :  { %v4118_v55 = vpop.eup %4117 }
 0xa2a   :  { %v1128_v46 = vmul.f32 %v4118_v55, %v4114_v22  ;;  %3753 = vmatmul.mubr.msk.bf16.vlgmr.msra.gmra.mrb[32].mxu0 %vm341_vm3, %v1129_v32  ;;  %v4060_v22 = vld [vmem:[%s5021_s15 + $0x8] sm:$0xff]  }
 0xa2b   :  { %3766 = vmatprep.mubr.msk.bf16.mxu0 %vm4168_vm0, %v4167_v0  ;;  %3763 = vmatpush3.bf16.msra.mxu0 %v4055_v56 }
 0xa2c   :  { %v1130_v43 = vpack.c.bf16 %v1128_v46, %v1128_v46  ;;  %3764 = vmatprep.subr.bf16.mxu0 %v4167_v0 }
 0xa2e   :  { %3759 = vmatmul.mubr.msk.bf16.vlgmr.msra.gmra.mrb[40].mxu1 %vm341_vm3, %v1130_v43 }
 0xa2f   :  { %3774 = vmatprep.mubr.msk.bf16.mxu1 %vm4168_vm0, %v4167_v0  ;;  %3765 = vmatpush3.bf16.msra.mxu0 %v4056_v57  ;;  %v3385_v57 = vld [vmem:[%s5022_s11] ss:$0 sm:$0xff] }
 0xa30   :  { %3778 = vmatprep.subr.bf16.mxu0 %v4167_v0 }
 0xafd   :  { %v1173_v58 = vpop.f32.mrb[32].mxu0 }
 0xafe   :  { %v3754_v59 = vpop.f32.mrb[33].mxu0 }
 0xaff   :  { %v1176_v60 = vpop.f32.mrb[34].mxu0 }
 0xb00   :  { %v3755_v61 = vpop.f32.mrb[35].mxu0 }
 0xb01   :  { %v1221_v62 = vpop.f32.mrb[40].mxu1  ;;  %v3386_v61 = vld [vmem:[%s5023_s12] ss:$0 sm:$0xff] }
 0xb02   :  { %v4042_v63 = vpack.i.bf16 %v1221_v62, %v1173_v58  ;;  %v3760_v1 = vpop.f32.mrb[41].mxu1 }
 0xb03   :  { %v1224_v2 = vpop.f32.mrb[42].mxu1 }
 0xb04   :  { %4043 = vrot.lane.b32.xlu0 %v4042_v63, %s5039_s0  ;;  %v3761_v3 = vpop.f32.mrb[43].mxu1 }
 0xb05   :  { %v4065_v3 = vld [vmem:[%s5021_s15 + $0x30] sm:$0xff]  }
 0xb76   :  { %v4044_v9 = vpop.permute.xlu0 %4043 }
 0xb77   :  { %v4046_v12 = vunpack.i.h.bf16 %v4044_v9  ;;  %v4045_v15 = vunpack.i.l.bf16 %v4044_v9 }
 0xb79   :  { %v1257_v19 = vsel %vm1255_vm5, %v1254_v17, %v4046_v12  ;;  %v1256_v20 = vsel %vm1255_vm5, %v1253_v16, %v4045_v15  ;;  %v3391_v16 = vld [vmem:[%s5025_s16] ss:$0 sm:$0xff] }
 0xb7a   :  { %v1258_v21 = vpack.c.bf16 %v1257_v19, %v1256_v20 }
 0xb7c   :  { %3767 = vmatmul.mubr.msk.bf16.vlgmr.msra.gmra.mrb[36].mxu0 %vm164_vm2, %v1258_v21 }
 0xb7d   :  { %3794 = vmatprep.mubr.msk.bf16.mxu0 %vm4168_vm0, %v4167_v0  ;;  %3779 = vmatpush3.bf16.msra.mxu0 %v4059_v18 }
 0xb7e   :  { %3780 = vmatprep.subr.bf16.mxu0 %v4167_v0 }
 0xb81   :  { %3781 = vmatpush3.bf16.msra.mxu0 %v4060_v22 }
 0xb82   :  { %3782 = vmatprep.subr.bf16.mxu0 %v4167_v0 }
 0xb85   :  { %3783 = vmatpush3.bf16.msra.mxu0 %v4061_v23  ;;  %v3400_v23 = vld [vmem:[%s5026_s17] ss:$0 sm:$0xff] }
 0xb86   :  { %3784 = vmatprep.subr.bf16.mxu0 %v4167_v0 }
 0xb89   :  { %3785 = vmatpush3.bf16.msra.mxu0 %v4062_v50 }
 0xb8a   :  { %3786 = vmatprep.subr.bf16.mxu0 %v4167_v0 }
 0xb8d   :  { %3787 = vmatpush3.bf16.msra.mxu0 %v4063_v51 }
 0xb8e   :  { %3788 = vmatprep.subr.bf16.mxu0 %v4167_v0 }
 0xb91   :  { %3789 = vmatpush3.bf16.msra.mxu0 %v4064_v52  ;;  %v3401_v52 = vld [vmem:[%s5027_s18] ss:$0 sm:$0xff] }
 0xb92   :  { %3790 = vmatprep.subr.bf16.mxu0 %v4167_v0 }
 0xb95   :  { %3791 = vmatpush3.bf16.msra.mxu0 %v4065_v3  ;;  %v4072_v3 = vld [vmem:[%s5057_s7 + $0x18] sm:$0xff]  }
 0xb96   :  { %3792 = vmatprep.subr.bf16.mxu0 %v4167_v0 }
 0xb99   :  { %3793 = vmatpush3.bf16.msra.mxu0 %v4066_v42  ;;  %v4175_v42 = vmov 1966171168  }
 0xb9a   :  { %3828 = vmatprep.subr.bf16.mxu0 %v4167_v0 }
 0xc4f   :  { %v1319_v30 = vpop.f32.mrb[36].mxu0 }
 0xc50   :  { %v1320_v24 = vadd.f32 %v3381_v25, %v1319_v30  ;;  %v3768_v26 = vpop.f32.mrb[37].mxu0 }
 0xc51   :  { %v1322_v28 = vpop.f32.mrb[38].mxu0 }
 0xc52   :  { %v1323_v29 = vadd.f32 %v3381_v25, %v1322_v28  ;;  %v3769_v31 = vpop.f32.mrb[39].mxu0  ;;  %v1326_v33 = vadd.f32 %v1320_v24, %v4336_v13 }
 0xc54   :  { %v1330_v34 = vsel %vm164_vm2, %v1326_v33, 0.0  ;;  %v1327_v35 = vadd.f32 %v1323_v29, %v4338_v14  ;;  %v4057_v14 = vld [vmem:[%s5020_s13] sm:$0xff]  }
 0xc55   :  { %1331 = vadd.xlane.f32.xlu1 %v1330_v34  ;;  %3771 = vmatpush3.bf16.msra.mxu1 %v4057_v14 }
 0xc56   :  { %v1333_v36 = vsel %vm164_vm2, %v1327_v35, 0.0  ;;  %3772 = vmatprep.subr.bf16.mxu1 %v4167_v0 }
 0xc57   :  { %1334 = vadd.xlane.f32.xlu0 %v1333_v36 }
 0xc59   :  { %3773 = vmatpush3.bf16.msra.mxu1 %v4058_v49 }
 0xc5a   :  { %3798 = vmatprep.subr.bf16.mxu1 %v4167_v0 }
 0xce2   :  { %v1332_v37 = vpop.xlane.xlu1 %1331 }
 0xce3   :  { %v1337_v38 = vmul.f32 0.03125, %v1332_v37 }
 0xce4   :  { %v1335_v39 = vpop.xlane.xlu0 %1334 }
 0xce5   :  { %v1339_v40 = vsub.f32 %v1326_v33, %v1337_v38  ;;  %v1338_v41 = vmul.f32 0.03125, %v1335_v39 }
 0xce7   :  { %v1340_v44 = vsub.f32 %v1327_v35, %v1338_v41  ;;  %v1341_v45 = vmul.f32 %v1339_v40, %v1339_v40 }
 0xce9   :  { %v1343_v48 = vsel %vm164_vm2, %v1341_v45, 0.0  ;;  %v1342_v47 = vmul.f32 %v1340_v44, %v1340_v44  ;;  %v4068_v45 = vld [vmem:[%s5054_s6 + $0x18] sm:$0xff]  }
 0xcea   :  { %1344 = vadd.xlane.f32.xlu0 %v1343_v48 }
 0xceb   :  { %v1346_v13 = vsel %vm164_vm2, %v1342_v47, 0.0 }
 0xcee   :  { %1347 = vadd.xlane.f32.xlu0 %v1346_v13 }
 0xd77   :  { %v1345_v53 = vpop.xlane.xlu0 %1344 }
 0xd78   :  { %v1349_v54 = vmul.f32 0.03125, %v1345_v53 }
 0xd7a   :  { %v1351_v27 = vadd.f32 1e-05, %v1349_v54 }
 0xd7b   :  { %v1348_v32 = vpop.xlane.xlu0 %1347 }
 0xd7c   :  { %4119 = vrsqrt.f32 %v1351_v27  ;;  %v1350_v55 = vmul.f32 0.03125, %v1348_v32 }
 0xd7e   :  { %v1352_v46 = vadd.f32 1e-05, %v1350_v55 }
 0xd80   :  { %4121 = vrsqrt.f32 %v1352_v46 }
 0xd86   :  { %v4120_v43 = vpop.eup %4119 }
 0xd87   :  { %v1355_v56 = vmul.f32 %v4120_v43, %v1339_v40 }
 0xd89   :  { %v1363_v59 = vmul.f32 %v3385_v57, %v1355_v56 }
 0xd8a   :  { %v4122_v58 = vpop.eup %4121 }
 0xd8b   :  { %v1356_v60 = vmul.f32 %v4122_v58, %v1340_v44  ;;  %v1371_v63 = vadd.f32 %v3386_v61, %v1363_v59  ;;  %v4067_v44 = vld [vmem:[%s5054_s6 + $0x10] sm:$0xff]  }
 0xd8d   :  { %v1364_v62 = vmul.f32 %v3385_v57, %v1356_v60 }
 0xd8f   :  { %v1372_v1 = vadd.f32 %v3386_v61, %v1364_v62  ;;  %v4069_v61 = vld [vmem:[%s5055_s4 + $0x10] sm:$0xff]  }
 0xd91   :  { %v1373_v2 = vpack.c.bf16 %v1372_v1, %v1371_v63 }
 0xd93   :  { %3775 = vmatmul.mubr.msk.bf16.vlgmr.msra.gmra.mrb[44].mxu1 %vm164_vm2, %v1373_v2 }
 0xd94   :  { %3802 = vmatprep.mubr.msk.bf16.mxu1 %vm4168_vm0, %v4167_v0  ;;  %3799 = vmatpush3.bf16.msra.mxu1 %v4067_v44 }
 0xd95   :  { %3800 = vmatprep.subr.bf16.mxu1 %v4167_v0 }
 0xd98   :  { %3801 = vmatpush3.bf16.msra.mxu1 %v4068_v45 }
 0xd99   :  { %3806 = vmatprep.subr.bf16.mxu1 %v4167_v0 }
 0xe66   :  { %v1434_v5 = vpop.f32.mrb[44].mxu1 }
 0xe67   :  { %v1435_v6 = vadd.f32 %v3387_v4, %v1434_v5  ;;  %v3776_v7 = vpop.f32.mrb[45].mxu1  ;;  %v1821_v5 = vlaneseq }
 0xe68   :  { %v1437_v8 = vpop.f32.mrb[46].mxu1 }
 0xe69   :  { %v1438_v9 = vadd.f32 %v3387_v4, %v1437_v8  ;;  %v3777_v10 = vpop.f32.mrb[47].mxu1  ;;  %v1441_v11 = vmax.f32 %v1435_v6, 0.0  ;;  %v1819_v4 = vunpack.c.l.s4 %v4175_v42  ;;  %v1822_v8 = vshrl.u32 %v1821_v5, 7 }
 0xe6a   :  { %v3407_v10 = vld [vmem:[%s5059_s25 + $0x1] ss:$0 sm:$0xff] }
 0xe6b   :  { %v1442_v12 = vmax.f32 %v1438_v9, 0.0  ;;  %v1820_v7 = vunpack.c.0.s8 %v1819_v4 }
 0xe6d   :  { %v1443_v15 = vpack.c.bf16 %v1442_v12, %v1441_v11 }
 0xe6f   :  { %3795 = vmatmul.mubr.bf16.vlgmr.msra.gmra.mrb[40].mxu0 %v1443_v15 }
 0xe70   :  { %3830 = vmatprep.mubr.msk.bf16.mxu0 %vm4168_vm0, %v4167_v0 }
 0xf42   :  { %v1549_v17 = vpop.f32.mrb[40].mxu0 }
 0xf43   :  { %v1550_v19 = vadd.f32 %v3391_v16, %v1549_v17  ;;  %v3796_v20 = vpop.f32.mrb[41].mxu0  ;;  %v3416_v17 = vld [vmem:[%s5058_s5 + $0x1] ss:$0 sm:$0xff]  ;;  %s5061_s5 = smov 8  }
 0xf44   :  { %v1552_v21 = vpop.f32.mrb[42].mxu0 }
 0xf45   :  { %v1553_v25 = vadd.f32 %v3391_v16, %v1552_v21  ;;  %v3797_v30 = vpop.f32.mrb[43].mxu0  ;;  %v1556_v24 = vadd.f32 %v1550_v19, %v1371_v63  ;;  %v4070_v63 = vld [vmem:[%s5055_s4 + $0x18] sm:$0xff]   ;;  %v1823_v16 = vsub.s32 %v1820_v7, %v1822_v8 }
 0xf47   :  { %v1560_v26 = vsel %vm164_vm2, %v1556_v24, 0.0  ;;  %v1557_v28 = vadd.f32 %v1553_v25, %v1372_v1  ;;  %v4071_v1 = vld [vmem:[%s5057_s7 + $0x10] sm:$0xff]  }
 0xf48   :  { %1561 = vadd.xlane.f32.xlu1 %v1560_v26 }
 0xf49   :  { %v1563_v29 = vsel %vm164_vm2, %v1557_v28, 0.0 }
 0xf4a   :  { %1564 = vadd.xlane.f32.xlu0 %v1563_v29 }
 0xfd5   :  { %v1562_v31 = vpop.xlane.xlu1 %1561 }
 0xfd6   :  { %v1566_v33 = vmul.f32 0.03125, %v1562_v31 }
 0xfd7   :  { %v1565_v34 = vpop.xlane.xlu0 %1564 }
 0xfd8   :  { %v1568_v35 = vsub.f32 %v1556_v24, %v1566_v33  ;;  %v1567_v36 = vmul.f32 0.03125, %v1565_v34  ;;  %v3425_v34 = vld [vmem:[%s5017_s8 + $0x1] ss:$0 sm:$0xff]  ;;  %s5060_s8 = smov 104  }
 0xfda   :  { %v1569_v37 = vsub.f32 %v1557_v28, %v1567_v36  ;;  %v1570_v38 = vmul.f32 %v1568_v35, %v1568_v35 }
 0xfdc   :  { %v1572_v39 = vsel %vm164_vm2, %v1570_v38, 0.0  ;;  %v1571_v40 = vmul.f32 %v1569_v37, %v1569_v37 }
 0xfdd   :  { %1573 = vadd.xlane.f32.xlu1 %v1572_v39 }
 0xfde   :  { %v1575_v41 = vsel %vm164_vm2, %v1571_v40, 0.0 }
 0xfdf   :  { %1576 = vadd.xlane.f32.xlu0 %v1575_v41 }
0x106a   :  { %v1574_v48 = vpop.xlane.xlu1 %1573 }
0x106b   :  { %v1578_v47 = vmul.f32 0.03125, %v1574_v48 }
0x106c   :  { %v1577_v13 = vpop.xlane.xlu0 %1576 }
0x106d   :  { %v1580_v14 = vadd.f32 1e-05, %v1578_v47  ;;  %v1579_v49 = vmul.f32 0.03125, %v1577_v13 }
0x106f   :  { %4123 = vrsqrt.f32 %v1580_v14  ;;  %v1581_v18 = vadd.f32 1e-05, %v1579_v49 }
0x1071   :  { %4125 = vrsqrt.f32 %v1581_v18 }
0x1079   :  { %v4124_v22 = vpop.eup %4123 }
0x107a   :  { %v1584_v50 = vmul.f32 %v4124_v22, %v1568_v35 }
0x107b   :  { %v4126_v51 = vpop.eup %4125 }
0x107c   :  { %v1592_v53 = vmul.f32 %v3400_v23, %v1584_v50  ;;  %v1585_v54 = vmul.f32 %v4126_v51, %v1569_v37 }
0x107e   :  { %v4637_v27 = vadd.f32 %v3401_v52, %v1592_v53  ;;  %v1593_v32 = vmul.f32 %v3400_v23, %v1585_v54 }
0x1080   :  { %v4639_v55 = vadd.f32 %v3401_v52, %v1593_v32  ;;  %v1603_v46 = vpack.c.bf16 %v4637_v27, %v4637_v27 }
0x1082   :  { %v1604_v43 = vpack.c.bf16 %v4639_v55, %v4639_v55  ;;  %v1620_v56 = vunpack.c.l.b16 %v1603_v46  ;;  %v1602_v2 = vpack.c.bf16 %v4639_v55, %v4637_v27 }
0x1084   :  { %v1621_v57 = vunpack.c.l.b16 %v1604_v43  ;;  %v1622_v58 = vrot.slane %v1620_v56, 7 }
0x1086   :  { %v1623_v59 = vrot.slane %v1621_v57, 6 }
0x1088   :  { %v1625_v60 = vsel %vm1624_vm6, %v1623_v59, %v1622_v58 }
0x1089   :  { %v1626_v62 = vpack.c.b16 %v1625_v60, %v1625_v60 }
0x108b   :  { %3803 = vmatmul.mubr.msk.bf16.vlgmr.msra.gmra.mrb[48].mxu1 %vm164_vm2, %v1626_v62 }
0x108c   :  { %3807 = vmatpush3.bf16.msra.mxu1 %v4069_v61  ;;  %3810 = vmatprep.mubr.msk.bf16.mxu1 %vm4168_vm0, %v4167_v0 }
0x108d   :  { %3808 = vmatprep.subr.bf16.mxu1 %v4167_v0 }
0x1090   :  { %3809 = vmatpush3.bf16.msra.mxu1 %v4070_v63 }
0x1091   :  { %3814 = vmatprep.subr.bf16.mxu1 %v4167_v0 }
0x1093   :  { %3811 = vmatmul.mubr.msk.bf16.vlgmr.msra.gmra.mrb[52].mxu1 %vm164_vm2, %v1602_v2 }
0x1094   :  { %3815 = vmatpush3.bf16.msra.mxu1 %v4071_v1  ;;  %3818 = vmatprep.mubr.msk.bf16.mxu1 %vm4168_vm0, %v4167_v0 }
0x1095   :  { %3816 = vmatprep.subr.bf16.mxu1 %v4167_v0 }
0x1098   :  { %3817 = vmatpush3.bf16.msra.mxu1 %v4072_v3 }
0x1099   :  { %3822 = vmatprep.subr.bf16.mxu1 %v4167_v0 }
0x109b   :  { %3819 = vmatmul.mubr.msk.bf16.vlgmr.msra.gmra.mrb[56].mxu1 %vm164_vm2, %v1602_v2 }
0x109c   :  { %3824 = vmatprep.mubr.msk.bf16.mxu1 %vm4168_vm0, %v4167_v0 }
0x115e   :  { %v1676_v6 = vpop.f32.mrb[48].mxu1 }
0x115f   :  { %v3804_v9 = vpop.f32.mrb[49].mxu1  ;;  %v1677_v15 = vadd.f32 %v3407_v10, %v1676_v6 }
0x1160   :  { %v1679_v11 = vpop.f32.mrb[50].mxu1 }
0x1161   :  { %v3805_v12 = vpop.f32.mrb[51].mxu1  ;;  %v1824_v20 = vrot.slane %v1677_v15, %v1823_v16 }
0x1163   :  { %v1825_v29 = vcombine.high %v1824_v20, %v1824_v20  ;;  %v1832_v35 = vrot.slane %v1824_v20, %v1823_v16 }
0x1165   :  { %v1839_v38 = vrot.slane %v1825_v29, %v1823_v16  ;;  %v4692_v44 = vpack.c.bf16 %v1832_v35, %v1832_v35 }
0x1166   :  { %v1744_v19 = vpop.f32.mrb[52].mxu1 }
0x1167   :  { %v1745_v21 = vadd.f32 %v3416_v17, %v1744_v19  ;;  %v3812_v25 = vpop.f32.mrb[53].mxu1  ;;  %v4696_v13 = vpack.c.bf16 %v1839_v38, %v1839_v38 }
0x1168   :  { %v1747_v30 = vpop.f32.mrb[54].mxu1 }
0x1169   :  { %v4679_v24 = vpack.c.bf16 %v1745_v21, %v1745_v21  ;;  %v1748_v26 = vadd.f32 %v3416_v17, %v1747_v30  ;;  %v3813_v28 = vpop.f32.mrb[55].mxu1 }
0x116b   :  { %v4681_v31 = vpack.c.bf16 %v1748_v26, %v1748_v26  ;;  %v1850_v33 = vsel %vm341_vm3, %v4679_v24, 0 }
0x116c   :  { %3823 = vmatpush3.bf16.xpose.msra.mxu1 %v1850_v33 }
0x116d   :  { %v1896_v36 = vsel %vm341_vm3, %v4681_v31, 0  ;;  %3834 = vmatprep.subr.bf16.mxu1 %v4167_v0 }
0x116e   :  { %v1810_v37 = vpop.f32.mrb[56].mxu1  ;;  %3829 = vmatpush3.bf16.xpose.msra.mxu0 %v1896_v36 }
0x116f   :  { %v1811_v39 = vadd.f32 %v3425_v34, %v1810_v37  ;;  %v3820_v40 = vpop.f32.mrb[57].mxu1  ;;  %3840 = vmatprep.subr.bf16.mxu0 %v4167_v0 }
0x1170   :  { %v1813_v41 = vpop.f32.mrb[58].mxu1 }
0x1171   :  { %v4694_v45 = vpack.c.bf16 %v1811_v39, %v1811_v39  ;;  %v1814_v48 = vadd.f32 %v3425_v34, %v1813_v41  ;;  %v3821_v47 = vpop.f32.mrb[59].mxu1 }
0x1173   :  { %v4698_v14 = vpack.c.bf16 %v1814_v48, %v1814_v48  ;;  %3825 = vmatmul.mubr.msk.bf16.vlgmr.msra.gmra.mrb[60].mxu1 %vm341_vm3, %v4692_v44  ;;  %v1971_v49 = vsel %vm465_vm4, %v4694_v45, 0 }
0x1174   :  { %3835 = vmatpush3.bf16.msra.mxu1 %v1971_v49  ;;  %3836 = vmatprep.mubr.msk.bf16.mxu1 %vm4168_vm0, %v4167_v0 }
0x1175   :  { %3831 = vmatmul.mubr.msk.bf16.vlgmr.msra.gmra.mrb[44].mxu0 %vm341_vm3, %v4696_v13  ;;  %v2017_v18 = vsel %vm465_vm4, %v4698_v14, 0  ;;  %3846 = vmatprep.subr.bf16.mxu1 %v4167_v0 }
0x1176   :  { %3841 = vmatpush3.bf16.msra.mxu0 %v2017_v18  ;;  %3842 = vmatprep.mubr.msk.bf16.mxu0 %vm4168_vm0, %v4167_v0 }
0x1177   :  { %3852 = vmatprep.subr.bf16.mxu0 %v4167_v0 }
0x1246   :  { %v1886_v22 = vpop.f32.mrb[60].mxu1 }
0x1247   :  { %v1938_v23 = vmul.f32 0.35355338, %v1886_v22  ;;  %v3826_v50 = vpop.f32.mrb[61].mxu1 }
0x1248   :  { %v1889_v51 = vpop.f32.mrb[62].mxu1  ;;  %v1932_v52 = vpop.f32.mrb[44].mxu0 }
0x1249   :  { %v1939_v53 = vmul.f32 0.35355338, %v1932_v52  ;;  %v3827_v54 = vpop.f32.mrb[63].mxu1  ;;  %v3832_v32 = vpop.f32.mrb[45].mxu0  ;;  %v1941_v46 = vsel %vm1940_vm7, %v1938_v23, -inf }
0x124a   :  { %v1935_v43 = vpop.f32.mrb[46].mxu0  ;;  %1942 = vmax.xlane.f32.xlu0 %v1941_v46 }
0x124b   :  { %v3833_v56 = vpop.f32.mrb[47].mxu0  ;;  %v1944_v57 = vsel %vm1940_vm7, %v1939_v53, -inf }
0x124c   :  { %1945 = vmax.xlane.f32.xlu1 %v1944_v57 }
0x125d   :  { %2115 = vrot.lane.b32.xlu1 %v4681_v31, %s4169_s26 }
0x12d7   :  { %v1943_v58 = vpop.xlane.xlu0 %1942 }
0x12d8   :  { %v1947_v59 = vsub.f32 %v1938_v23, %v1943_v58 }
0x12d9   :  { %v1946_v60 = vpop.xlane.xlu1 %1945 }
0x12da   :  { %v1949_v61 = vmul.f32 1.442695, %v1947_v59  ;;  %v1948_v62 = vsub.f32 %v1939_v53, %v1946_v60 }
0x12dc   :  { %4127 = vpow2.f32 %v1949_v61  ;;  %v1951_v63 = vmul.f32 1.442695, %v1948_v62 }
0x12dd   :  { %v2116_v4 = vpop.permute.xlu1 %2115 }
0x12de   :  { %4129 = vpow2.f32 %v1951_v63  ;;  %v2121_v19 = vsel %vm341_vm3, %v2116_v4, 0 }
0x12e6   :  { %v4128_v1 = vpop.eup %4127 }
0x12e7   :  { %v1953_v2 = vsel %vm1940_vm7, %v4128_v1, 0.0 }
0x12e8   :  { %v4130_v3 = vpop.eup %4129  ;;  %1954 = vadd.xlane.f32.xlu0 %v1953_v2 }
0x12e9   :  { %v1956_v42 = vsel %vm1940_vm7, %v4130_v3, 0.0 }
0x12ea   :  { %1957 = vadd.xlane.f32.xlu1 %v1956_v42 }
0x12fb   :  { %2112 = vrot.lane.b32.xlu1 %v4696_v13, %s4169_s26 }
0x12fe   :  { %2063 = vrot.lane.b32.xlu0 %v4679_v24, %s4169_s26 }
0x12ff   :  { %2060 = vrot.lane.b32.xlu1 %v4692_v44, %s4169_s26 }
0x1375   :  { %v1955_v5 = vpop.xlane.xlu0 %1954 }
0x1376   :  { %4131 = vrcp.f32 %v1955_v5 }
0x1377   :  { %v1958_v6 = vpop.xlane.xlu1 %1957 }
0x1378   :  { %4133 = vrcp.f32 %v1958_v6 }
0x1379   :  { %v2064_v10 = vpop.permute.xlu0 %2063 }
0x137a   :  { %v2069_v15 = vsel %vm341_vm3, %v2064_v10, 0 }
0x137b   :  { %v2113_v17 = vpop.permute.xlu1 %2112 }
0x137f   :  { %v2061_v20 = vpop.permute.xlu1 %2060 }
0x1380   :  { %v4132_v7 = vpop.eup %4131 }
0x1381   :  { %v1961_v8 = vmul.f32 %v4132_v7, %v4128_v1 }
0x1382   :  { %v4134_v9 = vpop.eup %4133 }
0x1383   :  { %v1962_v11 = vmul.f32 %v4134_v9, %v4130_v3  ;;  %v1963_v12 = vpack.c.bf16 %v1961_v8, %v1961_v8 }
0x1385   :  { %3837 = vmatmul.mubr.msk.bf16.vlgmr.msra.gmra.mrb[64].mxu1 %vm341_vm3, %v1963_v12  ;;  %v1964_v16 = vpack.c.bf16 %v1962_v11, %v1962_v11 }
0x1386   :  { %3847 = vmatpush3.bf16.xpose.msra.mxu1 %v2069_v15  ;;  %3848 = vmatprep.mubr.msk.bf16.mxu1 %vm4168_vm0, %v4167_v0 }
0x1387   :  { %3843 = vmatmul.mubr.msk.bf16.vlgmr.msra.gmra.mrb[48].mxu0 %vm341_vm3, %v1964_v16  ;;  %3858 = vmatprep.subr.bf16.mxu1 %v4167_v0 }
0x1388   :  { %3853 = vmatpush3.bf16.xpose.msra.mxu0 %v2121_v19  ;;  %3854 = vmatprep.mubr.msk.bf16.mxu0 %vm4168_vm0, %v4167_v0 }
0x1389   :  { %3864 = vmatprep.subr.bf16.mxu0 %v4167_v0 }
0x138d   :  { %3849 = vmatmul.mubr.msk.bf16.vlgmr.msra.gmra.mrb[68].mxu1 %vm341_vm3, %v2061_v20 }
0x138e   :  { %3860 = vmatprep.mubr.msk.bf16.mxu1 %vm4168_vm0, %v4167_v0 }
0x138f   :  { %3855 = vmatmul.mubr.msk.bf16.vlgmr.msra.gmra.mrb[52].mxu0 %vm341_vm3, %v2113_v17 }
0x1390   :  { %3866 = vmatprep.mubr.msk.bf16.mxu0 %vm4168_vm0, %v4167_v0 }
0x1458   :  { %v2007_v21 = vpop.f32.mrb[64].mxu1 }
0x1459   :  { %v3838_v25 = vpop.f32.mrb[65].mxu1 }
0x145a   :  { %v2010_v30 = vpop.f32.mrb[66].mxu1  ;;  %v2053_v26 = vpop.f32.mrb[48].mxu0 }
0x145b   :  { %v2733_v28 = vrot.slane %v2053_v26, 7  ;;  %v3839_v29 = vpop.f32.mrb[67].mxu1  ;;  %v3844_v33 = vpop.f32.mrb[49].mxu0 }
0x145c   :  { %v2056_v34 = vpop.f32.mrb[50].mxu0 }
0x145d   :  { %v3845_v35 = vpop.f32.mrb[51].mxu0  ;;  %v4743_v36 = vsel %vm1624_vm6, %v2733_v28, %v2007_v21 }
0x1460   :  { %v2105_v37 = vpop.f32.mrb[68].mxu1 }
0x1461   :  { %v2163_v38 = vmul.f32 0.35355338, %v2105_v37  ;;  %v3850_v39 = vpop.f32.mrb[69].mxu1 }
0x1462   :  { %v2108_v40 = vpop.f32.mrb[70].mxu1  ;;  %v2157_v41 = vpop.f32.mrb[52].mxu0 }
0x1463   :  { %v2164_v48 = vmul.f32 0.35355338, %v2157_v41  ;;  %v3851_v47 = vpop.f32.mrb[71].mxu1  ;;  %v3856_v49 = vpop.f32.mrb[53].mxu0  ;;  %v2165_v18 = vsel %vm1940_vm7, %v2163_v38, -inf }
0x1464   :  { %v2160_v22 = vpop.f32.mrb[54].mxu0  ;;  %2166 = vmax.xlane.f32.xlu0 %v2165_v18 }
0x1465   :  { %v3857_v23 = vpop.f32.mrb[55].mxu0  ;;  %v2168_v50 = vsel %vm1940_vm7, %v2164_v48, -inf }
0x1466   :  { %2169 = vmax.xlane.f32.xlu1 %v2168_v50 }
0x1477   :  { %2239 = vrot.lane.b32.xlu1 %v4698_v14, %s4169_s26 }
0x147b   :  { %2339 = vrot.lane.b32.xlu1 %v4681_v31, %s4170_s3 }
0x147f   :  { %2289 = vrot.lane.b32.xlu1 %v4679_v24, %s4170_s3 }
0x1483   :  { %2337 = vrot.lane.b32.xlu1 %v4696_v13, %s4170_s3 }
0x14f1   :  { %v2167_v51 = vpop.xlane.xlu0 %2166 }
0x14f2   :  { %v2171_v52 = vsub.f32 %v2163_v38, %v2167_v51 }
0x14f3   :  { %v2170_v53 = vpop.xlane.xlu1 %2169 }
0x14f4   :  { %v2173_v54 = vmul.f32 1.442695, %v2171_v52  ;;  %v2172_v32 = vsub.f32 %v2164_v48, %v2170_v53 }
0x14f6   :  { %4135 = vpow2.f32 %v2173_v54  ;;  %v2175_v46 = vmul.f32 1.442695, %v2172_v32 }
0x14f7   :  { %v2240_v43 = vpop.permute.xlu1 %2239 }
0x14f8   :  { %4137 = vpow2.f32 %v2175_v46  ;;  %v2245_v56 = vsel %vm465_vm4, %v2240_v43, 0 }
0x14f9   :  { %3865 = vmatpush3.bf16.msra.mxu0 %v2245_v56 }
0x14fa   :  { %3876 = vmatprep.subr.bf16.mxu0 %v4167_v0 }
0x14fb   :  { %v2340_v1 = vpop.permute.xlu1 %2339 }
0x14fc   :  { %v2345_v10 = vsel %vm341_vm3, %v2340_v1, 0 }
0x14ff   :  { %v2290_v6 = vpop.permute.xlu1 %2289 }
0x1500   :  { %v4136_v57 = vpop.eup %4135  ;;  %v2295_v8 = vsel %vm341_vm3, %v2290_v6, 0 }
0x1501   :  { %v2177_v58 = vsel %vm1940_vm7, %v4136_v57, 0.0 }
0x1502   :  { %v4138_v59 = vpop.eup %4137  ;;  %2178 = vadd.xlane.f32.xlu0 %v2177_v58 }
0x1503   :  { %v2180_v60 = vsel %vm1940_vm7, %v4138_v59, 0.0  ;;  %v2338_v12 = vpop.permute.xlu1 %2337 }
0x1506   :  { %2181 = vadd.xlane.f32.xlu0 %v2180_v60 }
0x151c   :  { %2190 = vrot.lane.b32.xlu0 %v4694_v45, %s4169_s26  ;;  %s5062_s26 = smov 16  }
0x1520   :  { %2287 = vrot.lane.b32.xlu0 %v4692_v44, %s4170_s3 }
0x158f   :  { %v2179_v61 = vpop.xlane.xlu0 %2178 }
0x1590   :  { %4139 = vrcp.f32 %v2179_v61 }
0x1593   :  { %v2182_v62 = vpop.xlane.xlu0 %2181 }
0x1594   :  { %4141 = vrcp.f32 %v2182_v62 }
0x1597   :  { %v2191_v63 = vpop.permute.xlu0 %2190 }
0x1598   :  { %v2196_v2 = vsel %vm465_vm4, %v2191_v63, 0 }
0x1599   :  { %3859 = vmatpush3.bf16.msra.mxu1 %v2196_v2 }
0x159a   :  { %v4140_v3 = vpop.eup %4139  ;;  %3870 = vmatprep.subr.bf16.mxu1 %v4167_v0 }
0x159b   :  { %v2185_v42 = vmul.f32 %v4140_v3, %v4136_v57  ;;  %v2288_v11 = vpop.permute.xlu0 %2287 }
0x159d   :  { %v2187_v4 = vpack.c.bf16 %v2185_v42, %v2185_v42 }
0x159e   :  { %v4142_v5 = vpop.eup %4141 }
0x159f   :  { %v2186_v7 = vmul.f32 %v4142_v5, %v4138_v59  ;;  %3861 = vmatmul.mubr.msk.bf16.vlgmr.msra.gmra.mrb[72].mxu1 %vm341_vm3, %v2187_v4 }
0x15a0   :  { %3872 = vmatprep.mubr.msk.bf16.mxu1 %vm4168_vm0, %v4167_v0 }
0x15a1   :  { %v2188_v9 = vpack.c.bf16 %v2186_v7, %v2186_v7 }
0x15a2   :  { %3871 = vmatpush3.bf16.xpose.msra.mxu1 %v2295_v8 }
0x15a3   :  { %3867 = vmatmul.mubr.msk.bf16.vlgmr.msra.gmra.mrb[56].mxu0 %vm341_vm3, %v2188_v9  ;;  %3882 = vmatprep.subr.bf16.mxu1 %v4167_v0 }
0x15a4   :  { %3877 = vmatpush3.bf16.xpose.msra.mxu0 %v2345_v10  ;;  %3878 = vmatprep.mubr.msk.bf16.mxu0 %vm4168_vm0, %v4167_v0 }
0x15a5   :  { %3888 = vmatprep.subr.bf16.mxu0 %v4167_v0 }
0x15a9   :  { %3873 = vmatmul.mubr.msk.bf16.vlgmr.msra.gmra.mrb[76].mxu1 %vm341_vm3, %v2288_v11 }
0x15aa   :  { %3884 = vmatprep.mubr.msk.bf16.mxu1 %vm4168_vm0, %v4167_v0 }
0x15ab   :  { %3879 = vmatmul.mubr.msk.bf16.vlgmr.msra.gmra.mrb[60].mxu0 %vm341_vm3, %v2338_v12 }
0x15ac   :  { %3890 = vmatprep.mubr.msk.bf16.mxu0 %vm4168_vm0, %v4167_v0 }
0x1672   :  { %v2232_v15 = vpop.f32.mrb[72].mxu1 }
0x1673   :  { %v3862_v16 = vpop.f32.mrb[73].mxu1 }
0x1674   :  { %v2235_v17 = vpop.f32.mrb[74].mxu1 }
0x1675   :  { %v3863_v19 = vpop.f32.mrb[75].mxu1 }
0x1676   :  { %v2281_v20 = vpop.f32.mrb[56].mxu0 }
0x1677   :  { %v2738_v21 = vrot.slane %v2281_v20, 7  ;;  %v3868_v25 = vpop.f32.mrb[57].mxu0 }
0x1678   :  { %v2284_v30 = vpop.f32.mrb[58].mxu0 }
0x1679   :  { %v3869_v26 = vpop.f32.mrb[59].mxu0  ;;  %v4782_v28 = vsel %vm1624_vm6, %v2738_v21, %v2232_v15 }
0x167c   :  { %v2331_v29 = vpop.f32.mrb[76].mxu1 }
0x167d   :  { %v2387_v33 = vmul.f32 0.35355338, %v2331_v29  ;;  %v3874_v34 = vpop.f32.mrb[77].mxu1 }
0x167e   :  { %v2334_v35 = vpop.f32.mrb[78].mxu1  ;;  %v2381_v37 = vpop.f32.mrb[60].mxu0 }
0x167f   :  { %v2388_v38 = vmul.f32 0.35355338, %v2381_v37  ;;  %v3875_v39 = vpop.f32.mrb[79].mxu1  ;;  %v3880_v40 = vpop.f32.mrb[61].mxu0  ;;  %v2389_v41 = vsel %vm1940_vm7, %v2387_v33, -inf }
0x1680   :  { %v2384_v48 = vpop.f32.mrb[62].mxu0  ;;  %2390 = vmax.xlane.f32.xlu0 %v2389_v41 }
0x1681   :  { %v3881_v47 = vpop.f32.mrb[63].mxu0  ;;  %v2392_v49 = vsel %vm1940_vm7, %v2388_v38, -inf }
0x1682   :  { %2393 = vmax.xlane.f32.xlu1 %v2392_v49 }
0x1693   :  { %2461 = vrot.lane.b32.xlu1 %v4698_v14, %s4170_s3 }
0x1697   :  { %2561 = vrot.lane.b32.xlu1 %v4681_v31, %s5060_s8 }
0x169b   :  { %2511 = vrot.lane.b32.xlu1 %v4679_v24, %s5060_s8 }
0x169f   :  { %2559 = vrot.lane.b32.xlu1 %v4696_v13, %s5060_s8 }
0x170d   :  { %v2391_v18 = vpop.xlane.xlu0 %2390 }
0x170e   :  { %v2395_v22 = vsub.f32 %v2387_v33, %v2391_v18 }
0x170f   :  { %v2394_v23 = vpop.xlane.xlu1 %2393 }
0x1710   :  { %v2397_v50 = vmul.f32 1.442695, %v2395_v22  ;;  %v2396_v51 = vsub.f32 %v2388_v38, %v2394_v23 }
0x1712   :  { %4143 = vpow2.f32 %v2397_v50  ;;  %v2399_v52 = vmul.f32 1.442695, %v2396_v51 }
0x1713   :  { %v2462_v53 = vpop.permute.xlu1 %2461 }
0x1714   :  { %4145 = vpow2.f32 %v2399_v52  ;;  %v2467_v54 = vsel %vm465_vm4, %v2462_v53, 0 }
0x1715   :  { %3889 = vmatpush3.bf16.msra.mxu0 %v2467_v54 }
0x1716   :  { %3900 = vmatprep.subr.bf16.mxu0 %v4167_v0 }
0x1717   :  { %v2562_v57 = vpop.permute.xlu1 %2561 }
0x1718   :  { %v2567_v3 = vsel %vm341_vm3, %v2562_v57, 0 }
0x171b   :  { %v2512_v63 = vpop.permute.xlu1 %2511 }
0x171c   :  { %v4144_v31 = vpop.eup %4143 }
0x171d   :  { %v2401_v24 = vsel %vm1940_vm7, %v4144_v31, 0.0 }
0x171e   :  { %v4146_v32 = vpop.eup %4145  ;;  %2402 = vadd.xlane.f32.xlu0 %v2401_v24 }
0x171f   :  { %v2404_v13 = vsel %vm1940_vm7, %v4146_v32, 0.0  ;;  %v2560_v4 = vpop.permute.xlu1 %2559 }
0x1722   :  { %2405 = vadd.xlane.f32.xlu0 %v2404_v13 }
0x1738   :  { %2413 = vrot.lane.b32.xlu0 %v4694_v45, %s4170_s3 }
0x173c   :  { %2509 = vrot.lane.b32.xlu0 %v4692_v44, %s5060_s8  ;;  %v2517_v44 = vsel %vm341_vm3, %v2512_v63, 0 }
0x17ab   :  { %v2403_v46 = vpop.xlane.xlu0 %2402 }
0x17ac   :  { %4147 = vrcp.f32 %v2403_v46  ;;  %v4073_v46 = vld [vmem:[%s5018_s9 + $0x10] sm:$0xff]  }
0x17af   :  { %v2406_v43 = vpop.xlane.xlu0 %2405 }
0x17b0   :  { %4149 = vrcp.f32 %v2406_v43  ;;  %v4074_v43 = vld [vmem:[%s5018_s9 + $0x18] sm:$0xff]  }
0x17b3   :  { %v2414_v56 = vpop.permute.xlu0 %2413 }
0x17b4   :  { %v2419_v58 = vsel %vm465_vm4, %v2414_v56, 0 }
0x17b5   :  { %3883 = vmatpush3.bf16.msra.mxu1 %v2419_v58 }
0x17b6   :  { %v4148_v59 = vpop.eup %4147  ;;  %3894 = vmatprep.subr.bf16.mxu1 %v4167_v0 }
0x17b7   :  { %v2409_v60 = vmul.f32 %v4148_v59, %v4144_v31  ;;  %v2510_v42 = vpop.permute.xlu0 %2509 }
0x17b9   :  { %v2411_v61 = vpack.c.bf16 %v2409_v60, %v2409_v60 }
0x17ba   :  { %v4150_v62 = vpop.eup %4149 }
0x17bb   :  { %v2410_v1 = vmul.f32 %v4150_v62, %v4146_v32  ;;  %3885 = vmatmul.mubr.msk.bf16.vlgmr.msra.gmra.mrb[80].mxu1 %vm341_vm3, %v2411_v61 }
0x17bc   :  { %3896 = vmatprep.mubr.msk.bf16.mxu1 %vm4168_vm0, %v4167_v0 }
0x17bd   :  { %v2412_v2 = vpack.c.bf16 %v2410_v1, %v2410_v1 }
0x17be   :  { %3895 = vmatpush3.bf16.xpose.msra.mxu1 %v2517_v44 }
0x17bf   :  { %3891 = vmatmul.mubr.msk.bf16.vlgmr.msra.gmra.mrb[64].mxu0 %vm341_vm3, %v2412_v2  ;;  %3906 = vmatprep.subr.bf16.mxu1 %v4167_v0 }
0x17c0   :  { %3901 = vmatpush3.bf16.xpose.msra.mxu0 %v2567_v3  ;;  %3902 = vmatprep.mubr.msk.bf16.mxu0 %vm4168_vm0, %v4167_v0 }
0x17c1   :  { %3912 = vmatprep.subr.bf16.mxu0 %v4167_v0 }
0x17c5   :  { %3897 = vmatmul.mubr.msk.bf16.vlgmr.msra.gmra.mrb[84].mxu1 %vm341_vm3, %v2510_v42 }
0x17c6   :  { %3908 = vmatprep.mubr.msk.bf16.mxu1 %vm4168_vm0, %v4167_v0 }
0x17c7   :  { %3903 = vmatmul.mubr.msk.bf16.vlgmr.msra.gmra.mrb[68].mxu0 %vm341_vm3, %v2560_v4 }
0x17c8   :  { %3914 = vmatprep.mubr.msk.bf16.mxu0 %vm4168_vm0, %v4167_v0 }
0x188e   :  { %v2455_v5 = vpop.f32.mrb[80].mxu1 }
0x188f   :  { %v3886_v6 = vpop.f32.mrb[81].mxu1 }
0x1890   :  { %v2458_v7 = vpop.f32.mrb[82].mxu1 }
0x1891   :  { %v3887_v8 = vpop.f32.mrb[83].mxu1 }
0x1892   :  { %v2503_v9 = vpop.f32.mrb[64].mxu0  ;;  %v3450_v8 = vld [vmem:[%s5019_s10 + $0x1] ss:$0 sm:$0xff] }
0x1893   :  { %v2745_v10 = vrot.slane %v2503_v9, 7  ;;  %v3892_v11 = vpop.f32.mrb[65].mxu0 }
0x1894   :  { %v2506_v12 = vpop.f32.mrb[66].mxu0 }
0x1895   :  { %v3893_v15 = vpop.f32.mrb[67].mxu0  ;;  %v2746_v16 = vsel %vm1624_vm6, %v2745_v10, %v2455_v5 }
0x1898   :  { %v2553_v17 = vpop.f32.mrb[84].mxu1 }
0x1899   :  { %v2609_v19 = vmul.f32 0.35355338, %v2553_v17  ;;  %v3898_v20 = vpop.f32.mrb[85].mxu1 }
0x189a   :  { %v2556_v21 = vpop.f32.mrb[86].mxu1  ;;  %v2603_v25 = vpop.f32.mrb[68].mxu0 }
0x189b   :  { %v2610_v30 = vmul.f32 0.35355338, %v2603_v25  ;;  %v3899_v26 = vpop.f32.mrb[87].mxu1  ;;  %v3904_v29 = vpop.f32.mrb[69].mxu0  ;;  %v2611_v33 = vsel %vm1940_vm7, %v2609_v19, -inf }
0x189c   :  { %v2606_v34 = vpop.f32.mrb[70].mxu0  ;;  %2612 = vmax.xlane.f32.xlu0 %v2611_v33 }
0x189d   :  { %v3905_v35 = vpop.f32.mrb[71].mxu0  ;;  %v2614_v37 = vsel %vm1940_vm7, %v2610_v30, -inf }
0x189e   :  { %2615 = vmax.xlane.f32.xlu1 %v2614_v37 }
0x18af   :  { %2683 = vrot.lane.b32.xlu1 %v4698_v14, %s5060_s8 }
0x18b3   :  { %2740 = vrot.lane.b32.xlu1 %v4782_v28, %s5061_s5 }
0x18b7   :  { %2747 = vrot.lane.b32.xlu1 %v2746_v16, %s5062_s26 }
0x1929   :  { %v2613_v38 = vpop.xlane.xlu0 %2612 }
0x192a   :  { %v2617_v39 = vsub.f32 %v2609_v19, %v2613_v38 }
0x192b   :  { %v2616_v40 = vpop.xlane.xlu1 %2615 }
0x192c   :  { %v2619_v41 = vmul.f32 1.442695, %v2617_v39  ;;  %v2618_v48 = vsub.f32 %v2610_v30, %v2616_v40 }
0x192e   :  { %4151 = vpow2.f32 %v2619_v41  ;;  %v2621_v47 = vmul.f32 1.442695, %v2618_v48  ;;  %v4075_v41 = vld [vmem:[%s5020_s13 + $0x10] sm:$0xff]   ;;  %v4076_v48 = vld [vmem:[%s5020_s13 + $0x18] sm:$0xff]  }
0x192f   :  { %v2684_v49 = vpop.permute.xlu1 %2683 }
0x1930   :  { %4153 = vpow2.f32 %v2621_v47  ;;  %v2689_v18 = vsel %vm465_vm4, %v2684_v49, 0  ;;  %v4077_v47 = vld [vmem:[%s5021_s15 + $0x40] sm:$0xff]   ;;  %v4078_v49 = vld [vmem:[%s5021_s15 + $0x48] sm:$0xff]  }
0x1931   :  { %3913 = vmatpush3.bf16.msra.mxu0 %v2689_v18  ;;  %v4079_v18 = vld [vmem:[%s5021_s15 + $0x50] sm:$0xff]  }
0x1932   :  { %3926 = vmatprep.subr.bf16.mxu0 %v4167_v0 }
0x1933   :  { %v2741_v2 = vpop.permute.xlu1 %2740 }
0x1934   :  { %v2757_v42 = vsel %vm341_vm3, %v4743_v36, %v2741_v2 }
0x1937   :  { %v2748_v3 = vpop.permute.xlu1 %2747 }
0x1938   :  { %v4152_v14 = vpop.eup %4151  ;;  %v2758_v4 = vsel %vm95_vm1, %v2757_v42, %v2748_v3  ;;  %v4083_v42 = vld [vmem:[%s5021_s15 + $0x70] sm:$0xff]  }
0x1939   :  { %v2623_v22 = vsel %vm1940_vm7, %v4152_v14, 0.0 }
0x193a   :  { %v4154_v28 = vpop.eup %4153  ;;  %2624 = vadd.xlane.f32.xlu0 %v2623_v22  ;;  %v4081_v22 = vld [vmem:[%s5021_s15 + $0x60] sm:$0xff]  }
0x193b   :  { %v2626_v23 = vsel %vm1940_vm7, %v4154_v28, 0.0 }
0x193e   :  { %2627 = vadd.xlane.f32.xlu0 %v2626_v23 }
0x1954   :  { %2635 = vrot.lane.b32.xlu0 %v4694_v45, %s5060_s8 }
0x19c7   :  { %v2625_v50 = vpop.xlane.xlu0 %2624 }
0x19c8   :  { %4155 = vrcp.f32 %v2625_v50 }
0x19cb   :  { %v2628_v51 = vpop.xlane.xlu0 %2627 }
0x19cc   :  { %4157 = vrcp.f32 %v2628_v51 }
0x19cf   :  { %v2636_v52 = vpop.permute.xlu0 %2635 }
0x19d0   :  { %v2641_v53 = vsel %vm465_vm4, %v2636_v52, 0 }
0x19d1   :  { %3907 = vmatpush3.bf16.msra.mxu1 %v2641_v53 }
0x19d2   :  { %v4156_v54 = vpop.eup %4155  ;;  %3918 = vmatprep.subr.bf16.mxu1 %v4167_v0 }
0x19d3   :  { %v2631_v31 = vmul.f32 %v4156_v54, %v4152_v14  ;;  %v4080_v14 = vld [vmem:[%s5021_s15 + $0x58] sm:$0xff]  }
0x19d5   :  { %v2633_v24 = vpack.c.bf16 %v2631_v31, %v2631_v31 }
0x19d6   :  { %v4158_v32 = vpop.eup %4157 }
0x19d7   :  { %v2632_v13 = vmul.f32 %v4158_v32, %v4154_v28  ;;  %3909 = vmatmul.mubr.msk.bf16.vlgmr.msra.gmra.mrb[88].mxu1 %vm341_vm3, %v2633_v24  ;;  %v4082_v28 = vld [vmem:[%s5021_s15 + $0x68] sm:$0xff]   ;;  %v3456_v32 = vld [vmem:[%s5022_s11 + $0x1] ss:$0 sm:$0xff] }
0x19d8   :  { %3922 = vmatprep.mubr.msk.bf16.mxu1 %vm4168_vm0, %v4167_v0  ;;  %3919 = vmatpush3.bf16.msra.mxu1 %v4073_v46  ;;  %v3457_v46 = vld [vmem:[%s5023_s12 + $0x1] ss:$0 sm:$0xff] }
0x19d9   :  { %v2634_v45 = vpack.c.bf16 %v2632_v13, %v2632_v13  ;;  %3920 = vmatprep.subr.bf16.mxu1 %v4167_v0 }
0x19db   :  { %3915 = vmatmul.mubr.msk.bf16.vlgmr.msra.gmra.mrb[72].mxu0 %vm341_vm3, %v2634_v45 }
0x19dc   :  { %3930 = vmatprep.mubr.msk.bf16.mxu0 %vm4168_vm0, %v4167_v0  ;;  %3921 = vmatpush3.bf16.msra.mxu1 %v4074_v43 }
0x19dd   :  { %3934 = vmatprep.subr.bf16.mxu1 %v4167_v0  ;;  %3927 = vmatpush3.bf16.msra.mxu0 %v4075_v41 }
0x19de   :  { %3928 = vmatprep.subr.bf16.mxu0 %v4167_v0 }
0x19e1   :  { %3929 = vmatpush3.bf16.msra.mxu0 %v4076_v48 }
0x19e2   :  { %3954 = vmatprep.subr.bf16.mxu0 %v4167_v0 }
0x1aaa   :  { %v2677_v56 = vpop.f32.mrb[88].mxu1 }
0x1aab   :  { %v3910_v57 = vpop.f32.mrb[89].mxu1 }
0x1aac   :  { %v2680_v58 = vpop.f32.mrb[90].mxu1 }
0x1aad   :  { %v3911_v59 = vpop.f32.mrb[91].mxu1 }
0x1aae   :  { %v2725_v60 = vpop.f32.mrb[72].mxu0 }
0x1aaf   :  { %v2752_v61 = vrot.slane %v2725_v60, 7  ;;  %v3916_v62 = vpop.f32.mrb[73].mxu0 }
0x1ab0   :  { %v2728_v63 = vpop.f32.mrb[74].mxu0 }
0x1ab1   :  { %v3917_v1 = vpop.f32.mrb[75].mxu0  ;;  %v2753_v44 = vsel %vm1624_vm6, %v2752_v61, %v2677_v56 }
0x1ab2   :  { %2754 = vrot.lane.b32.xlu1 %v2753_v44, %s5063_s24 }
0x1b24   :  { %v2755_v5 = vpop.permute.xlu1 %2754 }
0x1b25   :  { %v2759_v6 = vsel %vm1255_vm5, %v2758_v4, %v2755_v5  ;;  %v4084_v4 = vld [vmem:[%s5021_s15 + $0x78] sm:$0xff]   ;;  %v3463_v5 = vld [vmem:[%s5024_s14 + $0x1] ss:$0 sm:$0xff] }
0x1b26   :  { %v2760_v7 = vpack.c.bf16 %v2759_v6, %v2759_v6 }
0x1b28   :  { %3923 = vmatmul.mubr.msk.bf16.vlgmr.msra.gmra.mrb[92].mxu1 %vm164_vm2, %v2760_v7 }
0x1b29   :  { %3950 = vmatprep.mubr.msk.bf16.mxu1 %vm4168_vm0, %v4167_v0  ;;  %3935 = vmatpush3.bf16.msra.mxu1 %v4077_v47 }
0x1b2a   :  { %3936 = vmatprep.subr.bf16.mxu1 %v4167_v0 }
0x1b2d   :  { %3937 = vmatpush3.bf16.msra.mxu1 %v4078_v49 }
0x1b2e   :  { %3938 = vmatprep.subr.bf16.mxu1 %v4167_v0 }
0x1b31   :  { %3939 = vmatpush3.bf16.msra.mxu1 %v4079_v18 }
0x1b32   :  { %3940 = vmatprep.subr.bf16.mxu1 %v4167_v0 }
0x1b35   :  { %3941 = vmatpush3.bf16.msra.mxu1 %v4080_v14  ;;  %v4085_v14 = vld [vmem:[%s5028_s19] sm:$0xff]  }
0x1b36   :  { %3942 = vmatprep.subr.bf16.mxu1 %v4167_v0 }
0x1b39   :  { %3943 = vmatpush3.bf16.msra.mxu1 %v4081_v22  ;;  %v4086_v22 = vld [vmem:[%s5028_s19 + $0x8] sm:$0xff]  }
0x1b3a   :  { %3944 = vmatprep.subr.bf16.mxu1 %v4167_v0 }
0x1b3d   :  { %3945 = vmatpush3.bf16.msra.mxu1 %v4082_v28  ;;  %v4176_v28 = vmov 0.0|0.0  }
0x1b3e   :  { %3946 = vmatprep.subr.bf16.mxu1 %v4167_v0 }
0x1b41   :  { %3947 = vmatpush3.bf16.msra.mxu1 %v4083_v42 }
0x1b42   :  { %3948 = vmatprep.subr.bf16.mxu1 %v4167_v0 }
0x1b45   :  { %3949 = vmatpush3.bf16.msra.mxu1 %v4084_v4 }
0x1bfb   :  { %v2823_v9 = vpop.f32.mrb[92].mxu1 }
0x1bfc   :  { %v2824_v10 = vadd.f32 %v3450_v8, %v2823_v9  ;;  %v3924_v11 = vpop.f32.mrb[93].mxu1 }
0x1bfd   :  { %v2826_v12 = vpop.f32.mrb[94].mxu1 }
0x1bfe   :  { %v2830_v36 = vrot.slane %v2824_v10, 1  ;;  %v2831_v15 = vrot.slane %v2824_v10, 2  ;;  %v3925_v16 = vpop.f32.mrb[95].mxu1 }
0x1c00   :  { %v2834_v17 = vadd.f32 %v2830_v36, %v4637_v27  ;;  %v2835_v19 = vadd.f32 %v2831_v15, %v4639_v55  ;;  %v3484_v36 = vld [vmem:[%s5025_s16 + $0x1] ss:$0 sm:$0xff] }
0x1c02   :  { %v2846_v20 = vsel %vm2845_vm8, %v2834_v17, 0.0  ;;  %v2842_v21 = vrot.slane %v2835_v19, 7 }
0x1c03   :  { %2847 = vadd.xlane.f32.xlu1 %v2846_v20 }
0x1c04   :  { %v2850_v25 = vsel %vm2849_vm9, %v2842_v21, 0.0 }
0x1c05   :  { %2851 = vadd.xlane.f32.xlu0 %v2850_v25 }
0x1c90   :  { %v2848_v30 = vpop.xlane.xlu1 %2847 }
0x1c91   :  { %v2853_v33 = vmul.f32 0.03125, %v2848_v30 }
0x1c92   :  { %v2852_v26 = vpop.xlane.xlu0 %2851 }
0x1c93   :  { %v2854_v29 = vmul.f32 0.03125, %v2852_v26  ;;  %v2860_v37 = vsub.f32 %v2834_v17, %v2853_v33 }
0x1c95   :  { %v2857_v34 = vrot.slane %v2854_v29, 1  ;;  %v2862_v55 = vmul.f32 %v2860_v37, %v2860_v37 }
0x1c97   :  { %v2861_v35 = vsub.f32 %v2835_v19, %v2857_v34  ;;  %v2869_v40 = vsel %vm2845_vm8, %v2862_v55, 0.0 }
0x1c99   :  { %v2863_v38 = vmul.f32 %v2861_v35, %v2861_v35 }
0x1c9b   :  { %v2866_v39 = vrot.slane %v2863_v38, 7 }
0x1c9d   :  { %v2872_v27 = vsel %vm2849_vm9, %v2866_v39, 0.0 }
0x1c9e   :  { %2873 = vadd.xlane.f32.xlu0 %v2872_v27 }
0x1ca2   :  { %2870 = vadd.xlane.f32.xlu0 %v2869_v40 }
0x1d2b   :  { %v2874_v23 = vpop.xlane.xlu0 %2873 }
0x1d2c   :  { %v2876_v50 = vmul.f32 0.03125, %v2874_v23 }
0x1d2e   :  { %v2878_v51 = vadd.f32 1e-05, %v2876_v50 }
0x1d2f   :  { %v2871_v52 = vpop.xlane.xlu0 %2870 }
0x1d30   :  { %4159 = vrsqrt.f32 %v2878_v51  ;;  %v2875_v53 = vmul.f32 0.03125, %v2871_v52 }
0x1d32   :  { %v2877_v54 = vadd.f32 1e-05, %v2875_v53 }
0x1d34   :  { %4161 = vrsqrt.f32 %v2877_v54 }
0x1d3a   :  { %v4160_v31 = vpop.eup %4159 }
0x1d3b   :  { %v2883_v24 = vrot.slane %v4160_v31, 1 }
0x1d3d   :  { %v2887_v13 = vmul.f32 %v2883_v24, %v2861_v35  ;;  %v3495_v24 = vld [vmem:[%s5026_s17 + $0x1] ss:$0 sm:$0xff] }
0x1d3e   :  { %v4162_v45 = vpop.eup %4161 }
0x1d3f   :  { %v2895_v43 = vmul.f32 %v3456_v32, %v2887_v13  ;;  %v2886_v56 = vmul.f32 %v4162_v45, %v2860_v37  ;;  %v3496_v45 = vld [vmem:[%s5027_s18 + $0x1] ss:$0 sm:$0xff] }
0x1d41   :  { %v2903_v57 = vadd.f32 %v3457_v46, %v2895_v43  ;;  %v2894_v58 = vmul.f32 %v3456_v32, %v2886_v56 }
0x1d43   :  { %v2905_v59 = vpack.c.bf16 %v2903_v57, %v2903_v57  ;;  %v2902_v60 = vadd.f32 %v3457_v46, %v2894_v58 }
0x1d45   :  { %v2922_v61 = vunpack.c.l.b16 %v2905_v59  ;;  %v2904_v62 = vpack.c.bf16 %v2902_v60, %v2902_v60 }
0x1d47   :  { %v2921_v63 = vunpack.c.l.b16 %v2904_v62  ;;  %v2924_v1 = vrot.slane %v2922_v61, 6 }
0x1d49   :  { %v2923_v44 = vrot.slane %v2921_v63, 7 }
0x1d4b   :  { %v2925_v2 = vsel %vm1624_vm6, %v2924_v1, %v2923_v44  ;;  %v3247_v1 = vld [vmem:[%s5029_s21] sm:$0xff]  ;;  %v3248_v44 = vld [vmem:[%s5029_s21 + $0x8] sm:$0xff] }
0x1d4c   :  { %v2926_v3 = vpack.c.b16 %v2925_v2, %v2925_v2  ;;  %v3998_v4 = vpack.c.bf16 %v3248_v44, %v3247_v1 }
0x1d4e   :  { %3931 = vmatmul.mubr.msk.bf16.vlgmr.msra.gmra.mrb[76].mxu0 %vm164_vm2, %v2926_v3 }
0x1d4f   :  { %3958 = vmatprep.mubr.msk.bf16.mxu0 %vm4168_vm0, %v4167_v0  ;;  %3955 = vmatpush3.bf16.msra.mxu0 %v4085_v14 }
0x1d50   :  { %3956 = vmatprep.subr.bf16.mxu0 %v4167_v0 }
0x1d53   :  { %3957 = vmatpush3.bf16.msra.mxu0 %v4086_v22 }
0x1d54   :  { %3997 = vmatprep.subr.bf16.mxu0 %v4176_v28 }
0x1e21   :  { %v2976_v6 = vpop.f32.mrb[76].mxu0 }
0x1e22   :  { %v2977_v7 = vadd.f32 %v3463_v5, %v2976_v6  ;;  %v3932_v8 = vpop.f32.mrb[77].mxu0  ;;  %v3249_v6 = vld [vmem:[%s5029_s21 + $0x10] sm:$0xff] }
0x1e23   :  { %v2979_v9 = vpop.f32.mrb[78].mxu0 }
0x1e24   :  { %v2982_v10 = vmax.f32 %v2977_v7, 0.0  ;;  %v3933_v11 = vpop.f32.mrb[79].mxu0  ;;  %v3250_v7 = vld [vmem:[%s5029_s21 + $0x18] sm:$0xff]  ;;  %v3251_v9 = vld [vmem:[%s5029_s21 + $0x20] sm:$0xff] }
0x1e25   :  { %v4001_v8 = vpack.c.bf16 %v3250_v7, %v3249_v6 }
0x1e26   :  { %v2983_v12 = vpack.c.bf16 %v2982_v10, %v2982_v10  ;;  %v3252_v10 = vld [vmem:[%s5029_s21 + $0x28] sm:$0xff] }
0x1e27   :  { %v4004_v11 = vpack.c.bf16 %v3252_v10, %v3251_v9 }
0x1e28   :  { %3951 = vmatmul.mubr.bf16.vlgmr.msra.gmra.mrb[96].mxu1 %v2983_v12  ;;  %v3253_v12 = vld [vmem:[%s5029_s21 + $0x30] sm:$0xff] }
0x1efb   :  { %v3091_v15 = vpop.f32.mrb[96].mxu1 }
0x1efc   :  { %v3092_v16 = vadd.f32 %v3484_v36, %v3091_v15  ;;  %v3952_v17 = vpop.f32.mrb[97].mxu1  ;;  %v3255_v15 = vld [vmem:[%s5029_s21 + $0x40] sm:$0xff] }
0x1efd   :  { %v3094_v19 = vpop.f32.mrb[98].mxu1 }
0x1efe   :  { %v3098_v20 = vrot.slane %v3092_v16, 1  ;;  %v3099_v21 = vrot.slane %v3092_v16, 2  ;;  %v3953_v25 = vpop.f32.mrb[99].mxu1  ;;  %v3256_v16 = vld [vmem:[%s5029_s21 + $0x48] sm:$0xff]  ;;  %v3257_v19 = vld [vmem:[%s5029_s21 + $0x50] sm:$0xff] }
0x1eff   :  { %v4010_v17 = vpack.c.bf16 %v3256_v16, %v3255_v15  ;;  %v3259_v25 = vld [vmem:[%s5029_s21 + $0x60] sm:$0xff] }
0x1f00   :  { %v3102_v30 = vadd.f32 %v3098_v20, %v2902_v60  ;;  %v3103_v26 = vadd.f32 %v3099_v21, %v2903_v57  ;;  %v3258_v20 = vld [vmem:[%s5029_s21 + $0x58] sm:$0xff] }
0x1f01   :  { %v4013_v21 = vpack.c.bf16 %v3258_v20, %v3257_v19 }
0x1f02   :  { %v3113_v29 = vsel %vm2845_vm8, %v3102_v30, 0.0  ;;  %v3110_v33 = vrot.slane %v3103_v26, 7 }
0x1f03   :  { %3114 = vadd.xlane.f32.xlu1 %v3113_v29  ;;  %v3261_v29 = vld [vmem:[%s5029_s21 + $0x70] sm:$0xff] }
0x1f04   :  { %v3116_v34 = vsel %vm2849_vm9, %v3110_v33, 0.0  ;;  %v3262_v33 = vld [vmem:[%s5029_s21 + $0x78] sm:$0xff] }
0x1f05   :  { %3117 = vadd.xlane.f32.xlu0 %v3116_v34  ;;  %v4019_v34 = vpack.c.bf16 %v3262_v33, %v3261_v29 }
0x1f90   :  { %v3115_v35 = vpop.xlane.xlu1 %3114 }
0x1f91   :  { %v3119_v37 = vmul.f32 0.03125, %v3115_v35  ;;  %v28_v35 = vstv %s5030_s22 }
0x1f92   :  { %v3118_v38 = vpop.xlane.xlu0 %3117  ;;  %29 = vst [vmem:[#allocation2] sm:$0x1] %v28_v35 }
0x1f93   :  { %v3126_v39 = vsub.f32 %v3102_v30, %v3119_v37  ;;  %v3120_v27 = vmul.f32 0.03125, %v3118_v38  ;;  %v3260_v30 = vld [vmem:[%s5029_s21 + $0x68] sm:$0xff]  ;;  %v3497_v37 = vld [vmem:[%s5031_s20] ss:$0 sm:$0xff] }
0x1f95   :  { %v3123_v55 = vrot.slane %v3120_v27, 1  ;;  %v3128_v40 = vmul.f32 %v3126_v39, %v3126_v39 }
0x1f97   :  { %v3127_v41 = vsub.f32 %v3103_v26, %v3123_v55  ;;  %v3135_v48 = vsel %vm2845_vm8, %v3128_v40, 0.0  ;;  %v4016_v26 = vpack.c.bf16 %v3260_v30, %v3259_v25 }
0x1f98   :  { %3136 = vadd.xlane.f32.xlu1 %v3135_v48  ;;  %v4177_v48 = vmov 0  }
0x1f99   :  { %v3129_v47 = vmul.f32 %v3127_v41, %v3127_v41  ;;  %4047 = vset.pattern.permute.xlu0 %v4177_v48 }
0x1f9b   :  { %v3132_v49 = vrot.slane %v3129_v47, 7  ;;  %v3501_v47 = vld [vmem:[#allocation2] ss:$0 sm:$0xff] }
0x1f9d   :  { %v3138_v18 = vsel %vm2849_vm9, %v3132_v49, 0.0 }
0x1f9e   :  { %3139 = vadd.xlane.f32.xlu0 %v3138_v18 }
0x2025   :  { %v3137_v23 = vpop.xlane.xlu1 %3136 }
0x2026   :  { %v3141_v50 = vmul.f32 0.03125, %v3137_v23 }
0x2028   :  { %v3143_v51 = vadd.f32 1e-05, %v3141_v50 }
0x202a   :  { %4163 = vrsqrt.f32 %v3143_v51 }
0x202b   :  { %v3140_v52 = vpop.xlane.xlu0 %3139 }
0x202c   :  { %v3142_v53 = vmul.f32 0.03125, %v3140_v52 }
0x202e   :  { %v3144_v54 = vadd.f32 1e-05, %v3142_v53 }
0x2030   :  { %4165 = vrsqrt.f32 %v3144_v54 }
0x2034   :  { %v4164_v31 = vpop.eup %4163 }
0x2035   :  { %v3152_v32 = vmul.f32 %v4164_v31, %v3126_v39 }
0x2037   :  { %v3160_v13 = vmul.f32 %v3495_v24, %v3152_v32 }
0x2039   :  { %v3168_v56 = vadd.f32 %v3496_v45, %v3160_v13 }
0x203a   :  { %v4166_v46 = vpop.eup %4165 }
0x203b   :  { %v3149_v43 = vrot.slane %v4166_v46, 1  ;;  %v3170_v59 = vpack.c.bf16 %v3168_v56, %v3168_v56 }
0x203d   :  { %v3153_v57 = vmul.f32 %v3149_v43, %v3127_v41  ;;  %v3185_v62 = vunpack.c.l.b16 %v3170_v59 }
0x203f   :  { %v3161_v58 = vmul.f32 %v3495_v24, %v3153_v57  ;;  %v3187_v2 = vrot.slane %v3185_v62, 7 }
0x2041   :  { %v3169_v60 = vadd.f32 %v3496_v45, %v3161_v58 }
0x2043   :  { %v3171_v61 = vpack.c.bf16 %v3169_v60, %v3169_v60 }
0x2045   :  { %v3186_v63 = vunpack.c.l.b16 %v3171_v61 }
0x2047   :  { %v3188_v3 = vrot.slane %v3186_v63, 6 }
0x2049   :  { %v3189_v42 = vsel %vm1624_vm6, %v3188_v3, %v3187_v2 }
0x204a   :  { %v3190_v5 = vpack.c.b16 %v3189_v42, %v3189_v42 }
0x204c   :  { %3959 = vmatmul.mubr.msk.bf16.vlgmr.msra.gmra.mrb[80].mxu0 %vm164_vm2, %v3190_v5 }
0x204d   :  { %3999 = vmatpush3.bf16.msra.mxu0 %v3998_v4  ;;  %3994 = vmatprep.mubr.msk.f32.mxu0 %vm4168_vm0, %v4167_v0  ;;  %v3254_v0 = vld [vmem:[%s5029_s21 + $0x38] sm:$0xff] }
0x204e   :  { %4000 = vmatprep.subr.bf16.mxu0 %v4176_v28  ;;  %v4007_v36 = vpack.c.bf16 %v3254_v0, %v3253_v12 }
0x2051   :  { %4002 = vmatpush3.bf16.msra.mxu0 %v4001_v8 }
0x2052   :  { %4003 = vmatprep.subr.bf16.mxu0 %v4176_v28 }
0x2055   :  { %4005 = vmatpush3.bf16.msra.mxu0 %v4004_v11 }
0x2056   :  { %4006 = vmatprep.subr.bf16.mxu0 %v4176_v28 }
0x2059   :  { %4008 = vmatpush3.bf16.msra.mxu0 %v4007_v36 }
0x205a   :  { %4009 = vmatprep.subr.bf16.mxu0 %v4176_v28 }
0x205d   :  { %4011 = vmatpush3.bf16.msra.mxu0 %v4010_v17 }
0x205e   :  { %4012 = vmatprep.subr.bf16.mxu0 %v4176_v28 }
0x2061   :  { %4014 = vmatpush3.bf16.msra.mxu0 %v4013_v21 }
0x2062   :  { %4015 = vmatprep.subr.bf16.mxu0 %v4176_v28 }
0x2065   :  { %4017 = vmatpush3.bf16.msra.mxu0 %v4016_v26 }
0x2066   :  { %4018 = vmatprep.subr.bf16.mxu0 %v4176_v28 }
0x2069   :  { %4020 = vmatpush3.bf16.msra.mxu0 %v4019_v34 }
0x211f   :  { %v3240_v38 = vpop.f32.mrb[80].mxu0 }
0x2120   :  { %v3241_v39 = vadd.f32 %v3497_v37, %v3240_v38  ;;  %v3960_v27 = vpop.f32.mrb[81].mxu0 }
0x2121   :  { %v3243_v55 = vpop.f32.mrb[82].mxu0 }
0x2122   :  { %v3246_v40 = vmax.f32 %v3241_v39, 0.0  ;;  %v3961_v41 = vpop.f32.mrb[83].mxu0 }
0x2124   :  { %3995 = vmatmul.mubr.f32.vlgmr.msra.gmra.mrb[84].mxu0 %v3246_v40 }
0x21f7   :  { %v3336_v49 = vpop.f32.mrb[84].mxu0 }
0x21f8   :  { %v3337_v18 = vadd.f32 %v3501_v47, %v3336_v49  ;;  %v3996_v14 = vpop.f32.mrb[85].mxu0 }
0x21fa   :  { %3342 = vperm.xlu0 %4047, %v3337_v18  }
0x2279   :  { %v3343_v22 = vpop.permute.xlu0 %3342 }
0x227a   :  { %3345 = vst [vmem:[%s5032_s23] sm:$0x3] %v3343_v22 }

</bundles_post_ra>
